<compile_context>
chip_gen: v7x
topology: tpu7x:2x2x1
jax: 0.10.0
libtpu: 0.0.40
codegen_flags: <defaults>
</compile_context>

<pallas_src>
import jax
import jax.numpy as jnp
from jax.experimental import pallas as pl
from jax.experimental.pallas import tpu as pltpu

NUM_OBJS = 151
NUM_RELS = 51
EMBED_DIM = 200
E_PAD = 256          # zero-padded K dim (full lanes / clean MXU K tiles)
HIDDEN_DIM = 512
H2 = HIDDEN_DIM // 2


def _round_up(x, m):
    return ((x + m - 1) // m) * m


def relation_prune_kernel(
    s_ref, o_ref, r_ref,          # (TB, E_PAD) bf16 activations
    ws_ref, wo_ref, wr_ref,       # (E_PAD, 3H) bf16 packed weights (branch-contiguous cols)
    bsor_ref,                     # (3, 3H) f32 packed biases (rows: s, o, r streams)
    w1_ref,                       # (3H, H2) bf16
    head_ref,                     # (3, H2) f32: row0 = b1, row1 = w2 (as row), row2 = b2 bcast
    out_ref,                      # (1, 1, TB) f32
):
    f32 = jnp.float32
    bf16 = jnp.bfloat16
    H = HIDDEN_DIM

    def sig(x):
        # Exact sigmoid via a single EUP transcendental (tanh).
        return 0.5 * jnp.tanh(0.5 * x) + 0.5

    def count_fusion(a, b):
        # a, b are f32 pre-activations: ReLU(a+b) - (a-b)^2
        d = a - b
        return jnp.maximum(a + b, 0.0) - d * d

    s = s_ref[...]
    o = o_ref[...]
    r = r_ref[...]

    b1 = head_ref[0:1, :]          # (1, H2)
    w2_row = head_ref[1:2, :]      # (1, H2)
    b2 = head_ref[2:3, 0:1]        # (1, 1)

    # For branch i, column slab [i*H:(i+1)*H] of each packed weight holds that
    # branch's contribution.  roles[i] selects which pre-activation plays
    # (cf_a, cf_b, proj):  0 -> x_s, 1 -> x_o, 2 -> x_r.
    roles = ((0, 1, 2),   # branch 0 (sor): sig(cf(s,o)) * sig(proj_r)
             (0, 2, 1),   # branch 1 (sro): sig(cf(s,r)) * sig(proj_o)
             (1, 2, 0))   # branch 2 (ors): sig(cf(o,r)) * sig(proj_s)

    h = None
    for i, (ia, ib, ip) in enumerate(roles):
        c0, c1 = i * H, (i + 1) * H
        xs = jnp.dot(s, ws_ref[:, c0:c1], preferred_element_type=f32) + bsor_ref[0:1, c0:c1]
        xo = jnp.dot(o, wo_ref[:, c0:c1], preferred_element_type=f32) + bsor_ref[1:2, c0:c1]
        xr = jnp.dot(r, wr_ref[:, c0:c1], preferred_element_type=f32) + bsor_ref[2:3, c0:c1]
        x = (xs, xo, xr)
        act = sig(count_fusion(x[ia], x[ib])) * sig(x[ip])      # (TB, H)
        part = jnp.dot(act.astype(bf16), w1_ref[c0:c1, :], preferred_element_type=f32)
        h = part if h is None else h + part

    h = jnp.maximum(h + b1, 0.0)                                # (TB, H2)

    # Final Linear(H2 -> 1): VPU multiply + lane reduction (no N=1 MXU pass).
    logit = jnp.sum(h * w2_row, axis=-1, keepdims=True) + b2    # (TB, 1)
    out_ref[...] = sig(logit).reshape(out_ref.shape)            # lane-dense (1,1,TB)


def init_params(key, num_objs=NUM_OBJS, num_rels=NUM_RELS,
                embed_dim=EMBED_DIM, hidden_dim=HIDDEN_DIM):
    """Deterministic synthetic parameters (JAX layout: W is (in, out)), f32."""
    keys = jax.random.split(key, 32)
    ki = iter(range(32))

    def nrm(k, shape, scale):
        return (scale * jax.random.normal(k, shape)).astype(jnp.float32)

    p = {}
    p["obj_embed_vecs"] = nrm(keys[next(ki)], (num_objs, embed_dim), 0.5)
    p["rel_embed_vecs"] = nrm(keys[next(ki)], (num_rels, embed_dim), 0.5)

    def linear(kw, kb, din, dout):
        scale = 1.0 / jnp.sqrt(jnp.float32(din))
        w = nrm(kw, (din, dout), scale)
        b = nrm(kb, (1, dout), scale)
        return w, b

    for name in ("so", "sr", "or"):
        p[f"wx_{name}"], p[f"bx_{name}"] = linear(keys[next(ki)], keys[next(ki)],
                                                  embed_dim, hidden_dim)
        p[f"wy_{name}"], p[f"by_{name}"] = linear(keys[next(ki)], keys[next(ki)],
                                                  embed_dim, hidden_dim)
    p["ws"], p["bs"] = linear(keys[next(ki)], keys[next(ki)], embed_dim, hidden_dim)
    p["wo"], p["bo"] = linear(keys[next(ki)], keys[next(ki)], embed_dim, hidden_dim)
    p["wr"], p["br"] = linear(keys[next(ki)], keys[next(ki)], embed_dim, hidden_dim)
    p["w1"], p["b1"] = linear(keys[next(ki)], keys[next(ki)],
                              3 * hidden_dim, hidden_dim // 2)
    p["w2"], p["b2"] = linear(keys[next(ki)], keys[next(ki)], hidden_dim // 2, 1)
    return p


def pack_params(params):
    """One-time packing: bf16 weights, branch-contiguous columns, K padded to 256."""
    bf16 = jnp.bfloat16
    f32 = jnp.float32

    def pad_k(w):
        return jnp.pad(w, ((0, E_PAD - EMBED_DIM), (0, 0)))

    # Column slab i belongs to branch i (0 = sor, 1 = sro, 2 = ors):
    #   w_s cols: [wx_so | wx_sr | ws   ]   roles: cf_a, cf_a, proj_s
    #   w_o cols: [wy_so | wo    | wx_or]   roles: cf_b, proj_o, cf_a
    #   w_r cols: [wr    | wy_sr | wy_or]   roles: proj_r, cf_b, cf_b
    w_s = pad_k(jnp.concatenate(
        [params["wx_so"], params["wx_sr"], params["ws"]], axis=1)).astype(bf16)
    w_o = pad_k(jnp.concatenate(
        [params["wy_so"], params["wo"], params["wx_or"]], axis=1)).astype(bf16)
    w_r = pad_k(jnp.concatenate(
        [params["wr"], params["wy_sr"], params["wy_or"]], axis=1)).astype(bf16)

    b_sor = jnp.concatenate([
        jnp.concatenate([params["bx_so"], params["bx_sr"], params["bs"]], axis=1),
        jnp.concatenate([params["by_so"], params["bo"], params["bx_or"]], axis=1),
        jnp.concatenate([params["br"], params["by_sr"], params["by_or"]], axis=1),
    ], axis=0).astype(f32)                                       # (3, 3H)

    head = jnp.concatenate([
        params["b1"],                                            # row 0: b1
        params["w2"].T,                                          # row 1: w2 as a row
        jnp.broadcast_to(params["b2"], (1, H2)),                 # row 2: b2 broadcast
    ], axis=0).astype(f32)                                       # (3, H2)

    return {
        "obj_embed_vecs": params["obj_embed_vecs"],
        "rel_embed_vecs": params["rel_embed_vecs"],
        "w_s": w_s, "w_o": w_o, "w_r": w_r,
        "b_sor": b_sor,
        "w1": params["w1"].astype(bf16),
        "head": head,
    }


@jax.jit
def relation_prune_forward(packed, sbj_token, obj_token, rel_token):
    # --- glue: embedding lookups (data-dependent gather) in plain JAX ---
    # Faithful to the PyTorch module: the obj lookup also goes through
    # sbj_embed, and both were initialised from obj_embed_vecs.
    sbj_e = jnp.take(packed["obj_embed_vecs"], sbj_token, axis=0)
    obj_e = jnp.take(packed["obj_embed_vecs"], obj_token, axis=0)
    rel_e = jnp.take(packed["rel_embed_vecs"], rel_token, axis=0)

    B = sbj_e.shape[0]
    # Batch tile: multiple of 8, capped at 256; for B > 16 pick TB so the grid
    # has >= 2 steps (lets v7x's two TensorCores both work via "parallel").
    if B <= 16:
        TB = _round_up(B, 8)
    else:
        TB = min(256, _round_up((B + 1) // 2, 8))
    padded_B = _round_up(B, TB)
    grid = padded_B // TB

    def prep(e):
        e = jnp.pad(e, ((0, padded_B - B), (0, E_PAD - EMBED_DIM)))
        return e.astype(jnp.bfloat16)

    s, o, r = prep(sbj_e), prep(obj_e), prep(rel_e)

    act_spec = pl.BlockSpec((TB, E_PAD), lambda i: (i, 0))

    def rep_spec(a):
        # Constant block index across the grid -> Pallas DMAs the weight once.
        nd = a.ndim
        return pl.BlockSpec(tuple(a.shape), lambda i, _nd=nd: (0,) * _nd)

    weight_args = [packed["w_s"], packed["w_o"], packed["w_r"],
                   packed["b_sor"], packed["w1"], packed["head"]]
    weight_specs = [rep_spec(w) for w in weight_args]

    out = pl.pallas_call(
        relation_prune_kernel,
        out_shape=jax.ShapeDtypeStruct((grid, 1, TB), jnp.float32),
        grid=(grid,),
        in_specs=[act_spec, act_spec, act_spec] + weight_specs,
        out_specs=pl.BlockSpec((1, 1, TB), lambda i: (i, 0, 0)),
        compiler_params=pltpu.CompilerParams(
            dimension_semantics=("parallel",),
            vmem_limit_bytes=32 * 1024 * 1024),
    )(s, o, r, *weight_args)
    return out.reshape(padded_B, 1)[:B]


def reference_forward(params, sbj_token, obj_token, rel_token):
    """Pure-JAX f32 reference matching the PyTorch semantics."""
    hp = jax.lax.Precision.HIGHEST

    sbj_e = jnp.take(params["obj_embed_vecs"], sbj_token, axis=0)
    obj_e = jnp.take(params["obj_embed_vecs"], obj_token, axis=0)
    rel_e = jnp.take(params["rel_embed_vecs"], rel_token, axis=0)

    def lin(x, w, b):
        return jnp.dot(x, w, precision=hp) + b

    def count_fusion(x, y, wx, bx, wy, by):
        x1 = lin(x, wx, bx)
        y1 = lin(y, wy, by)
        return jnp.maximum(x1 + y1, 0.0) - (x1 - y1) ** 2

    def sig(x):
        return 1.0 / (1.0 + jnp.exp(-x))

    fused_so = sig(count_fusion(sbj_e, obj_e, params["wx_so"], params["bx_so"],
                                params["wy_so"], params["by_so"]))
    fused_sr = sig(count_fusion(sbj_e, rel_e, params["wx_sr"], params["bx_sr"],
                                params["wy_sr"], params["by_sr"]))
    fused_or = sig(count_fusion(obj_e, rel_e, params["wx_or"], params["bx_or"],
                                params["wy_or"], params["by_or"]))
    proj_s = sig(lin(sbj_e, params["ws"], params["bs"]))
    proj_o = sig(lin(obj_e, params["wo"], params["bo"]))
    proj_r = sig(lin(rel_e, params["wr"], params["br"]))

    concat = jnp.concatenate(
        [fused_so * proj_r, fused_sr * proj_o, fused_or * proj_s], axis=-1)
    h = jnp.maximum(lin(concat, params["w1"], params["b1"]), 0.0)
    return sig(lin(h, params["w2"], params["b2"]))


if __name__ == "__main__":
    key = jax.random.PRNGKey(0)
    pkey, k1, k2, k3 = jax.random.split(key, 4)

    params = init_params(pkey)
    packed = pack_params(params)

    # B=8 exercises the single-tile path; B=24 exercises padding + a 2-step
    # "parallel" grid (TB=16, padded to 32).
    for B in (8, 24):
        kb1 = jax.random.fold_in(k1, B)
        kb2 = jax.random.fold_in(k2, B)
        kb3 = jax.random.fold_in(k3, B)
        sbj_token = jax.random.randint(kb1, (B,), 0, NUM_OBJS, dtype=jnp.int32)
        obj_token = jax.random.randint(kb2, (B,), 0, NUM_OBJS, dtype=jnp.int32)
        rel_token = jax.random.randint(kb3, (B,), 0, NUM_RELS, dtype=jnp.int32)

        logit = jax.block_until_ready(
            relation_prune_forward(packed, sbj_token, obj_token, rel_token))
        ref = jax.block_until_ready(
            reference_forward(params, sbj_token, obj_token, rel_token))

        assert logit.shape == (B, 1), logit.shape
        assert bool(jnp.all(jnp.isfinite(logit)))
        max_err = float(jnp.max(jnp.abs(logit - ref)))
        # bf16 weights/activations with f32 accumulation; the (x1-y1)^2 term
        # amplifies bf16 rounding, so allow a slightly loose (but still tight
        # for a (0,1) sigmoid output) tolerance.
        assert max_err < 3e-2, (B, max_err)

    print("KERNEL_OK")
</pallas_src>

<mosaic_0001>
module attributes {stable_mosaic.version = 11 : i64} {
  func.func @relation_prune_kernel(%arg0: i32, %arg1: memref<8x256xbf16, #tpu.memory_space<vmem>>, %arg2: memref<8x256xbf16, #tpu.memory_space<vmem>>, %arg3: memref<8x256xbf16, #tpu.memory_space<vmem>>, %arg4: memref<256x1536xbf16, #tpu.memory_space<vmem>>, %arg5: memref<256x1536xbf16, #tpu.memory_space<vmem>>, %arg6: memref<256x1536xbf16, #tpu.memory_space<vmem>>, %arg7: memref<3x1536xf32, #tpu.memory_space<vmem>>, %arg8: memref<1536x256xbf16, #tpu.memory_space<vmem>>, %arg9: memref<3x256xf32, #tpu.memory_space<vmem>>, %arg10: memref<1x1x8xf32, #tpu.memory_space<vmem>>) attributes {dimension_semantics = [#tpu.dimension_semantics<parallel>], iteration_bounds = array<i64: 1>, scalar_prefetch = 0 : i64, scratch_operands = 0 : i64, tpu.core_type = #tpu.core_type<tc>, window_params = [{transform_indices = @transform_0, window_bounds = array<i64: 8, 256>}, {transform_indices = @transform_1, window_bounds = array<i64: 8, 256>}, {transform_indices = @transform_2, window_bounds = array<i64: 8, 256>}, {pipeline_mode = #tpu.pipeline_mode<synchronous>, transform_indices = @transform_3, window_bounds = array<i64: 256, 1536>}, {pipeline_mode = #tpu.pipeline_mode<synchronous>, transform_indices = @transform_4, window_bounds = array<i64: 256, 1536>}, {pipeline_mode = #tpu.pipeline_mode<synchronous>, transform_indices = @transform_5, window_bounds = array<i64: 256, 1536>}, {pipeline_mode = #tpu.pipeline_mode<synchronous>, transform_indices = @transform_6, window_bounds = array<i64: 3, 1536>}, {pipeline_mode = #tpu.pipeline_mode<synchronous>, transform_indices = @transform_7, window_bounds = array<i64: 1536, 256>}, {pipeline_mode = #tpu.pipeline_mode<synchronous>, transform_indices = @transform_8, window_bounds = array<i64: 3, 256>}, {transform_indices = @transform_9, window_bounds = array<i64: 1, 1, 8>}]} {
    %c0 = arith.constant 0 : index
    %c0_0 = arith.constant 0 : index
    %0 = vector.load %arg1[%c0, %c0_0] : memref<8x256xbf16, #tpu.memory_space<vmem>>, vector<8x256xbf16>
    %c0_1 = arith.constant 0 : index
    %c0_2 = arith.constant 0 : index
    %1 = vector.load %arg2[%c0_1, %c0_2] : memref<8x256xbf16, #tpu.memory_space<vmem>>, vector<8x256xbf16>
    %c0_3 = arith.constant 0 : index
    %c0_4 = arith.constant 0 : index
    %2 = vector.load %arg3[%c0_3, %c0_4] : memref<8x256xbf16, #tpu.memory_space<vmem>>, vector<8x256xbf16>
    %c0_5 = arith.constant 0 : index
    %c0_6 = arith.constant 0 : index
    %3 = vector.load %arg9[%c0_5, %c0_6] : memref<3x256xf32, #tpu.memory_space<vmem>>, vector<1x256xf32>
    %c1 = arith.constant 1 : index
    %c0_7 = arith.constant 0 : index
    %4 = vector.load %arg9[%c1, %c0_7] : memref<3x256xf32, #tpu.memory_space<vmem>>, vector<1x256xf32>
    %c2 = arith.constant 2 : index
    %c0_8 = arith.constant 0 : index
    %5 = vector.load %arg9[%c2, %c0_8] : memref<3x256xf32, #tpu.memory_space<vmem>>, vector<1x1xf32>
    %c0_9 = arith.constant 0 : index
    %c0_10 = arith.constant 0 : index
    %6 = vector.load %arg4[%c0_9, %c0_10] : memref<256x1536xbf16, #tpu.memory_space<vmem>>, vector<256x512xbf16>
    %cst = arith.constant dense<0.000000e+00> : vector<8x512xf32>
    %7 = tpu.matmul %0, %6, %cst {dimension_numbers = #tpu.dot_dimension_numbers<[1], [0], [0], [1], [0, 0, 1, 1], [], []>} : vector<8x256xbf16>, vector<256x512xbf16>, vector<8x512xf32> -> vector<8x512xf32>
    %c0_11 = arith.constant 0 : index
    %c0_12 = arith.constant 0 : index
    %8 = vector.load %arg7[%c0_11, %c0_12] : memref<3x1536xf32, #tpu.memory_space<vmem>>, vector<1x512xf32>
    %9 = vector.broadcast %8 : vector<1x512xf32> to vector<8x512xf32>
    %10 = arith.addf %7, %9 : vector<8x512xf32>
    %c0_13 = arith.constant 0 : index
    %c0_14 = arith.constant 0 : index
    %11 = vector.load %arg5[%c0_13, %c0_14] : memref<256x1536xbf16, #tpu.memory_space<vmem>>, vector<256x512xbf16>
    %cst_15 = arith.constant dense<0.000000e+00> : vector<8x512xf32>
    %12 = tpu.matmul %1, %11, %cst_15 {dimension_numbers = #tpu.dot_dimension_numbers<[1], [0], [0], [1], [0, 0, 1, 1], [], []>} : vector<8x256xbf16>, vector<256x512xbf16>, vector<8x512xf32> -> vector<8x512xf32>
    %c1_16 = arith.constant 1 : index
    %c0_17 = arith.constant 0 : index
    %13 = vector.load %arg7[%c1_16, %c0_17] : memref<3x1536xf32, #tpu.memory_space<vmem>>, vector<1x512xf32>
    %14 = vector.broadcast %13 : vector<1x512xf32> to vector<8x512xf32>
    %15 = arith.addf %12, %14 : vector<8x512xf32>
    %c0_18 = arith.constant 0 : index
    %c0_19 = arith.constant 0 : index
    %16 = vector.load %arg6[%c0_18, %c0_19] : memref<256x1536xbf16, #tpu.memory_space<vmem>>, vector<256x512xbf16>
    %cst_20 = arith.constant dense<0.000000e+00> : vector<8x512xf32>
    %17 = tpu.matmul %2, %16, %cst_20 {dimension_numbers = #tpu.dot_dimension_numbers<[1], [0], [0], [1], [0, 0, 1, 1], [], []>} : vector<8x256xbf16>, vector<256x512xbf16>, vector<8x512xf32> -> vector<8x512xf32>
    %c2_21 = arith.constant 2 : index
    %c0_22 = arith.constant 0 : index
    %18 = vector.load %arg7[%c2_21, %c0_22] : memref<3x1536xf32, #tpu.memory_space<vmem>>, vector<1x512xf32>
    %19 = vector.broadcast %18 : vector<1x512xf32> to vector<8x512xf32>
    %20 = arith.addf %17, %19 : vector<8x512xf32>
    %21 = arith.subf %10, %15 : vector<8x512xf32>
    %22 = arith.addf %10, %15 : vector<8x512xf32>
    %cst_23 = arith.constant 0.000000e+00 : f32
    %23 = vector.broadcast %cst_23 : f32 to vector<8x512xf32>
    %24 = arith.maximumf %22, %23 : vector<8x512xf32>
    %25 = arith.mulf %21, %21 : vector<8x512xf32>
    %26 = arith.subf %24, %25 : vector<8x512xf32>
    %cst_24 = arith.constant 5.000000e-01 : f32
    %27 = vector.broadcast %cst_24 : f32 to vector<8x512xf32>
    %28 = arith.mulf %27, %26 : vector<8x512xf32>
    %29 = math.tanh %28 : vector<8x512xf32>
    %cst_25 = arith.constant 5.000000e-01 : f32
    %30 = vector.broadcast %cst_25 : f32 to vector<8x512xf32>
    %31 = arith.mulf %30, %29 : vector<8x512xf32>
    %cst_26 = arith.constant 5.000000e-01 : f32
    %32 = vector.broadcast %cst_26 : f32 to vector<8x512xf32>
    %33 = arith.addf %31, %32 : vector<8x512xf32>
    %cst_27 = arith.constant 5.000000e-01 : f32
    %34 = vector.broadcast %cst_27 : f32 to vector<8x512xf32>
    %35 = arith.mulf %34, %20 : vector<8x512xf32>
    %36 = math.tanh %35 : vector<8x512xf32>
    %cst_28 = arith.constant 5.000000e-01 : f32
    %37 = vector.broadcast %cst_28 : f32 to vector<8x512xf32>
    %38 = arith.mulf %37, %36 : vector<8x512xf32>
    %cst_29 = arith.constant 5.000000e-01 : f32
    %39 = vector.broadcast %cst_29 : f32 to vector<8x512xf32>
    %40 = arith.addf %38, %39 : vector<8x512xf32>
    %41 = arith.mulf %33, %40 : vector<8x512xf32>
    %42 = arith.truncf %41 : vector<8x512xf32> to vector<8x512xbf16>
    %c0_30 = arith.constant 0 : index
    %c0_31 = arith.constant 0 : index
    %43 = vector.load %arg8[%c0_30, %c0_31] : memref<1536x256xbf16, #tpu.memory_space<vmem>>, vector<512x256xbf16>
    %cst_32 = arith.constant dense<0.000000e+00> : vector<8x256xf32>
    %44 = tpu.matmul %42, %43, %cst_32 {dimension_numbers = #tpu.dot_dimension_numbers<[1], [0], [0], [1], [0, 0, 1, 1], [], []>} : vector<8x512xbf16>, vector<512x256xbf16>, vector<8x256xf32> -> vector<8x256xf32>
    %c0_33 = arith.constant 0 : index
    %c512 = arith.constant 512 : index
    %45 = vector.load %arg4[%c0_33, %c512] : memref<256x1536xbf16, #tpu.memory_space<vmem>>, vector<256x512xbf16>
    %cst_34 = arith.constant dense<0.000000e+00> : vector<8x512xf32>
    %46 = tpu.matmul %0, %45, %cst_34 {dimension_numbers = #tpu.dot_dimension_numbers<[1], [0], [0], [1], [0, 0, 1, 1], [], []>} : vector<8x256xbf16>, vector<256x512xbf16>, vector<8x512xf32> -> vector<8x512xf32>
    %c0_35 = arith.constant 0 : index
    %c512_36 = arith.constant 512 : index
    %47 = vector.load %arg7[%c0_35, %c512_36] : memref<3x1536xf32, #tpu.memory_space<vmem>>, vector<1x512xf32>
    %48 = vector.broadcast %47 : vector<1x512xf32> to vector<8x512xf32>
    %49 = arith.addf %46, %48 : vector<8x512xf32>
    %c0_37 = arith.constant 0 : index
    %c512_38 = arith.constant 512 : index
    %50 = vector.load %arg5[%c0_37, %c512_38] : memref<256x1536xbf16, #tpu.memory_space<vmem>>, vector<256x512xbf16>
    %cst_39 = arith.constant dense<0.000000e+00> : vector<8x512xf32>
    %51 = tpu.matmul %1, %50, %cst_39 {dimension_numbers = #tpu.dot_dimension_numbers<[1], [0], [0], [1], [0, 0, 1, 1], [], []>} : vector<8x256xbf16>, vector<256x512xbf16>, vector<8x512xf32> -> vector<8x512xf32>
    %c1_40 = arith.constant 1 : index
    %c512_41 = arith.constant 512 : index
    %52 = vector.load %arg7[%c1_40, %c512_41] : memref<3x1536xf32, #tpu.memory_space<vmem>>, vector<1x512xf32>
    %53 = vector.broadcast %52 : vector<1x512xf32> to vector<8x512xf32>
    %54 = arith.addf %51, %53 : vector<8x512xf32>
    %c0_42 = arith.constant 0 : index
    %c512_43 = arith.constant 512 : index
    %55 = vector.load %arg6[%c0_42, %c512_43] : memref<256x1536xbf16, #tpu.memory_space<vmem>>, vector<256x512xbf16>
    %cst_44 = arith.constant dense<0.000000e+00> : vector<8x512xf32>
    %56 = tpu.matmul %2, %55, %cst_44 {dimension_numbers = #tpu.dot_dimension_numbers<[1], [0], [0], [1], [0, 0, 1, 1], [], []>} : vector<8x256xbf16>, vector<256x512xbf16>, vector<8x512xf32> -> vector<8x512xf32>
    %c2_45 = arith.constant 2 : index
    %c512_46 = arith.constant 512 : index
    %57 = vector.load %arg7[%c2_45, %c512_46] : memref<3x1536xf32, #tpu.memory_space<vmem>>, vector<1x512xf32>
    %58 = vector.broadcast %57 : vector<1x512xf32> to vector<8x512xf32>
    %59 = arith.addf %56, %58 : vector<8x512xf32>
    %60 = arith.subf %49, %59 : vector<8x512xf32>
    %61 = arith.addf %49, %59 : vector<8x512xf32>
    %cst_47 = arith.constant 0.000000e+00 : f32
    %62 = vector.broadcast %cst_47 : f32 to vector<8x512xf32>
    %63 = arith.maximumf %61, %62 : vector<8x512xf32>
    %64 = arith.mulf %60, %60 : vector<8x512xf32>
    %65 = arith.subf %63, %64 : vector<8x512xf32>
    %cst_48 = arith.constant 5.000000e-01 : f32
    %66 = vector.broadcast %cst_48 : f32 to vector<8x512xf32>
    %67 = arith.mulf %66, %65 : vector<8x512xf32>
    %68 = math.tanh %67 : vector<8x512xf32>
    %cst_49 = arith.constant 5.000000e-01 : f32
    %69 = vector.broadcast %cst_49 : f32 to vector<8x512xf32>
    %70 = arith.mulf %69, %68 : vector<8x512xf32>
    %cst_50 = arith.constant 5.000000e-01 : f32
    %71 = vector.broadcast %cst_50 : f32 to vector<8x512xf32>
    %72 = arith.addf %70, %71 : vector<8x512xf32>
    %cst_51 = arith.constant 5.000000e-01 : f32
    %73 = vector.broadcast %cst_51 : f32 to vector<8x512xf32>
    %74 = arith.mulf %73, %54 : vector<8x512xf32>
    %75 = math.tanh %74 : vector<8x512xf32>
    %cst_52 = arith.constant 5.000000e-01 : f32
    %76 = vector.broadcast %cst_52 : f32 to vector<8x512xf32>
    %77 = arith.mulf %76, %75 : vector<8x512xf32>
    %cst_53 = arith.constant 5.000000e-01 : f32
    %78 = vector.broadcast %cst_53 : f32 to vector<8x512xf32>
    %79 = arith.addf %77, %78 : vector<8x512xf32>
    %80 = arith.mulf %72, %79 : vector<8x512xf32>
    %81 = arith.truncf %80 : vector<8x512xf32> to vector<8x512xbf16>
    %c512_54 = arith.constant 512 : index
    %c0_55 = arith.constant 0 : index
    %82 = vector.load %arg8[%c512_54, %c0_55] : memref<1536x256xbf16, #tpu.memory_space<vmem>>, vector<512x256xbf16>
    %cst_56 = arith.constant dense<0.000000e+00> : vector<8x256xf32>
    %83 = tpu.matmul %81, %82, %cst_56 {dimension_numbers = #tpu.dot_dimension_numbers<[1], [0], [0], [1], [0, 0, 1, 1], [], []>} : vector<8x512xbf16>, vector<512x256xbf16>, vector<8x256xf32> -> vector<8x256xf32>
    %84 = arith.addf %44, %83 : vector<8x256xf32>
    %c0_57 = arith.constant 0 : index
    %c1024 = arith.constant 1024 : index
    %85 = vector.load %arg4[%c0_57, %c1024] : memref<256x1536xbf16, #tpu.memory_space<vmem>>, vector<256x512xbf16>
    %cst_58 = arith.constant dense<0.000000e+00> : vector<8x512xf32>
    %86 = tpu.matmul %0, %85, %cst_58 {dimension_numbers = #tpu.dot_dimension_numbers<[1], [0], [0], [1], [0, 0, 1, 1], [], []>} : vector<8x256xbf16>, vector<256x512xbf16>, vector<8x512xf32> -> vector<8x512xf32>
    %c0_59 = arith.constant 0 : index
    %c1024_60 = arith.constant 1024 : index
    %87 = vector.load %arg7[%c0_59, %c1024_60] : memref<3x1536xf32, #tpu.memory_space<vmem>>, vector<1x512xf32>
    %88 = vector.broadcast %87 : vector<1x512xf32> to vector<8x512xf32>
    %89 = arith.addf %86, %88 : vector<8x512xf32>
    %c0_61 = arith.constant 0 : index
    %c1024_62 = arith.constant 1024 : index
    %90 = vector.load %arg5[%c0_61, %c1024_62] : memref<256x1536xbf16, #tpu.memory_space<vmem>>, vector<256x512xbf16>
    %cst_63 = arith.constant dense<0.000000e+00> : vector<8x512xf32>
    %91 = tpu.matmul %1, %90, %cst_63 {dimension_numbers = #tpu.dot_dimension_numbers<[1], [0], [0], [1], [0, 0, 1, 1], [], []>} : vector<8x256xbf16>, vector<256x512xbf16>, vector<8x512xf32> -> vector<8x512xf32>
    %c1_64 = arith.constant 1 : index
    %c1024_65 = arith.constant 1024 : index
    %92 = vector.load %arg7[%c1_64, %c1024_65] : memref<3x1536xf32, #tpu.memory_space<vmem>>, vector<1x512xf32>
    %93 = vector.broadcast %92 : vector<1x512xf32> to vector<8x512xf32>
    %94 = arith.addf %91, %93 : vector<8x512xf32>
    %c0_66 = arith.constant 0 : index
    %c1024_67 = arith.constant 1024 : index
    %95 = vector.load %arg6[%c0_66, %c1024_67] : memref<256x1536xbf16, #tpu.memory_space<vmem>>, vector<256x512xbf16>
    %cst_68 = arith.constant dense<0.000000e+00> : vector<8x512xf32>
    %96 = tpu.matmul %2, %95, %cst_68 {dimension_numbers = #tpu.dot_dimension_numbers<[1], [0], [0], [1], [0, 0, 1, 1], [], []>} : vector<8x256xbf16>, vector<256x512xbf16>, vector<8x512xf32> -> vector<8x512xf32>
    %c2_69 = arith.constant 2 : index
    %c1024_70 = arith.constant 1024 : index
    %97 = vector.load %arg7[%c2_69, %c1024_70] : memref<3x1536xf32, #tpu.memory_space<vmem>>, vector<1x512xf32>
    %98 = vector.broadcast %97 : vector<1x512xf32> to vector<8x512xf32>
    %99 = arith.addf %96, %98 : vector<8x512xf32>
    %100 = arith.subf %94, %99 : vector<8x512xf32>
    %101 = arith.addf %94, %99 : vector<8x512xf32>
    %cst_71 = arith.constant 0.000000e+00 : f32
    %102 = vector.broadcast %cst_71 : f32 to vector<8x512xf32>
    %103 = arith.maximumf %101, %102 : vector<8x512xf32>
    %104 = arith.mulf %100, %100 : vector<8x512xf32>
    %105 = arith.subf %103, %104 : vector<8x512xf32>
    %cst_72 = arith.constant 5.000000e-01 : f32
    %106 = vector.broadcast %cst_72 : f32 to vector<8x512xf32>
    %107 = arith.mulf %106, %105 : vector<8x512xf32>
    %108 = math.tanh %107 : vector<8x512xf32>
    %cst_73 = arith.constant 5.000000e-01 : f32
    %109 = vector.broadcast %cst_73 : f32 to vector<8x512xf32>
    %110 = arith.mulf %109, %108 : vector<8x512xf32>
    %cst_74 = arith.constant 5.000000e-01 : f32
    %111 = vector.broadcast %cst_74 : f32 to vector<8x512xf32>
    %112 = arith.addf %110, %111 : vector<8x512xf32>
    %cst_75 = arith.constant 5.000000e-01 : f32
    %113 = vector.broadcast %cst_75 : f32 to vector<8x512xf32>
    %114 = arith.mulf %113, %89 : vector<8x512xf32>
    %115 = math.tanh %114 : vector<8x512xf32>
    %cst_76 = arith.constant 5.000000e-01 : f32
    %116 = vector.broadcast %cst_76 : f32 to vector<8x512xf32>
    %117 = arith.mulf %116, %115 : vector<8x512xf32>
    %cst_77 = arith.constant 5.000000e-01 : f32
    %118 = vector.broadcast %cst_77 : f32 to vector<8x512xf32>
    %119 = arith.addf %117, %118 : vector<8x512xf32>
    %120 = arith.mulf %112, %119 : vector<8x512xf32>
    %121 = arith.truncf %120 : vector<8x512xf32> to vector<8x512xbf16>
    %c1024_78 = arith.constant 1024 : index
    %c0_79 = arith.constant 0 : index
    %122 = vector.load %arg8[%c1024_78, %c0_79] : memref<1536x256xbf16, #tpu.memory_space<vmem>>, vector<512x256xbf16>
    %cst_80 = arith.constant dense<0.000000e+00> : vector<8x256xf32>
    %123 = tpu.matmul %121, %122, %cst_80 {dimension_numbers = #tpu.dot_dimension_numbers<[1], [0], [0], [1], [0, 0, 1, 1], [], []>} : vector<8x512xbf16>, vector<512x256xbf16>, vector<8x256xf32> -> vector<8x256xf32>
    %124 = arith.addf %84, %123 : vector<8x256xf32>
    %125 = vector.broadcast %3 : vector<1x256xf32> to vector<8x256xf32>
    %126 = arith.addf %124, %125 : vector<8x256xf32>
    %cst_81 = arith.constant 0.000000e+00 : f32
    %127 = vector.broadcast %cst_81 : f32 to vector<8x256xf32>
    %128 = arith.maximumf %126, %127 : vector<8x256xf32>
    %129 = vector.broadcast %4 : vector<1x256xf32> to vector<8x256xf32>
    %130 = arith.mulf %128, %129 : vector<8x256xf32>
    %cst_82 = arith.constant dense<0.000000e+00> : vector<8xf32>
    %131 = vector.multi_reduction <add>, %130, %cst_82 [1] : vector<8x256xf32> to vector<8xf32>
    %132 = vector.shape_cast %131 : vector<8xf32> to vector<8x1xf32>
    %133 = vector.broadcast %5 : vector<1x1xf32> to vector<8x1xf32>
    %134 = arith.addf %132, %133 : vector<8x1xf32>
    %cst_83 = arith.constant 5.000000e-01 : f32
    %135 = vector.broadcast %cst_83 : f32 to vector<8x1xf32>
    %136 = arith.mulf %135, %134 : vector<8x1xf32>
    %137 = math.tanh %136 : vector<8x1xf32>
    %cst_84 = arith.constant 5.000000e-01 : f32
    %138 = vector.broadcast %cst_84 : f32 to vector<8x1xf32>
    %139 = arith.mulf %138, %137 : vector<8x1xf32>
    %cst_85 = arith.constant 5.000000e-01 : f32
    %140 = vector.broadcast %cst_85 : f32 to vector<8x1xf32>
    %141 = arith.addf %139, %140 : vector<8x1xf32>
    %142 = vector.shape_cast %141 : vector<8x1xf32> to vector<1x1x8xf32>
    %c0_86 = arith.constant 0 : index
    %c0_87 = arith.constant 0 : index
    %c0_88 = arith.constant 0 : index
    %143 = vector.load %arg10[%c0_86, %c0_87, %c0_88] : memref<1x1x8xf32, #tpu.memory_space<vmem>>, vector<1x1x8xf32>
    tpu.vector_store %arg10[%c0_86, %c0_87, %c0_88], %142 {strides = array<i32>} : memref<1x1x8xf32, #tpu.memory_space<vmem>>, vector<1x1x8xf32>,
    return
  }
  func.func @transform_0(%arg0: i32) -> (i32, i32) {
    %c0_i32 = arith.constant 0 : i32
    %c0_i32_0 = arith.constant 0 : i32
    return %arg0, %c0_i32 : i32, i32
  }
  func.func @transform_1(%arg0: i32) -> (i32, i32) {
    %c0_i32 = arith.constant 0 : i32
    %c0_i32_0 = arith.constant 0 : i32
    return %arg0, %c0_i32 : i32, i32
  }
  func.func @transform_2(%arg0: i32) -> (i32, i32) {
    %c0_i32 = arith.constant 0 : i32
    %c0_i32_0 = arith.constant 0 : i32
    return %arg0, %c0_i32 : i32, i32
  }
  func.func @transform_3(%arg0: i32) -> (i32, i32) {
    %c0_i32 = arith.constant 0 : i32
    %c0_i32_0 = arith.constant 0 : i32
    %c0_i32_1 = arith.constant 0 : i32
    return %c0_i32, %c0_i32_0 : i32, i32
  }
  func.func @transform_4(%arg0: i32) -> (i32, i32) {
    %c0_i32 = arith.constant 0 : i32
    %c0_i32_0 = arith.constant 0 : i32
    %c0_i32_1 = arith.constant 0 : i32
    return %c0_i32, %c0_i32_0 : i32, i32
  }
  func.func @transform_5(%arg0: i32) -> (i32, i32) {
    %c0_i32 = arith.constant 0 : i32
    %c0_i32_0 = arith.constant 0 : i32
    %c0_i32_1 = arith.constant 0 : i32
    return %c0_i32, %c0_i32_0 : i32, i32
  }
  func.func @transform_6(%arg0: i32) -> (i32, i32) {
    %c0_i32 = arith.constant 0 : i32
    %c0_i32_0 = arith.constant 0 : i32
    %c0_i32_1 = arith.constant 0 : i32
    return %c0_i32, %c0_i32_0 : i32, i32
  }
  func.func @transform_7(%arg0: i32) -> (i32, i32) {
    %c0_i32 = arith.constant 0 : i32
    %c0_i32_0 = arith.constant 0 : i32
    %c0_i32_1 = arith.constant 0 : i32
    return %c0_i32, %c0_i32_0 : i32, i32
  }
  func.func @transform_8(%arg0: i32) -> (i32, i32) {
    %c0_i32 = arith.constant 0 : i32
    %c0_i32_0 = arith.constant 0 : i32
    %c0_i32_1 = arith.constant 0 : i32
    return %c0_i32, %c0_i32_0 : i32, i32
  }
  func.func @transform_9(%arg0: i32) -> (i32, i32, i32) {
    %c0_i32 = arith.constant 0 : i32
    %c0_i32_0 = arith.constant 0 : i32
    %c0_i32_1 = arith.constant 0 : i32
    return %arg0, %c0_i32, %c0_i32_0 : i32, i32, i32
  }
}

</mosaic_0001>

<bundles_post_ra>
// kernel: relation_prune_forward.1
= control target key start
LH: loop header
LB: loop body
LE: loop exit
PB: predicated region body
PF: predicated region fallthrough
CT: control target
= control target key end

     0   :  { %14 = vsyncpa [#allocation3], 0  ;;  %s8668_s0 = inlined_call_operand.vmem [shape: bf16[8,256], index: 0, kind: input, shape index: {}]   ;;  %s8669_s1 = inlined_call_operand.vmem [shape: bf16[8,256], index: 1, kind: input, shape index: {}]   ;;  %s8670_s2 = inlined_call_operand.vmem [shape: bf16[8,256], index: 2, kind: input, shape index: {}]   ;;  %s8671_s3 = inlined_call_operand.hbm [shape: bf16[256,1536], index: 3, kind: input, shape index: {}]   ;;  %s8672_s4 = inlined_call_operand.hbm [shape: bf16[256,1536], index: 4, kind: input, shape index: {}]   ;;  %s8673_s5 = inlined_call_operand.hbm [shape: bf16[256,1536], index: 5, kind: input, shape index: {}]   ;;  %s8674_s6 = inlined_call_operand.vmem [shape: f32[3,1536], index: 6, kind: input, shape index: {}]   ;;  %s8675_s7 = inlined_call_operand.hbm [shape: bf16[1536,256], index: 7, kind: input, shape index: {}]   ;;  %s8676_s8 = inlined_call_operand.vmem [shape: f32[3,256], index: 8, kind: input, shape index: {}]   ;;  %s8677_s9 = inlined_call_operand.hbm [shape: f32[1,1,8], index: 9, kind: output, shape index: {}]  }
   0x1   :  { %15 = vsyncpa [#allocation6], 0 }
   0x2   :  { %16 = vsyncpa [#allocation9], 0 }
   0x3   :  { %17 = vsyncpa [#allocation4], 0  ;;  %s8287_s30 = smov [#allocation5]   ;;  %s8288_s11 = smov [#allocation2]  }
   0x4   :  { %s41_s10 = sshll.u32 %s8287_s30, 4  ;;  %s29_s12 = sshll.u32 %s8288_s11, 4  ;;  %s42_s10 = int_to_ptr.vmem [resolvable:$true] %s41_s10  ;;  %s8347_s12 = int_to_ptr.vmem [resolvable:$true] %s29_s12 }
   0x5   :  { %s8169_s15 = scalar_lea.hbm %s8672_s4, 24576 }
   0x6   :  { %p8170_p0 = scmp.ne.s32.totalorder %s8672_s4, %s8169_s15  ;;  %p8173_p1 = scmp.lt.u32.totalorder %s8169_s15, %s8672_s4 }
   0x8   :  { %p8175_p2 = pnand %p8173_p1, %p8170_p0 }
   0xa   :  { %8178 = shalt.err (!%p8175_p2)
}
   0xb   :  { %s8179_s20 = scalar_lea.vmem %s42_s10, 24576  ;;  %p8184_p4 = scmp.lt.s32.totalorder %s42_s10, %s42_s10 }
   0xc   :  { %p8180_p3 = scmp.ne.s32.totalorder %s42_s10, %s8179_s20  ;;  %p8185_p5 = scmp.lt.s32.totalorder %s8179_s20, %s8179_s20 }
   0xe   :  { %p8186_p6 = por %p8185_p5, %p8184_p4 }
  0x10   :  { %p8187_p7 = pnand %p8186_p6, %p8180_p3 }
  0x12   :  { %8190 = shalt.err (!%p8187_p7)
}
  0x13   :  { %s8289_s21 = smov 768   ;;  %s8290_s22 = smov 48  }
  0x14   :  { %47 = dma.hbm_to_vmem [thread:$0]  %s8672_s4, 24576, %s42_s10, [#allocation6], %s8289_s21, %s8289_s21, %s8290_s22  }
  0x15   :  { %s8191_s27 = scalar_lea.hbm %s8671_s3, 24576 }
  0x16   :  { %p8192_p8 = scmp.ne.s32.totalorder %s8671_s3, %s8191_s27  ;;  %p8195_p9 = scmp.lt.u32.totalorder %s8191_s27, %s8671_s3 }
  0x18   :  { %p8197_p10 = pnand %p8195_p9, %p8192_p8 }
  0x1a   :  { %8200 = shalt.err (!%p8197_p10)
}
  0x1b   :  { %s8201_s13 = scalar_lea.vmem %s8347_s12, 24576  ;;  %p8206_p12 = scmp.lt.s32.totalorder %s8347_s12, %s8347_s12 }
  0x1c   :  { %p8202_p11 = scmp.ne.s32.totalorder %s8347_s12, %s8201_s13  ;;  %p8207_p13 = scmp.lt.s32.totalorder %s8201_s13, %s8201_s13 }
  0x1e   :  { %p8208_p0 = por %p8207_p13, %p8206_p12 }
  0x20   :  { %p8209_p1 = pnand %p8208_p0, %p8202_p11 }
  0x22   :  { %8212 = shalt.err (!%p8209_p1)
}
  0x23   :  { %35 = dma.hbm_to_vmem [thread:$0]  %s8671_s3, 24576, %s8347_s12, [#allocation3], %s8289_s21, %s8289_s21, %s8290_s22  }
  0x24   :  { %s8291_s14 = smov [#allocation7]   ;;  %s8292_s16 = smov [#allocation8]  }
  0x25   :  { %s53_s15 = sshll.u32 %s8291_s14, 4  ;;  %s67_s17 = sshll.u32 %s8292_s16, 4  ;;  %s54_s15 = int_to_ptr.vmem [resolvable:$true] %s53_s15  ;;  %s8384_s17 = int_to_ptr.vmem [resolvable:$true] %s67_s17 }
  0x26   :  { %s8213_s20 = scalar_lea.hbm %s8673_s5, 24576 }
  0x27   :  { %p8214_p2 = scmp.ne.s32.totalorder %s8673_s5, %s8213_s20  ;;  %p8217_p3 = scmp.lt.u32.totalorder %s8213_s20, %s8673_s5 }
  0x29   :  { %p8219_p4 = pnand %p8217_p3, %p8214_p2 }
  0x2b   :  { %8222 = shalt.err (!%p8219_p4)
}
  0x2c   :  { %s8223_s3 = scalar_lea.vmem %s54_s15, 24576  ;;  %p8228_p6 = scmp.lt.s32.totalorder %s54_s15, %s54_s15 }
  0x2d   :  { %p8224_p5 = scmp.ne.s32.totalorder %s54_s15, %s8223_s3  ;;  %p8229_p7 = scmp.lt.s32.totalorder %s8223_s3, %s8223_s3 }
  0x2f   :  { %p8230_p8 = por %p8229_p7, %p8228_p6 }
  0x31   :  { %p8231_p9 = pnand %p8230_p8, %p8224_p5 }
  0x33   :  { %8234 = shalt.err (!%p8231_p9)
}
  0x34   :  { %59 = dma.hbm_to_vmem [thread:$0]  %s8673_s5, 24576, %s54_s15, [#allocation6], %s8289_s21, %s8289_s21, %s8290_s22  }
  0x35   :  { %s8235_s30 = scalar_lea.hbm %s8675_s7, 24576 }
  0x36   :  { %p8236_p10 = scmp.ne.s32.totalorder %s8675_s7, %s8235_s30  ;;  %p8239_p11 = scmp.lt.u32.totalorder %s8235_s30, %s8675_s7 }
  0x38   :  { %p8241_p12 = pnand %p8239_p11, %p8236_p10 }
  0x3a   :  { %8244 = shalt.err (!%p8241_p12)
}
  0x3b   :  { %s8245_s14 = scalar_lea.vmem %s8384_s17, 24576  ;;  %p8250_p0 = scmp.lt.s32.totalorder %s8384_s17, %s8384_s17 }
  0x3c   :  { %p8246_p13 = scmp.ne.s32.totalorder %s8384_s17, %s8245_s14  ;;  %p8251_p1 = scmp.lt.s32.totalorder %s8245_s14, %s8245_s14 }
  0x3e   :  { %p8252_p2 = por %p8251_p1, %p8250_p0 }
  0x40   :  { %p8253_p3 = pnand %p8252_p2, %p8246_p13 }
  0x42   :  { %8256 = shalt.err (!%p8253_p3)
}
  0x43   :  { %s8293_s5 = smov 128   ;;  %s8294_s21 = smov 8  }
  0x44   :  { %73 = dma.hbm_to_vmem [thread:$0]  %s8675_s7, 24576, %s8384_s17, [#allocation9], %s8293_s5, %s8293_s5, %s8294_s21  }
  0x45   :  { %8279 = dma.done.wait [#allocation3], 24576  }
  0x46   :  { %8280 = vsyncadd [#allocation3], 4294942720 }
  0x47   :  { %8281 = dma.done.wait [#allocation6], 49152  }
  0x48   :  { %8282 = vsyncadd [#allocation6], 4294918144 }
  0x49   :  { %8283 = dma.done.wait [#allocation9], 24576  }
  0x4a   :  { %8284 = vsyncadd [#allocation9], 4294942720  ;;  %v6961_v0 = vld [vmem:[#allocation2 + $0x4] ss:$48 sps:$4 sm:$0xff]   ;;  %v6963_v1 = vld [vmem:[#allocation2 + $0xc] ss:$48 sps:$4 sm:$0xff]  }
  0x4b   :  { %508 = vmatprep.subr.bf16.mxu0 %v6961_v0  ;;  %v6965_v2 = vld [vmem:[#allocation2] ss:$48 sps:$4 sm:$0xff]   ;;  %v6966_v3 = vld [vmem:[#allocation2 + $0x8] ss:$48 sps:$4 sm:$0xff]   ;;  %549 = vmatprep.subr.bf16.mxu1 %v6963_v1  ;;  %v6967_v4 = vld [vmem:[#allocation2 + $0x64] ss:$48 sps:$4 sm:$0xff]  }
  0x4c   :  { %509 = vmatpush1.bf16.msra.mxu0 %v6965_v2  ;;  %550 = vmatpush1.bf16.msra.mxu1 %v6966_v3  ;;  %v6969_v5 = vld [vmem:[#allocation2 + $0x6c] ss:$48 sps:$4 sm:$0xff]   ;;  %v6971_v6 = vld [vmem:[#allocation2 + $0x60] ss:$48 sps:$4 sm:$0xff]   ;;  %v6972_v7 = vld [vmem:[#allocation2 + $0x68] ss:$48 sps:$4 sm:$0xff]  }
  0x4d   :  { %510 = vmatprep.subr.bf16.mxu0 %v6967_v4  ;;  %551 = vmatprep.subr.bf16.mxu1 %v6969_v5  ;;  %v6973_v8 = vld [vmem:[#allocation2 + $0xc4] ss:$48 sps:$4 sm:$0xff]   ;;  %v6975_v9 = vld [vmem:[#allocation2 + $0xcc] ss:$48 sps:$4 sm:$0xff]   ;;  %v6977_v10 = vld [vmem:[#allocation2 + $0xc0] ss:$48 sps:$4 sm:$0xff]  }
  0x4e   :  { %v6978_v11 = vld [vmem:[#allocation2 + $0xc8] ss:$48 sps:$4 sm:$0xff]   ;;  %v6979_v12 = vld [vmem:[#allocation2 + $0x124] ss:$48 sps:$4 sm:$0xff]   ;;  %v6981_v13 = vld [vmem:[#allocation2 + $0x12c] ss:$48 sps:$4 sm:$0xff]  }
  0x4f   :  { %v6983_v14 = vld [vmem:[#allocation2 + $0x120] ss:$48 sps:$4 sm:$0xff]   ;;  %v6984_v15 = vld [vmem:[#allocation2 + $0x128] ss:$48 sps:$4 sm:$0xff]   ;;  %v6985_v16 = vld [vmem:[#allocation2 + $0x184] ss:$48 sps:$4 sm:$0xff]  }
  0x50   :  { %511 = vmatpush1.bf16.msra.mxu0 %v6971_v6  ;;  %552 = vmatpush1.bf16.msra.mxu1 %v6972_v7  ;;  %v6987_v17 = vld [vmem:[#allocation2 + $0x18c] ss:$48 sps:$4 sm:$0xff]   ;;  %v6989_v18 = vld [vmem:[#allocation2 + $0x180] ss:$48 sps:$4 sm:$0xff]   ;;  %v6990_v19 = vld [vmem:[#allocation2 + $0x188] ss:$48 sps:$4 sm:$0xff]  }
  0x51   :  { %512 = vmatprep.subr.bf16.mxu0 %v6973_v8  ;;  %553 = vmatprep.subr.bf16.mxu1 %v6975_v9  ;;  %v6991_v20 = vld [vmem:[#allocation2 + $0x1e4] ss:$48 sps:$4 sm:$0xff]   ;;  %v6993_v21 = vld [vmem:[#allocation2 + $0x1ec] ss:$48 sps:$4 sm:$0xff]   ;;  %v6995_v22 = vld [vmem:[#allocation2 + $0x1e0] ss:$48 sps:$4 sm:$0xff]  }
  0x52   :  { %v6996_v23 = vld [vmem:[#allocation2 + $0x1e8] ss:$48 sps:$4 sm:$0xff]   ;;  %v6997_v24 = vld [vmem:[#allocation2 + $0x244] ss:$48 sps:$4 sm:$0xff]   ;;  %v6999_v25 = vld [vmem:[#allocation2 + $0x24c] ss:$48 sps:$4 sm:$0xff]  }
  0x53   :  { %v7001_v26 = vld [vmem:[#allocation2 + $0x240] ss:$48 sps:$4 sm:$0xff]   ;;  %v7002_v27 = vld [vmem:[#allocation2 + $0x248] ss:$48 sps:$4 sm:$0xff]   ;;  %v7003_v28 = vld [vmem:[#allocation2 + $0x2a4] ss:$48 sps:$4 sm:$0xff]  }
  0x54   :  { %513 = vmatpush1.bf16.msra.mxu0 %v6977_v10  ;;  %554 = vmatpush1.bf16.msra.mxu1 %v6978_v11  ;;  %v7005_v29 = vld [vmem:[#allocation2 + $0x2ac] ss:$48 sps:$4 sm:$0xff]   ;;  %v7007_v30 = vld [vmem:[#allocation2 + $0x2a0] ss:$48 sps:$4 sm:$0xff]   ;;  %v7008_v31 = vld [vmem:[#allocation2 + $0x2a8] ss:$48 sps:$4 sm:$0xff]  }
  0x55   :  { %514 = vmatprep.subr.bf16.mxu0 %v6979_v12  ;;  %555 = vmatprep.subr.bf16.mxu1 %v6981_v13  ;;  %v7009_v32 = vld [vmem:[#allocation2 + $0x304] ss:$48 sps:$4 sm:$0xff]   ;;  %v7011_v33 = vld [vmem:[#allocation2 + $0x30c] ss:$48 sps:$4 sm:$0xff]   ;;  %v7013_v34 = vld [vmem:[#allocation2 + $0x300] ss:$48 sps:$4 sm:$0xff]  }
  0x56   :  { %v7014_v35 = vld [vmem:[#allocation2 + $0x308] ss:$48 sps:$4 sm:$0xff]   ;;  %v7015_v36 = vld [vmem:[#allocation2 + $0x364] ss:$48 sps:$4 sm:$0xff]   ;;  %v7017_v37 = vld [vmem:[#allocation2 + $0x36c] ss:$48 sps:$4 sm:$0xff]  }
  0x57   :  { %v7019_v38 = vld [vmem:[#allocation2 + $0x360] ss:$48 sps:$4 sm:$0xff]   ;;  %v7020_v39 = vld [vmem:[#allocation2 + $0x368] ss:$48 sps:$4 sm:$0xff]   ;;  %v7021_v40 = vld [vmem:[#allocation2 + $0x3c4] ss:$48 sps:$4 sm:$0xff]  }
  0x58   :  { %515 = vmatpush1.bf16.msra.mxu0 %v6983_v14  ;;  %556 = vmatpush1.bf16.msra.mxu1 %v6984_v15  ;;  %v7023_v41 = vld [vmem:[#allocation2 + $0x3cc] ss:$48 sps:$4 sm:$0xff]   ;;  %v7025_v42 = vld [vmem:[#allocation2 + $0x3c0] ss:$48 sps:$4 sm:$0xff]   ;;  %v7026_v43 = vld [vmem:[#allocation2 + $0x3c8] ss:$48 sps:$4 sm:$0xff]  }
  0x59   :  { %516 = vmatprep.subr.bf16.mxu0 %v6985_v16  ;;  %557 = vmatprep.subr.bf16.mxu1 %v6987_v17  ;;  %v7027_v44 = vld [vmem:[#allocation2 + $0x424] ss:$48 sps:$4 sm:$0xff]   ;;  %v7029_v45 = vld [vmem:[#allocation2 + $0x42c] ss:$48 sps:$4 sm:$0xff]   ;;  %v7031_v47 = vld [vmem:[#allocation2 + $0x420] ss:$48 sps:$4 sm:$0xff]  }
  0x5a   :  { %v88_v46 = vld [vmem:[%s8668_s0] sm:$0xff]  ;;  %v7032_v49 = vld [vmem:[#allocation2 + $0x428] ss:$48 sps:$4 sm:$0xff]   ;;  %v7035_v51 = vld [vmem:[#allocation2 + $0x48c] ss:$48 sps:$4 sm:$0xff]   ;;  %s8296_s16 = smov [#allocation10]  }
  0x5b   :  { %v8421_v48 = vcombine.high %v88_v46, %v88_v46  ;;  %v7033_v50 = vld [vmem:[#allocation2 + $0x484] ss:$48 sps:$4 sm:$0xff]   ;;  %v7037_v52 = vld [vmem:[#allocation2 + $0x480] ss:$48 sps:$4 sm:$0xff]   ;;  %v7038_v53 = vld [vmem:[#allocation2 + $0x488] ss:$48 sps:$4 sm:$0xff]   ;;  %v8425_v4 = vcombine.low %v88_v46, %v88_v46 }
  0x5c   :  { %517 = vmatpush1.bf16.msra.mxu0 %v6989_v18  ;;  %558 = vmatpush1.bf16.msra.mxu1 %v6990_v19  ;;  %v7039_v54 = vld [vmem:[#allocation2 + $0x4e4] ss:$48 sps:$4 sm:$0xff]   ;;  %v7041_v55 = vld [vmem:[#allocation2 + $0x4ec] ss:$48 sps:$4 sm:$0xff]   ;;  %v7043_v56 = vld [vmem:[#allocation2 + $0x4e0] ss:$48 sps:$4 sm:$0xff]  }
  0x5d   :  { %518 = vmatprep.subr.bf16.mxu0 %v6991_v20  ;;  %559 = vmatprep.subr.bf16.mxu1 %v6993_v21  ;;  %v7044_v57 = vld [vmem:[#allocation2 + $0x4e8] ss:$48 sps:$4 sm:$0xff]   ;;  %v7045_v58 = vld [vmem:[#allocation2 + $0x544] ss:$48 sps:$4 sm:$0xff]   ;;  %v7047_v59 = vld [vmem:[#allocation2 + $0x54c] ss:$48 sps:$4 sm:$0xff]  }
  0x5e   :  { %540 = vmatprep.mubr.bf16.mxu0 %v8421_v48  ;;  %581 = vmatprep.mubr.bf16.mxu1 %v8421_v48  ;;  %v7049_v60 = vld [vmem:[#allocation2 + $0x540] ss:$48 sps:$4 sm:$0xff]   ;;  %v7050_v61 = vld [vmem:[#allocation2 + $0x548] ss:$48 sps:$4 sm:$0xff]   ;;  %v7051_v62 = vld [vmem:[#allocation2 + $0x5a4] ss:$48 sps:$4 sm:$0xff]  }
  0x5f   :  { %v7053_v63 = vld [vmem:[#allocation2 + $0x5ac] ss:$48 sps:$4 sm:$0xff]   ;;  %v7055_v0 = vld [vmem:[#allocation2 + $0x5a0] ss:$48 sps:$4 sm:$0xff]   ;;  %v7056_v1 = vld [vmem:[#allocation2 + $0x5a8] ss:$48 sps:$4 sm:$0xff]  }
  0x60   :  { %519 = vmatpush1.bf16.msra.mxu0 %v6995_v22  ;;  %560 = vmatpush1.bf16.msra.mxu1 %v6996_v23  ;;  %v7061_v2 = vld [vmem:[#allocation5 + $0x4] ss:$48 sps:$4 sm:$0xff]   ;;  %v7064_v3 = vld [vmem:[#allocation5 + $0xc] ss:$48 sps:$4 sm:$0xff]   ;;  %v7059_v5 = vld [vmem:[#allocation5] ss:$48 sps:$4 sm:$0xff]  }
  0x61   :  { %520 = vmatprep.subr.bf16.mxu0 %v6997_v24  ;;  %561 = vmatprep.subr.bf16.mxu1 %v6999_v25  ;;  %v7062_v6 = vld [vmem:[#allocation5 + $0x8] ss:$48 sps:$4 sm:$0xff]   ;;  %v7067_v7 = vld [vmem:[#allocation5 + $0x64] ss:$48 sps:$4 sm:$0xff]   ;;  %v7070_v8 = vld [vmem:[#allocation5 + $0x6c] ss:$48 sps:$4 sm:$0xff]  }
  0x62   :  { %v7065_v9 = vld [vmem:[#allocation5 + $0x60] ss:$48 sps:$4 sm:$0xff]   ;;  %v7068_v10 = vld [vmem:[#allocation5 + $0x68] ss:$48 sps:$4 sm:$0xff]   ;;  %v7073_v11 = vld [vmem:[#allocation5 + $0xc4] ss:$48 sps:$4 sm:$0xff]  }
  0x63   :  { %v7076_v12 = vld [vmem:[#allocation5 + $0xcc] ss:$48 sps:$4 sm:$0xff]   ;;  %v7071_v13 = vld [vmem:[#allocation5 + $0xc0] ss:$48 sps:$4 sm:$0xff]   ;;  %v7074_v14 = vld [vmem:[#allocation5 + $0xc8] ss:$48 sps:$4 sm:$0xff]  }
  0x64   :  { %521 = vmatpush1.bf16.msra.mxu0 %v7001_v26  ;;  %562 = vmatpush1.bf16.msra.mxu1 %v7002_v27  ;;  %v7079_v15 = vld [vmem:[#allocation5 + $0x124] ss:$48 sps:$4 sm:$0xff]   ;;  %v7082_v16 = vld [vmem:[#allocation5 + $0x12c] ss:$48 sps:$4 sm:$0xff]   ;;  %v7077_v17 = vld [vmem:[#allocation5 + $0x120] ss:$48 sps:$4 sm:$0xff]  }
  0x65   :  { %522 = vmatprep.subr.bf16.mxu0 %v7003_v28  ;;  %563 = vmatprep.subr.bf16.mxu1 %v7005_v29  ;;  %v7080_v18 = vld [vmem:[#allocation5 + $0x128] ss:$48 sps:$4 sm:$0xff]   ;;  %v7085_v19 = vld [vmem:[#allocation5 + $0x184] ss:$48 sps:$4 sm:$0xff]   ;;  %v7088_v20 = vld [vmem:[#allocation5 + $0x18c] ss:$48 sps:$4 sm:$0xff]  }
  0x66   :  { %v7083_v21 = vld [vmem:[#allocation5 + $0x180] ss:$48 sps:$4 sm:$0xff]   ;;  %v7086_v22 = vld [vmem:[#allocation5 + $0x188] ss:$48 sps:$4 sm:$0xff]   ;;  %v7091_v23 = vld [vmem:[#allocation5 + $0x1e4] ss:$48 sps:$4 sm:$0xff]  }
  0x67   :  { %v7094_v24 = vld [vmem:[#allocation5 + $0x1ec] ss:$48 sps:$4 sm:$0xff]   ;;  %v7089_v25 = vld [vmem:[#allocation5 + $0x1e0] ss:$48 sps:$4 sm:$0xff]   ;;  %v7092_v26 = vld [vmem:[#allocation5 + $0x1e8] ss:$48 sps:$4 sm:$0xff]  }
  0x68   :  { %523 = vmatpush1.bf16.msra.mxu0 %v7007_v30  ;;  %564 = vmatpush1.bf16.msra.mxu1 %v7008_v31  ;;  %v7097_v27 = vld [vmem:[#allocation5 + $0x244] ss:$48 sps:$4 sm:$0xff]   ;;  %v7100_v28 = vld [vmem:[#allocation5 + $0x24c] ss:$48 sps:$4 sm:$0xff]   ;;  %v7095_v31 = vld [vmem:[#allocation5 + $0x240] ss:$48 sps:$4 sm:$0xff]  }
  0x69   :  { %524 = vmatprep.subr.bf16.mxu0 %v7009_v32  ;;  %565 = vmatprep.subr.bf16.mxu1 %v7011_v33  ;;  %v8432_v29 = vld [vmem:[%s8669_s1] sm:$0xff]  ;;  %v7098_v32 = vld [vmem:[#allocation5 + $0x248] ss:$48 sps:$4 sm:$0xff]   ;;  %v7124_v46 = vld [vmem:[#allocation5 + $0x3cc] ss:$48 sps:$4 sm:$0xff]   ;;  %s6155_s0 = sshll.u32 %s8296_s16, 4  ;;  %s6156_s0 = int_to_ptr.vmem [resolvable:$true] %s6155_s0 }
  0x6a   :  { %v8436_v30 = vcombine.high %v8432_v29, %v8432_v29  ;;  %v7103_v33 = vld [vmem:[#allocation5 + $0x2a4] ss:$48 sps:$4 sm:$0xff]   ;;  %vm6147_vm0 = vcmask 57344   ;;  %s8261_s17 = scalar_lea.vmem %s6156_s0, 32  ;;  %p8262_p5 = scmp.lt.s32.totalorder %s6156_s0, %s6156_s0 }
  0x6c   :  { %525 = vmatpush1.bf16.msra.mxu0 %v7013_v34  ;;  %566 = vmatpush1.bf16.msra.mxu1 %v7014_v35  ;;  %v7106_v34 = vld [vmem:[#allocation5 + $0x2ac] ss:$48 sps:$4 sm:$0xff]   ;;  %v7101_v35 = vld [vmem:[#allocation5 + $0x2a0] ss:$48 sps:$4 sm:$0xff]  }
  0x6d   :  { %526 = vmatprep.subr.bf16.mxu0 %v7015_v36  ;;  %567 = vmatprep.subr.bf16.mxu1 %v7017_v37  ;;  %v7104_v36 = vld [vmem:[#allocation5 + $0x2a8] ss:$48 sps:$4 sm:$0xff]   ;;  %v7109_v37 = vld [vmem:[#allocation5 + $0x304] ss:$48 sps:$4 sm:$0xff]  }
  0x70   :  { %527 = vmatpush1.bf16.msra.mxu0 %v7019_v38  ;;  %568 = vmatpush1.bf16.msra.mxu1 %v7020_v39  ;;  %v7112_v38 = vld [vmem:[#allocation5 + $0x30c] ss:$48 sps:$4 sm:$0xff]   ;;  %v7107_v39 = vld [vmem:[#allocation5 + $0x300] ss:$48 sps:$4 sm:$0xff]  }
  0x71   :  { %528 = vmatprep.subr.bf16.mxu0 %v7021_v40  ;;  %569 = vmatprep.subr.bf16.mxu1 %v7023_v41  ;;  %v7110_v40 = vld [vmem:[#allocation5 + $0x308] ss:$48 sps:$4 sm:$0xff]   ;;  %v7115_v41 = vld [vmem:[#allocation5 + $0x364] ss:$48 sps:$4 sm:$0xff]  }
  0x74   :  { %529 = vmatpush1.bf16.msra.mxu0 %v7025_v42  ;;  %570 = vmatpush1.bf16.msra.mxu1 %v7026_v43  ;;  %v7118_v42 = vld [vmem:[#allocation5 + $0x36c] ss:$48 sps:$4 sm:$0xff]   ;;  %v7113_v43 = vld [vmem:[#allocation5 + $0x360] ss:$48 sps:$4 sm:$0xff]  }
  0x75   :  { %530 = vmatprep.subr.bf16.mxu0 %v7027_v44  ;;  %571 = vmatprep.subr.bf16.mxu1 %v7029_v45  ;;  %v7116_v44 = vld [vmem:[#allocation5 + $0x368] ss:$48 sps:$4 sm:$0xff]   ;;  %v7121_v45 = vld [vmem:[#allocation5 + $0x3c4] ss:$48 sps:$4 sm:$0xff]  }
  0x78   :  { %531 = vmatpush1.bf16.msra.mxu0 %v7031_v47  ;;  %572 = vmatpush1.bf16.msra.mxu1 %v7032_v49  ;;  %v7119_v47 = vld [vmem:[#allocation5 + $0x3c0] ss:$48 sps:$4 sm:$0xff]   ;;  %v7122_v49 = vld [vmem:[#allocation5 + $0x3c8] ss:$48 sps:$4 sm:$0xff]  }
  0x79   :  { %532 = vmatprep.subr.bf16.mxu0 %v7033_v50  ;;  %573 = vmatprep.subr.bf16.mxu1 %v7035_v51  ;;  %v7127_v50 = vld [vmem:[#allocation5 + $0x424] ss:$48 sps:$4 sm:$0xff]   ;;  %v7130_v51 = vld [vmem:[#allocation5 + $0x42c] ss:$48 sps:$4 sm:$0xff]  }
  0x7c   :  { %533 = vmatpush1.bf16.msra.mxu0 %v7037_v52  ;;  %574 = vmatpush1.bf16.msra.mxu1 %v7038_v53  ;;  %v7125_v52 = vld [vmem:[#allocation5 + $0x420] ss:$48 sps:$4 sm:$0xff]   ;;  %v7128_v53 = vld [vmem:[#allocation5 + $0x428] ss:$48 sps:$4 sm:$0xff]  }
  0x7d   :  { %534 = vmatprep.subr.bf16.mxu0 %v7039_v54  ;;  %575 = vmatprep.subr.bf16.mxu1 %v7041_v55  ;;  %v7133_v54 = vld [vmem:[#allocation5 + $0x484] ss:$48 sps:$4 sm:$0xff]   ;;  %v7136_v55 = vld [vmem:[#allocation5 + $0x48c] ss:$48 sps:$4 sm:$0xff]  }
  0x80   :  { %535 = vmatpush1.bf16.msra.mxu0 %v7043_v56  ;;  %576 = vmatpush1.bf16.msra.mxu1 %v7044_v57  ;;  %v7131_v56 = vld [vmem:[#allocation5 + $0x480] ss:$48 sps:$4 sm:$0xff]   ;;  %v7134_v57 = vld [vmem:[#allocation5 + $0x488] ss:$48 sps:$4 sm:$0xff]  }
  0x81   :  { %536 = vmatprep.subr.bf16.mxu0 %v7045_v58  ;;  %577 = vmatprep.subr.bf16.mxu1 %v7047_v59  ;;  %v7139_v58 = vld [vmem:[#allocation5 + $0x4e4] ss:$48 sps:$4 sm:$0xff]   ;;  %v7142_v59 = vld [vmem:[#allocation5 + $0x4ec] ss:$48 sps:$4 sm:$0xff]  }
  0x84   :  { %537 = vmatpush1.bf16.msra.mxu0 %v7049_v60  ;;  %578 = vmatpush1.bf16.msra.mxu1 %v7050_v61  ;;  %v7137_v60 = vld [vmem:[#allocation5 + $0x4e0] ss:$48 sps:$4 sm:$0xff]   ;;  %v7140_v61 = vld [vmem:[#allocation5 + $0x4e8] ss:$48 sps:$4 sm:$0xff]  }
  0x85   :  { %538 = vmatprep.subr.bf16.mxu0 %v7051_v62  ;;  %579 = vmatprep.subr.bf16.mxu1 %v7053_v63  ;;  %v7145_v62 = vld [vmem:[#allocation5 + $0x544] ss:$48 sps:$4 sm:$0xff]   ;;  %v7148_v63 = vld [vmem:[#allocation5 + $0x54c] ss:$48 sps:$4 sm:$0xff]  }
  0x88   :  { %539 = vmatpush1.bf16.msra.mxu0 %v7055_v0  ;;  %580 = vmatpush1.bf16.msra.mxu1 %v7056_v1  ;;  %v7143_v0 = vld [vmem:[#allocation5 + $0x540] ss:$48 sps:$4 sm:$0xff]   ;;  %v7146_v1 = vld [vmem:[#allocation5 + $0x548] ss:$48 sps:$4 sm:$0xff]  }
  0x89   :  { %1004 = vmatprep.subr.bf16.mxu0 %v7061_v2  ;;  %1045 = vmatprep.subr.bf16.mxu1 %v7064_v3  ;;  %v7151_v2 = vld [vmem:[#allocation5 + $0x5a4] ss:$48 sps:$4 sm:$0xff]   ;;  %v7154_v3 = vld [vmem:[#allocation5 + $0x5ac] ss:$48 sps:$4 sm:$0xff]  }
  0x8b   :  { %541 = vmatmul.mubr.bf16.vlgmr.msra.gmra.mrb[0].mxu0 %v8425_v4  ;;  %582 = vmatmul.mubr.bf16.vlgmr.msra.gmra.mrb[0].mxu1 %v8425_v4 }
  0x8c   :  { %1005 = vmatpush1.bf16.msra.mxu0 %v7059_v5  ;;  %1046 = vmatpush1.bf16.msra.mxu1 %v7062_v6  ;;  %v7149_v5 = vld [vmem:[#allocation5 + $0x5a0] ss:$48 sps:$4 sm:$0xff]   ;;  %v7152_v6 = vld [vmem:[#allocation5 + $0x5a8] ss:$48 sps:$4 sm:$0xff]  }
  0x8d   :  { %1006 = vmatprep.subr.bf16.mxu0 %v7067_v7  ;;  %1047 = vmatprep.subr.bf16.mxu1 %v7070_v8  ;;  %v7159_v7 = vld [vmem:[#allocation7 + $0x4] ss:$48 sps:$4 sm:$0xff]   ;;  %v7162_v8 = vld [vmem:[#allocation7 + $0xc] ss:$48 sps:$4 sm:$0xff]  }
  0x8e   :  { %1036 = vmatprep.mubr.bf16.mxu0 %v8436_v30  ;;  %1077 = vmatprep.mubr.bf16.mxu1 %v8436_v30 }
  0x90   :  { %1007 = vmatpush1.bf16.msra.mxu0 %v7065_v9  ;;  %1048 = vmatpush1.bf16.msra.mxu1 %v7068_v10  ;;  %v8442_v9 = vcombine.low %v8432_v29, %v8432_v29  ;;  %v7157_v10 = vld [vmem:[#allocation7] ss:$48 sps:$4 sm:$0xff]   ;;  %v7184_v29 = vld [vmem:[#allocation7 + $0x188] ss:$48 sps:$4 sm:$0xff]  }
  0x91   :  { %1008 = vmatprep.subr.bf16.mxu0 %v7073_v11  ;;  %1049 = vmatprep.subr.bf16.mxu1 %v7076_v12  ;;  %v7160_v11 = vld [vmem:[#allocation7 + $0x8] ss:$48 sps:$4 sm:$0xff]   ;;  %v7165_v12 = vld [vmem:[#allocation7 + $0x64] ss:$48 sps:$4 sm:$0xff]  }
  0x94   :  { %1009 = vmatpush1.bf16.msra.mxu0 %v7071_v13  ;;  %1050 = vmatpush1.bf16.msra.mxu1 %v7074_v14  ;;  %v8447_v13 = vld [vmem:[%s8670_s2] sm:$0xff]  ;;  %v7168_v14 = vld [vmem:[#allocation7 + $0x6c] ss:$48 sps:$4 sm:$0xff]  }
  0x95   :  { %1010 = vmatprep.subr.bf16.mxu0 %v7079_v15  ;;  %1051 = vmatprep.subr.bf16.mxu1 %v7082_v16  ;;  %v8451_v15 = vcombine.high %v8447_v13, %v8447_v13  ;;  %v7163_v16 = vld [vmem:[#allocation7 + $0x60] ss:$48 sps:$4 sm:$0xff]  }
  0x98   :  { %1011 = vmatpush1.bf16.msra.mxu0 %v7077_v17  ;;  %1052 = vmatpush1.bf16.msra.mxu1 %v7080_v18  ;;  %v7166_v17 = vld [vmem:[#allocation7 + $0x68] ss:$48 sps:$4 sm:$0xff]   ;;  %v7171_v18 = vld [vmem:[#allocation7 + $0xc4] ss:$48 sps:$4 sm:$0xff]  }
  0x99   :  { %1012 = vmatprep.subr.bf16.mxu0 %v7085_v19  ;;  %1053 = vmatprep.subr.bf16.mxu1 %v7088_v20  ;;  %v7174_v19 = vld [vmem:[#allocation7 + $0xcc] ss:$48 sps:$4 sm:$0xff]   ;;  %v7169_v20 = vld [vmem:[#allocation7 + $0xc0] ss:$48 sps:$4 sm:$0xff]  }
  0x9c   :  { %1013 = vmatpush1.bf16.msra.mxu0 %v7083_v21  ;;  %1054 = vmatpush1.bf16.msra.mxu1 %v7086_v22  ;;  %v7172_v21 = vld [vmem:[#allocation7 + $0xc8] ss:$48 sps:$4 sm:$0xff]   ;;  %v7177_v22 = vld [vmem:[#allocation7 + $0x124] ss:$48 sps:$4 sm:$0xff]  }
  0x9d   :  { %1014 = vmatprep.subr.bf16.mxu0 %v7091_v23  ;;  %1055 = vmatprep.subr.bf16.mxu1 %v7094_v24  ;;  %v7180_v23 = vld [vmem:[#allocation7 + $0x12c] ss:$48 sps:$4 sm:$0xff]   ;;  %v7175_v24 = vld [vmem:[#allocation7 + $0x120] ss:$48 sps:$4 sm:$0xff]  }
  0xa0   :  { %1015 = vmatpush1.bf16.msra.mxu0 %v7089_v25  ;;  %1056 = vmatpush1.bf16.msra.mxu1 %v7092_v26  ;;  %v7178_v25 = vld [vmem:[#allocation7 + $0x128] ss:$48 sps:$4 sm:$0xff]   ;;  %v7183_v26 = vld [vmem:[#allocation7 + $0x184] ss:$48 sps:$4 sm:$0xff]  }
  0xa1   :  { %1016 = vmatprep.subr.bf16.mxu0 %v7097_v27  ;;  %1057 = vmatprep.subr.bf16.mxu1 %v7100_v28  ;;  %v7186_v27 = vld [vmem:[#allocation7 + $0x18c] ss:$48 sps:$4 sm:$0xff]   ;;  %v7181_v28 = vld [vmem:[#allocation7 + $0x180] ss:$48 sps:$4 sm:$0xff]  }
  0xa4   :  { %1017 = vmatpush1.bf16.msra.mxu0 %v7095_v31  ;;  %1058 = vmatpush1.bf16.msra.mxu1 %v7098_v32  ;;  %v7189_v31 = vld [vmem:[#allocation7 + $0x1e4] ss:$48 sps:$4 sm:$0xff]   ;;  %v7192_v32 = vld [vmem:[#allocation7 + $0x1ec] ss:$48 sps:$4 sm:$0xff]  }
  0xa5   :  { %1018 = vmatprep.subr.bf16.mxu0 %v7103_v33  ;;  %1059 = vmatprep.subr.bf16.mxu1 %v7106_v34  ;;  %v7187_v33 = vld [vmem:[#allocation7 + $0x1e0] ss:$48 sps:$4 sm:$0xff]   ;;  %v7190_v34 = vld [vmem:[#allocation7 + $0x1e8] ss:$48 sps:$4 sm:$0xff]  }
  0xa8   :  { %1019 = vmatpush1.bf16.msra.mxu0 %v7101_v35  ;;  %1060 = vmatpush1.bf16.msra.mxu1 %v7104_v36  ;;  %v7195_v35 = vld [vmem:[#allocation7 + $0x244] ss:$48 sps:$4 sm:$0xff]   ;;  %v7198_v36 = vld [vmem:[#allocation7 + $0x24c] ss:$48 sps:$4 sm:$0xff]  }
  0xa9   :  { %1020 = vmatprep.subr.bf16.mxu0 %v7109_v37  ;;  %1061 = vmatprep.subr.bf16.mxu1 %v7112_v38  ;;  %v7193_v37 = vld [vmem:[#allocation7 + $0x240] ss:$48 sps:$4 sm:$0xff]   ;;  %v7196_v38 = vld [vmem:[#allocation7 + $0x248] ss:$48 sps:$4 sm:$0xff]  }
  0xac   :  { %1021 = vmatpush1.bf16.msra.mxu0 %v7107_v39  ;;  %1062 = vmatpush1.bf16.msra.mxu1 %v7110_v40  ;;  %v7201_v39 = vld [vmem:[#allocation7 + $0x2a4] ss:$48 sps:$4 sm:$0xff]   ;;  %v7204_v40 = vld [vmem:[#allocation7 + $0x2ac] ss:$48 sps:$4 sm:$0xff]  }
  0xad   :  { %1022 = vmatprep.subr.bf16.mxu0 %v7115_v41  ;;  %1063 = vmatprep.subr.bf16.mxu1 %v7118_v42  ;;  %v7199_v41 = vld [vmem:[#allocation7 + $0x2a0] ss:$48 sps:$4 sm:$0xff]   ;;  %v7202_v42 = vld [vmem:[#allocation7 + $0x2a8] ss:$48 sps:$4 sm:$0xff]  }
  0xb0   :  { %1023 = vmatpush1.bf16.msra.mxu0 %v7113_v43  ;;  %1064 = vmatpush1.bf16.msra.mxu1 %v7116_v44  ;;  %v7207_v43 = vld [vmem:[#allocation7 + $0x304] ss:$48 sps:$4 sm:$0xff]   ;;  %v7210_v44 = vld [vmem:[#allocation7 + $0x30c] ss:$48 sps:$4 sm:$0xff]  }
  0xb1   :  { %1024 = vmatprep.subr.bf16.mxu0 %v7121_v45  ;;  %1065 = vmatprep.subr.bf16.mxu1 %v7124_v46  ;;  %v7205_v45 = vld [vmem:[#allocation7 + $0x300] ss:$48 sps:$4 sm:$0xff]   ;;  %v7208_v46 = vld [vmem:[#allocation7 + $0x308] ss:$48 sps:$4 sm:$0xff]  }
  0xb4   :  { %1025 = vmatpush1.bf16.msra.mxu0 %v7119_v47  ;;  %1066 = vmatpush1.bf16.msra.mxu1 %v7122_v49  ;;  %v7213_v47 = vld [vmem:[#allocation7 + $0x364] ss:$48 sps:$4 sm:$0xff]   ;;  %v7216_v49 = vld [vmem:[#allocation7 + $0x36c] ss:$48 sps:$4 sm:$0xff]  }
  0xb5   :  { %1026 = vmatprep.subr.bf16.mxu0 %v7127_v50  ;;  %1067 = vmatprep.subr.bf16.mxu1 %v7130_v51  ;;  %v7211_v50 = vld [vmem:[#allocation7 + $0x360] ss:$48 sps:$4 sm:$0xff]   ;;  %v7214_v51 = vld [vmem:[#allocation7 + $0x368] ss:$48 sps:$4 sm:$0xff]  }
  0xb8   :  { %1027 = vmatpush1.bf16.msra.mxu0 %v7125_v52  ;;  %1068 = vmatpush1.bf16.msra.mxu1 %v7128_v53  ;;  %v7219_v52 = vld [vmem:[#allocation7 + $0x3c4] ss:$48 sps:$4 sm:$0xff]   ;;  %v7222_v53 = vld [vmem:[#allocation7 + $0x3cc] ss:$48 sps:$4 sm:$0xff]  }
  0xb9   :  { %1028 = vmatprep.subr.bf16.mxu0 %v7133_v54  ;;  %1069 = vmatprep.subr.bf16.mxu1 %v7136_v55  ;;  %v7217_v54 = vld [vmem:[#allocation7 + $0x3c0] ss:$48 sps:$4 sm:$0xff]   ;;  %v7220_v55 = vld [vmem:[#allocation7 + $0x3c8] ss:$48 sps:$4 sm:$0xff]  }
  0xbc   :  { %1029 = vmatpush1.bf16.msra.mxu0 %v7131_v56  ;;  %1070 = vmatpush1.bf16.msra.mxu1 %v7134_v57  ;;  %v7225_v56 = vld [vmem:[#allocation7 + $0x424] ss:$48 sps:$4 sm:$0xff]   ;;  %v7228_v57 = vld [vmem:[#allocation7 + $0x42c] ss:$48 sps:$4 sm:$0xff]  }
  0xbd   :  { %1030 = vmatprep.subr.bf16.mxu0 %v7139_v58  ;;  %1071 = vmatprep.subr.bf16.mxu1 %v7142_v59  ;;  %v7223_v58 = vld [vmem:[#allocation7 + $0x420] ss:$48 sps:$4 sm:$0xff]   ;;  %v7226_v59 = vld [vmem:[#allocation7 + $0x428] ss:$48 sps:$4 sm:$0xff]  }
  0xc0   :  { %1031 = vmatpush1.bf16.msra.mxu0 %v7137_v60  ;;  %1072 = vmatpush1.bf16.msra.mxu1 %v7140_v61  ;;  %v7231_v60 = vld [vmem:[#allocation7 + $0x484] ss:$48 sps:$4 sm:$0xff]   ;;  %v7234_v61 = vld [vmem:[#allocation7 + $0x48c] ss:$48 sps:$4 sm:$0xff]  }
  0xc1   :  { %1032 = vmatprep.subr.bf16.mxu0 %v7145_v62  ;;  %1073 = vmatprep.subr.bf16.mxu1 %v7148_v63  ;;  %v7229_v62 = vld [vmem:[#allocation7 + $0x480] ss:$48 sps:$4 sm:$0xff]   ;;  %v7232_v63 = vld [vmem:[#allocation7 + $0x488] ss:$48 sps:$4 sm:$0xff]  }
  0xc4   :  { %1033 = vmatpush1.bf16.msra.mxu0 %v7143_v0  ;;  %1074 = vmatpush1.bf16.msra.mxu1 %v7146_v1  ;;  %v7237_v0 = vld [vmem:[#allocation7 + $0x4e4] ss:$48 sps:$4 sm:$0xff]   ;;  %v7240_v1 = vld [vmem:[#allocation7 + $0x4ec] ss:$48 sps:$4 sm:$0xff]  }
  0xc5   :  { %1034 = vmatprep.subr.bf16.mxu0 %v7151_v2  ;;  %1075 = vmatprep.subr.bf16.mxu1 %v7154_v3  ;;  %v7235_v2 = vld [vmem:[#allocation7 + $0x4e0] ss:$48 sps:$4 sm:$0xff]   ;;  %v7238_v3 = vld [vmem:[#allocation7 + $0x4e8] ss:$48 sps:$4 sm:$0xff]  }
  0xc8   :  { %1035 = vmatpush1.bf16.msra.mxu0 %v7149_v5  ;;  %1076 = vmatpush1.bf16.msra.mxu1 %v7152_v6  ;;  %v7243_v5 = vld [vmem:[#allocation7 + $0x544] ss:$48 sps:$4 sm:$0xff]   ;;  %v7246_v6 = vld [vmem:[#allocation7 + $0x54c] ss:$48 sps:$4 sm:$0xff]  }
  0xc9   :  { %1500 = vmatprep.subr.bf16.mxu0 %v7159_v7  ;;  %1541 = vmatprep.subr.bf16.mxu1 %v7162_v8  ;;  %v7241_v7 = vld [vmem:[#allocation7 + $0x540] ss:$48 sps:$4 sm:$0xff]   ;;  %v7244_v8 = vld [vmem:[#allocation7 + $0x548] ss:$48 sps:$4 sm:$0xff]  }
  0xcb   :  { %1037 = vmatmul.mubr.bf16.vlgmr.msra.gmra.mrb[4].mxu0 %v8442_v9  ;;  %1078 = vmatmul.mubr.bf16.vlgmr.msra.gmra.mrb[4].mxu1 %v8442_v9 }
  0xcc   :  { %1501 = vmatpush1.bf16.msra.mxu0 %v7157_v10  ;;  %1542 = vmatpush1.bf16.msra.mxu1 %v7160_v11  ;;  %v7249_v10 = vld [vmem:[#allocation7 + $0x5a4] ss:$48 sps:$4 sm:$0xff]   ;;  %v7252_v11 = vld [vmem:[#allocation7 + $0x5ac] ss:$48 sps:$4 sm:$0xff]  }
  0xcd   :  { %1502 = vmatprep.subr.bf16.mxu0 %v7165_v12  ;;  %1543 = vmatprep.subr.bf16.mxu1 %v7168_v14  ;;  %v7247_v12 = vld [vmem:[#allocation7 + $0x5a0] ss:$48 sps:$4 sm:$0xff]   ;;  %v7250_v14 = vld [vmem:[#allocation7 + $0x5a8] ss:$48 sps:$4 sm:$0xff]  }
  0xce   :  { %1532 = vmatprep.mubr.bf16.mxu0 %v8451_v15  ;;  %1573 = vmatprep.mubr.bf16.mxu1 %v8451_v15 }
  0xd0   :  { %1503 = vmatpush1.bf16.msra.mxu0 %v7163_v16  ;;  %1544 = vmatpush1.bf16.msra.mxu1 %v7166_v17  ;;  %v7257_v16 = vld [vmem:[#allocation2 + $0x14] ss:$48 sps:$4 sm:$0xff]   ;;  %v7260_v17 = vld [vmem:[#allocation2 + $0x1c] ss:$48 sps:$4 sm:$0xff]  }
  0xd1   :  { %1504 = vmatprep.subr.bf16.mxu0 %v7171_v18  ;;  %1545 = vmatprep.subr.bf16.mxu1 %v7174_v19  ;;  %v8459_v18 = vcombine.low %v8447_v13, %v8447_v13  ;;  %v7255_v19 = vld [vmem:[#allocation2 + $0x10] ss:$48 sps:$4 sm:$0xff]   ;;  %v7272_v13 = vld [vmem:[#allocation2 + $0xdc] ss:$48 sps:$4 sm:$0xff]  }
  0xd4   :  { %1505 = vmatpush1.bf16.msra.mxu0 %v7169_v20  ;;  %1546 = vmatpush1.bf16.msra.mxu1 %v7172_v21  ;;  %v7258_v20 = vld [vmem:[#allocation2 + $0x18] ss:$48 sps:$4 sm:$0xff]   ;;  %v7263_v21 = vld [vmem:[#allocation2 + $0x74] ss:$48 sps:$4 sm:$0xff]  }
  0xd5   :  { %1506 = vmatprep.subr.bf16.mxu0 %v7177_v22  ;;  %1547 = vmatprep.subr.bf16.mxu1 %v7180_v23  ;;  %v7266_v22 = vld [vmem:[#allocation2 + $0x7c] ss:$48 sps:$4 sm:$0xff]   ;;  %v7261_v23 = vld [vmem:[#allocation2 + $0x70] ss:$48 sps:$4 sm:$0xff]  }
  0xd8   :  { %1507 = vmatpush1.bf16.msra.mxu0 %v7175_v24  ;;  %1548 = vmatpush1.bf16.msra.mxu1 %v7178_v25  ;;  %v7264_v24 = vld [vmem:[#allocation2 + $0x78] ss:$48 sps:$4 sm:$0xff]   ;;  %v7269_v25 = vld [vmem:[#allocation2 + $0xd4] ss:$48 sps:$4 sm:$0xff]  }
  0xd9   :  { %1508 = vmatprep.subr.bf16.mxu0 %v7183_v26  ;;  %1549 = vmatprep.subr.bf16.mxu1 %v7186_v27  ;;  %v7267_v26 = vld [vmem:[#allocation2 + $0xd0] ss:$48 sps:$4 sm:$0xff]   ;;  %v7270_v27 = vld [vmem:[#allocation2 + $0xd8] ss:$48 sps:$4 sm:$0xff]  }
  0xdc   :  { %1509 = vmatpush1.bf16.msra.mxu0 %v7181_v28  ;;  %1550 = vmatpush1.bf16.msra.mxu1 %v7184_v29  ;;  %v7275_v28 = vld [vmem:[#allocation2 + $0x134] ss:$48 sps:$4 sm:$0xff]   ;;  %v7278_v29 = vld [vmem:[#allocation2 + $0x13c] ss:$48 sps:$4 sm:$0xff]  }
  0xdd   :  { %1510 = vmatprep.subr.bf16.mxu0 %v7189_v31  ;;  %1551 = vmatprep.subr.bf16.mxu1 %v7192_v32  ;;  %v7273_v31 = vld [vmem:[#allocation2 + $0x130] ss:$48 sps:$4 sm:$0xff]   ;;  %v7276_v32 = vld [vmem:[#allocation2 + $0x138] ss:$48 sps:$4 sm:$0xff]  }
  0xe0   :  { %1511 = vmatpush1.bf16.msra.mxu0 %v7187_v33  ;;  %1552 = vmatpush1.bf16.msra.mxu1 %v7190_v34  ;;  %v7281_v33 = vld [vmem:[#allocation2 + $0x194] ss:$48 sps:$4 sm:$0xff]   ;;  %v7284_v34 = vld [vmem:[#allocation2 + $0x19c] ss:$48 sps:$4 sm:$0xff]  }
  0xe1   :  { %1512 = vmatprep.subr.bf16.mxu0 %v7195_v35  ;;  %1553 = vmatprep.subr.bf16.mxu1 %v7198_v36  ;;  %v7279_v35 = vld [vmem:[#allocation2 + $0x190] ss:$48 sps:$4 sm:$0xff]   ;;  %v7282_v36 = vld [vmem:[#allocation2 + $0x198] ss:$48 sps:$4 sm:$0xff]  }
  0xe4   :  { %1513 = vmatpush1.bf16.msra.mxu0 %v7193_v37  ;;  %1554 = vmatpush1.bf16.msra.mxu1 %v7196_v38  ;;  %v7287_v37 = vld [vmem:[#allocation2 + $0x1f4] ss:$48 sps:$4 sm:$0xff]   ;;  %v7290_v38 = vld [vmem:[#allocation2 + $0x1fc] ss:$48 sps:$4 sm:$0xff]  }
  0xe5   :  { %1514 = vmatprep.subr.bf16.mxu0 %v7201_v39  ;;  %1555 = vmatprep.subr.bf16.mxu1 %v7204_v40  ;;  %v7285_v39 = vld [vmem:[#allocation2 + $0x1f0] ss:$48 sps:$4 sm:$0xff]   ;;  %v7288_v40 = vld [vmem:[#allocation2 + $0x1f8] ss:$48 sps:$4 sm:$0xff]  }
  0xe8   :  { %1515 = vmatpush1.bf16.msra.mxu0 %v7199_v41  ;;  %1556 = vmatpush1.bf16.msra.mxu1 %v7202_v42  ;;  %v7293_v41 = vld [vmem:[#allocation2 + $0x254] ss:$48 sps:$4 sm:$0xff]   ;;  %v7296_v42 = vld [vmem:[#allocation2 + $0x25c] ss:$48 sps:$4 sm:$0xff]  }
  0xe9   :  { %1516 = vmatprep.subr.bf16.mxu0 %v7207_v43  ;;  %1557 = vmatprep.subr.bf16.mxu1 %v7210_v44  ;;  %v7291_v43 = vld [vmem:[#allocation2 + $0x250] ss:$48 sps:$4 sm:$0xff]   ;;  %v7294_v44 = vld [vmem:[#allocation2 + $0x258] ss:$48 sps:$4 sm:$0xff]  }
  0xec   :  { %1517 = vmatpush1.bf16.msra.mxu0 %v7205_v45  ;;  %1558 = vmatpush1.bf16.msra.mxu1 %v7208_v46  ;;  %v7299_v45 = vld [vmem:[#allocation2 + $0x2b4] ss:$48 sps:$4 sm:$0xff]   ;;  %v7302_v46 = vld [vmem:[#allocation2 + $0x2bc] ss:$48 sps:$4 sm:$0xff]  }
  0xed   :  { %1518 = vmatprep.subr.bf16.mxu0 %v7213_v47  ;;  %1559 = vmatprep.subr.bf16.mxu1 %v7216_v49  ;;  %v7297_v47 = vld [vmem:[#allocation2 + $0x2b0] ss:$48 sps:$4 sm:$0xff]   ;;  %v7300_v49 = vld [vmem:[#allocation2 + $0x2b8] ss:$48 sps:$4 sm:$0xff]  }
  0xf0   :  { %1519 = vmatpush1.bf16.msra.mxu0 %v7211_v50  ;;  %1560 = vmatpush1.bf16.msra.mxu1 %v7214_v51  ;;  %v7305_v50 = vld [vmem:[#allocation2 + $0x314] ss:$48 sps:$4 sm:$0xff]   ;;  %v7308_v51 = vld [vmem:[#allocation2 + $0x31c] ss:$48 sps:$4 sm:$0xff]  }
  0xf1   :  { %1520 = vmatprep.subr.bf16.mxu0 %v7219_v52  ;;  %1561 = vmatprep.subr.bf16.mxu1 %v7222_v53  ;;  %v7303_v52 = vld [vmem:[#allocation2 + $0x310] ss:$48 sps:$4 sm:$0xff]   ;;  %v7306_v53 = vld [vmem:[#allocation2 + $0x318] ss:$48 sps:$4 sm:$0xff]  }
  0xf4   :  { %1521 = vmatpush1.bf16.msra.mxu0 %v7217_v54  ;;  %1562 = vmatpush1.bf16.msra.mxu1 %v7220_v55  ;;  %v7311_v54 = vld [vmem:[#allocation2 + $0x374] ss:$48 sps:$4 sm:$0xff]   ;;  %v7314_v55 = vld [vmem:[#allocation2 + $0x37c] ss:$48 sps:$4 sm:$0xff]  }
  0xf5   :  { %1522 = vmatprep.subr.bf16.mxu0 %v7225_v56  ;;  %1563 = vmatprep.subr.bf16.mxu1 %v7228_v57  ;;  %v7309_v56 = vld [vmem:[#allocation2 + $0x370] ss:$48 sps:$4 sm:$0xff]   ;;  %v7312_v57 = vld [vmem:[#allocation2 + $0x378] ss:$48 sps:$4 sm:$0xff]  }
  0xf8   :  { %1523 = vmatpush1.bf16.msra.mxu0 %v7223_v58  ;;  %1564 = vmatpush1.bf16.msra.mxu1 %v7226_v59  ;;  %v7317_v58 = vld [vmem:[#allocation2 + $0x3d4] ss:$48 sps:$4 sm:$0xff]   ;;  %v7320_v59 = vld [vmem:[#allocation2 + $0x3dc] ss:$48 sps:$4 sm:$0xff]  }
  0xf9   :  { %1524 = vmatprep.subr.bf16.mxu0 %v7231_v60  ;;  %1565 = vmatprep.subr.bf16.mxu1 %v7234_v61  ;;  %v7315_v60 = vld [vmem:[#allocation2 + $0x3d0] ss:$48 sps:$4 sm:$0xff]   ;;  %v7318_v61 = vld [vmem:[#allocation2 + $0x3d8] ss:$48 sps:$4 sm:$0xff]  }
  0xfc   :  { %1525 = vmatpush1.bf16.msra.mxu0 %v7229_v62  ;;  %1566 = vmatpush1.bf16.msra.mxu1 %v7232_v63  ;;  %v7323_v62 = vld [vmem:[#allocation2 + $0x434] ss:$48 sps:$4 sm:$0xff]   ;;  %v7326_v63 = vld [vmem:[#allocation2 + $0x43c] ss:$48 sps:$4 sm:$0xff]  }
  0xfd   :  { %1526 = vmatprep.subr.bf16.mxu0 %v7237_v0  ;;  %1567 = vmatprep.subr.bf16.mxu1 %v7240_v1  ;;  %v7321_v0 = vld [vmem:[#allocation2 + $0x430] ss:$48 sps:$4 sm:$0xff]   ;;  %v7324_v1 = vld [vmem:[#allocation2 + $0x438] ss:$48 sps:$4 sm:$0xff]  }
 0x100   :  { %1527 = vmatpush1.bf16.msra.mxu0 %v7235_v2  ;;  %1568 = vmatpush1.bf16.msra.mxu1 %v7238_v3  ;;  %v7329_v2 = vld [vmem:[#allocation2 + $0x494] ss:$48 sps:$4 sm:$0xff]   ;;  %v7332_v3 = vld [vmem:[#allocation2 + $0x49c] ss:$48 sps:$4 sm:$0xff]  }
 0x101   :  { %1528 = vmatprep.subr.bf16.mxu0 %v7243_v5  ;;  %1569 = vmatprep.subr.bf16.mxu1 %v7246_v6  ;;  %v7327_v5 = vld [vmem:[#allocation2 + $0x490] ss:$48 sps:$4 sm:$0xff]   ;;  %v7330_v6 = vld [vmem:[#allocation2 + $0x498] ss:$48 sps:$4 sm:$0xff]  }
 0x104   :  { %1529 = vmatpush1.bf16.msra.mxu0 %v7241_v7  ;;  %1570 = vmatpush1.bf16.msra.mxu1 %v7244_v8  ;;  %v7335_v7 = vld [vmem:[#allocation2 + $0x4f4] ss:$48 sps:$4 sm:$0xff]   ;;  %v7338_v8 = vld [vmem:[#allocation2 + $0x4fc] ss:$48 sps:$4 sm:$0xff]  }
 0x105   :  { %1530 = vmatprep.subr.bf16.mxu0 %v7249_v10  ;;  %1571 = vmatprep.subr.bf16.mxu1 %v7252_v11  ;;  %v7333_v10 = vld [vmem:[#allocation2 + $0x4f0] ss:$48 sps:$4 sm:$0xff]   ;;  %v7336_v11 = vld [vmem:[#allocation2 + $0x4f8] ss:$48 sps:$4 sm:$0xff]  }
 0x108   :  { %1531 = vmatpush1.bf16.msra.mxu0 %v7247_v12  ;;  %1572 = vmatpush1.bf16.msra.mxu1 %v7250_v14  ;;  %v7341_v12 = vld [vmem:[#allocation2 + $0x554] ss:$48 sps:$4 sm:$0xff]   ;;  %v7344_v14 = vld [vmem:[#allocation2 + $0x55c] ss:$48 sps:$4 sm:$0xff]  }
 0x109   :  { %2113 = vmatprep.subr.bf16.mxu0 %v7257_v16  ;;  %2154 = vmatprep.subr.bf16.mxu1 %v7260_v17  ;;  %v7339_v16 = vld [vmem:[#allocation2 + $0x550] ss:$48 sps:$4 sm:$0xff]   ;;  %v7342_v17 = vld [vmem:[#allocation2 + $0x558] ss:$48 sps:$4 sm:$0xff]  }
 0x10b   :  { %1533 = vmatmul.mubr.bf16.vlgmr.msra.gmra.mrb[8].mxu0 %v8459_v18  ;;  %1574 = vmatmul.mubr.bf16.vlgmr.msra.gmra.mrb[8].mxu1 %v8459_v18 }
 0x10c   :  { %2114 = vmatpush1.bf16.msra.mxu0 %v7255_v19  ;;  %2155 = vmatpush1.bf16.msra.mxu1 %v7258_v20  ;;  %v7347_v19 = vld [vmem:[#allocation2 + $0x5b4] ss:$48 sps:$4 sm:$0xff]   ;;  %v7350_v20 = vld [vmem:[#allocation2 + $0x5bc] ss:$48 sps:$4 sm:$0xff]  }
 0x10d   :  { %2115 = vmatprep.subr.bf16.mxu0 %v7263_v21  ;;  %2156 = vmatprep.subr.bf16.mxu1 %v7266_v22  ;;  %v7345_v21 = vld [vmem:[#allocation2 + $0x5b0] ss:$48 sps:$4 sm:$0xff]   ;;  %v7348_v22 = vld [vmem:[#allocation2 + $0x5b8] ss:$48 sps:$4 sm:$0xff]  }
 0x10e   :  { %2145 = vmatprep.mubr.bf16.mxu0 %v8421_v48  ;;  %2186 = vmatprep.mubr.bf16.mxu1 %v8421_v48 }
 0x110   :  { %2116 = vmatpush1.bf16.msra.mxu0 %v7261_v23  ;;  %2157 = vmatpush1.bf16.msra.mxu1 %v7264_v24  ;;  %v7353_v23 = vld [vmem:[#allocation5 + $0x14] ss:$48 sps:$4 sm:$0xff]   ;;  %v7356_v24 = vld [vmem:[#allocation5 + $0x1c] ss:$48 sps:$4 sm:$0xff]  }
 0x111   :  { %2117 = vmatprep.subr.bf16.mxu0 %v7269_v25  ;;  %2158 = vmatprep.subr.bf16.mxu1 %v7272_v13  ;;  %v7351_v25 = vld [vmem:[#allocation5 + $0x10] ss:$48 sps:$4 sm:$0xff]   ;;  %v7354_v13 = vld [vmem:[#allocation5 + $0x18] ss:$48 sps:$4 sm:$0xff]  }
 0x114   :  { %2118 = vmatpush1.bf16.msra.mxu0 %v7267_v26  ;;  %2159 = vmatpush1.bf16.msra.mxu1 %v7270_v27  ;;  %v7359_v26 = vld [vmem:[#allocation5 + $0x74] ss:$48 sps:$4 sm:$0xff]   ;;  %v7362_v27 = vld [vmem:[#allocation5 + $0x7c] ss:$48 sps:$4 sm:$0xff]  }
 0x115   :  { %2119 = vmatprep.subr.bf16.mxu0 %v7275_v28  ;;  %2160 = vmatprep.subr.bf16.mxu1 %v7278_v29  ;;  %v7357_v28 = vld [vmem:[#allocation5 + $0x70] ss:$48 sps:$4 sm:$0xff]   ;;  %v7360_v29 = vld [vmem:[#allocation5 + $0x78] ss:$48 sps:$4 sm:$0xff]  }
 0x118   :  { %2120 = vmatpush1.bf16.msra.mxu0 %v7273_v31  ;;  %2161 = vmatpush1.bf16.msra.mxu1 %v7276_v32  ;;  %v7365_v31 = vld [vmem:[#allocation5 + $0xd4] ss:$48 sps:$4 sm:$0xff]   ;;  %v7368_v32 = vld [vmem:[#allocation5 + $0xdc] ss:$48 sps:$4 sm:$0xff]  }
 0x119   :  { %2121 = vmatprep.subr.bf16.mxu0 %v7281_v33  ;;  %2162 = vmatprep.subr.bf16.mxu1 %v7284_v34  ;;  %v7363_v33 = vld [vmem:[#allocation5 + $0xd0] ss:$48 sps:$4 sm:$0xff]   ;;  %v7366_v34 = vld [vmem:[#allocation5 + $0xd8] ss:$48 sps:$4 sm:$0xff]  }
 0x11c   :  { %2122 = vmatpush1.bf16.msra.mxu0 %v7279_v35  ;;  %2163 = vmatpush1.bf16.msra.mxu1 %v7282_v36  ;;  %v7371_v35 = vld [vmem:[#allocation5 + $0x134] ss:$48 sps:$4 sm:$0xff]   ;;  %v7374_v36 = vld [vmem:[#allocation5 + $0x13c] ss:$48 sps:$4 sm:$0xff]  }
 0x11d   :  { %2123 = vmatprep.subr.bf16.mxu0 %v7287_v37  ;;  %2164 = vmatprep.subr.bf16.mxu1 %v7290_v38  ;;  %v7369_v37 = vld [vmem:[#allocation5 + $0x130] ss:$48 sps:$4 sm:$0xff]   ;;  %v7372_v38 = vld [vmem:[#allocation5 + $0x138] ss:$48 sps:$4 sm:$0xff]  }
 0x120   :  { %2124 = vmatpush1.bf16.msra.mxu0 %v7285_v39  ;;  %2165 = vmatpush1.bf16.msra.mxu1 %v7288_v40  ;;  %v7377_v39 = vld [vmem:[#allocation5 + $0x194] ss:$48 sps:$4 sm:$0xff]   ;;  %v7380_v40 = vld [vmem:[#allocation5 + $0x19c] ss:$48 sps:$4 sm:$0xff]  }
 0x121   :  { %2125 = vmatprep.subr.bf16.mxu0 %v7293_v41  ;;  %2166 = vmatprep.subr.bf16.mxu1 %v7296_v42  ;;  %v7375_v41 = vld [vmem:[#allocation5 + $0x190] ss:$48 sps:$4 sm:$0xff]   ;;  %v7378_v42 = vld [vmem:[#allocation5 + $0x198] ss:$48 sps:$4 sm:$0xff]  }
 0x124   :  { %2126 = vmatpush1.bf16.msra.mxu0 %v7291_v43  ;;  %2167 = vmatpush1.bf16.msra.mxu1 %v7294_v44  ;;  %v7383_v43 = vld [vmem:[#allocation5 + $0x1f4] ss:$48 sps:$4 sm:$0xff]   ;;  %v7386_v44 = vld [vmem:[#allocation5 + $0x1fc] ss:$48 sps:$4 sm:$0xff]  }
 0x125   :  { %2127 = vmatprep.subr.bf16.mxu0 %v7299_v45  ;;  %2168 = vmatprep.subr.bf16.mxu1 %v7302_v46  ;;  %v7381_v45 = vld [vmem:[#allocation5 + $0x1f0] ss:$48 sps:$4 sm:$0xff]   ;;  %v7384_v46 = vld [vmem:[#allocation5 + $0x1f8] ss:$48 sps:$4 sm:$0xff]  }
 0x128   :  { %2128 = vmatpush1.bf16.msra.mxu0 %v7297_v47  ;;  %2169 = vmatpush1.bf16.msra.mxu1 %v7300_v49  ;;  %v7389_v47 = vld [vmem:[#allocation5 + $0x254] ss:$48 sps:$4 sm:$0xff]   ;;  %v7392_v49 = vld [vmem:[#allocation5 + $0x25c] ss:$48 sps:$4 sm:$0xff]  }
 0x129   :  { %2129 = vmatprep.subr.bf16.mxu0 %v7305_v50  ;;  %2170 = vmatprep.subr.bf16.mxu1 %v7308_v51 }
 0x12c   :  { %2130 = vmatpush1.bf16.msra.mxu0 %v7303_v52  ;;  %2171 = vmatpush1.bf16.msra.mxu1 %v7306_v53  ;;  %v7387_v52 = vld [vmem:[#allocation5 + $0x250] ss:$48 sps:$4 sm:$0xff]   ;;  %v7390_v53 = vld [vmem:[#allocation5 + $0x258] ss:$48 sps:$4 sm:$0xff]  }
 0x12d   :  { %2131 = vmatprep.subr.bf16.mxu0 %v7311_v54  ;;  %2172 = vmatprep.subr.bf16.mxu1 %v7314_v55 }
 0x130   :  { %2132 = vmatpush1.bf16.msra.mxu0 %v7309_v56  ;;  %2173 = vmatpush1.bf16.msra.mxu1 %v7312_v57  ;;  %v7395_v56 = vld [vmem:[#allocation5 + $0x2b4] ss:$48 sps:$4 sm:$0xff]   ;;  %v7398_v57 = vld [vmem:[#allocation5 + $0x2bc] ss:$48 sps:$4 sm:$0xff]  }
 0x131   :  { %2133 = vmatprep.subr.bf16.mxu0 %v7317_v58  ;;  %2174 = vmatprep.subr.bf16.mxu1 %v7320_v59 }
 0x134   :  { %2134 = vmatpush1.bf16.msra.mxu0 %v7315_v60  ;;  %2175 = vmatpush1.bf16.msra.mxu1 %v7318_v61 }
 0x135   :  { %2135 = vmatprep.subr.bf16.mxu0 %v7323_v62  ;;  %2176 = vmatprep.subr.bf16.mxu1 %v7326_v63  ;;  %v7393_v62 = vld [vmem:[#allocation5 + $0x2b0] ss:$48 sps:$4 sm:$0xff]   ;;  %v7396_v63 = vld [vmem:[#allocation5 + $0x2b8] ss:$48 sps:$4 sm:$0xff]  }
 0x138   :  { %2136 = vmatpush1.bf16.msra.mxu0 %v7321_v0  ;;  %2177 = vmatpush1.bf16.msra.mxu1 %v7324_v1  ;;  %v7401_v0 = vld [vmem:[#allocation5 + $0x314] ss:$48 sps:$4 sm:$0xff]   ;;  %v7404_v1 = vld [vmem:[#allocation5 + $0x31c] ss:$48 sps:$4 sm:$0xff]  }
 0x139   :  { %2137 = vmatprep.subr.bf16.mxu0 %v7329_v2  ;;  %2178 = vmatprep.subr.bf16.mxu1 %v7332_v3  ;;  %v7399_v2 = vld [vmem:[#allocation5 + $0x310] ss:$48 sps:$4 sm:$0xff]   ;;  %v7402_v3 = vld [vmem:[#allocation5 + $0x318] ss:$48 sps:$4 sm:$0xff]  }
 0x13c   :  { %2138 = vmatpush1.bf16.msra.mxu0 %v7327_v5  ;;  %2179 = vmatpush1.bf16.msra.mxu1 %v7330_v6  ;;  %v7407_v5 = vld [vmem:[#allocation5 + $0x374] ss:$48 sps:$4 sm:$0xff]   ;;  %v7410_v6 = vld [vmem:[#allocation5 + $0x37c] ss:$48 sps:$4 sm:$0xff]  }
 0x13d   :  { %2139 = vmatprep.subr.bf16.mxu0 %v7335_v7  ;;  %2180 = vmatprep.subr.bf16.mxu1 %v7338_v8  ;;  %v7405_v7 = vld [vmem:[#allocation5 + $0x370] ss:$48 sps:$4 sm:$0xff]   ;;  %v7408_v8 = vld [vmem:[#allocation5 + $0x378] ss:$48 sps:$4 sm:$0xff]  }
 0x140   :  { %2140 = vmatpush1.bf16.msra.mxu0 %v7333_v10  ;;  %2181 = vmatpush1.bf16.msra.mxu1 %v7336_v11  ;;  %v7413_v10 = vld [vmem:[#allocation5 + $0x3d4] ss:$48 sps:$4 sm:$0xff]   ;;  %v7416_v11 = vld [vmem:[#allocation5 + $0x3dc] ss:$48 sps:$4 sm:$0xff]  }
 0x141   :  { %2141 = vmatprep.subr.bf16.mxu0 %v7341_v12  ;;  %2182 = vmatprep.subr.bf16.mxu1 %v7344_v14  ;;  %v7411_v12 = vld [vmem:[#allocation5 + $0x3d0] ss:$48 sps:$4 sm:$0xff]   ;;  %v7414_v14 = vld [vmem:[#allocation5 + $0x3d8] ss:$48 sps:$4 sm:$0xff]  }
 0x144   :  { %2142 = vmatpush1.bf16.msra.mxu0 %v7339_v16  ;;  %2183 = vmatpush1.bf16.msra.mxu1 %v7342_v17  ;;  %v7419_v16 = vld [vmem:[#allocation5 + $0x434] ss:$48 sps:$4 sm:$0xff]   ;;  %v7422_v17 = vld [vmem:[#allocation5 + $0x43c] ss:$48 sps:$4 sm:$0xff]  }
 0x145   :  { %2143 = vmatprep.subr.bf16.mxu0 %v7347_v19  ;;  %2184 = vmatprep.subr.bf16.mxu1 %v7350_v20  ;;  %v7417_v19 = vld [vmem:[#allocation5 + $0x430] ss:$48 sps:$4 sm:$0xff]   ;;  %v7420_v20 = vld [vmem:[#allocation5 + $0x438] ss:$48 sps:$4 sm:$0xff]  }
 0x148   :  { %2144 = vmatpush1.bf16.msra.mxu0 %v7345_v21  ;;  %2185 = vmatpush1.bf16.msra.mxu1 %v7348_v22  ;;  %v7425_v21 = vld [vmem:[#allocation5 + $0x494] ss:$48 sps:$4 sm:$0xff]   ;;  %v7428_v22 = vld [vmem:[#allocation5 + $0x49c] ss:$48 sps:$4 sm:$0xff]  }
 0x149   :  { %2602 = vmatprep.subr.bf16.mxu0 %v7353_v23  ;;  %2643 = vmatprep.subr.bf16.mxu1 %v7356_v24  ;;  %v7423_v23 = vld [vmem:[#allocation5 + $0x490] ss:$48 sps:$4 sm:$0xff]   ;;  %v7426_v24 = vld [vmem:[#allocation5 + $0x498] ss:$48 sps:$4 sm:$0xff]  }
 0x14b   :  { %2146 = vmatmul.mubr.bf16.vlgmr.msra.gmra.mrb[12].mxu0 %v8425_v4  ;;  %2187 = vmatmul.mubr.bf16.vlgmr.msra.gmra.mrb[12].mxu1 %v8425_v4 }
 0x14c   :  { %2603 = vmatpush1.bf16.msra.mxu0 %v7351_v25  ;;  %2644 = vmatpush1.bf16.msra.mxu1 %v7354_v13  ;;  %v7431_v25 = vld [vmem:[#allocation5 + $0x4f4] ss:$48 sps:$4 sm:$0xff]   ;;  %v7434_v13 = vld [vmem:[#allocation5 + $0x4fc] ss:$48 sps:$4 sm:$0xff]  }
 0x14d   :  { %2604 = vmatprep.subr.bf16.mxu0 %v7359_v26  ;;  %2645 = vmatprep.subr.bf16.mxu1 %v7362_v27  ;;  %v7429_v26 = vld [vmem:[#allocation5 + $0x4f0] ss:$48 sps:$4 sm:$0xff]   ;;  %v7432_v27 = vld [vmem:[#allocation5 + $0x4f8] ss:$48 sps:$4 sm:$0xff]  }
 0x14e   :  { %2634 = vmatprep.mubr.bf16.mxu0 %v8436_v30  ;;  %2675 = vmatprep.mubr.bf16.mxu1 %v8436_v30 }
 0x150   :  { %2605 = vmatpush1.bf16.msra.mxu0 %v7357_v28  ;;  %2646 = vmatpush1.bf16.msra.mxu1 %v7360_v29  ;;  %v7437_v28 = vld [vmem:[#allocation5 + $0x554] ss:$48 sps:$4 sm:$0xff]   ;;  %v7440_v29 = vld [vmem:[#allocation5 + $0x55c] ss:$48 sps:$4 sm:$0xff]  }
 0x151   :  { %2606 = vmatprep.subr.bf16.mxu0 %v7365_v31  ;;  %2647 = vmatprep.subr.bf16.mxu1 %v7368_v32  ;;  %v7435_v31 = vld [vmem:[#allocation5 + $0x550] ss:$48 sps:$4 sm:$0xff]   ;;  %v7438_v32 = vld [vmem:[#allocation5 + $0x558] ss:$48 sps:$4 sm:$0xff]  }
 0x154   :  { %2607 = vmatpush1.bf16.msra.mxu0 %v7363_v33  ;;  %2648 = vmatpush1.bf16.msra.mxu1 %v7366_v34  ;;  %v7443_v33 = vld [vmem:[#allocation5 + $0x5b4] ss:$48 sps:$4 sm:$0xff]   ;;  %v7446_v34 = vld [vmem:[#allocation5 + $0x5bc] ss:$48 sps:$4 sm:$0xff]  }
 0x155   :  { %2608 = vmatprep.subr.bf16.mxu0 %v7371_v35  ;;  %2649 = vmatprep.subr.bf16.mxu1 %v7374_v36  ;;  %v7441_v35 = vld [vmem:[#allocation5 + $0x5b0] ss:$48 sps:$4 sm:$0xff]   ;;  %v7444_v36 = vld [vmem:[#allocation5 + $0x5b8] ss:$48 sps:$4 sm:$0xff]  }
 0x158   :  { %2609 = vmatpush1.bf16.msra.mxu0 %v7369_v37  ;;  %2650 = vmatpush1.bf16.msra.mxu1 %v7372_v38  ;;  %v7449_v37 = vld [vmem:[#allocation7 + $0x14] ss:$48 sps:$4 sm:$0xff]   ;;  %v7452_v38 = vld [vmem:[#allocation7 + $0x1c] ss:$48 sps:$4 sm:$0xff]  }
 0x159   :  { %2610 = vmatprep.subr.bf16.mxu0 %v7377_v39  ;;  %2651 = vmatprep.subr.bf16.mxu1 %v7380_v40  ;;  %v7447_v39 = vld [vmem:[#allocation7 + $0x10] ss:$48 sps:$4 sm:$0xff]   ;;  %v7450_v40 = vld [vmem:[#allocation7 + $0x18] ss:$48 sps:$4 sm:$0xff]  }
 0x15c   :  { %2611 = vmatpush1.bf16.msra.mxu0 %v7375_v41  ;;  %2652 = vmatpush1.bf16.msra.mxu1 %v7378_v42  ;;  %v7455_v41 = vld [vmem:[#allocation7 + $0x74] ss:$48 sps:$4 sm:$0xff]   ;;  %v7458_v42 = vld [vmem:[#allocation7 + $0x7c] ss:$48 sps:$4 sm:$0xff]  }
 0x15d   :  { %2612 = vmatprep.subr.bf16.mxu0 %v7383_v43  ;;  %2653 = vmatprep.subr.bf16.mxu1 %v7386_v44  ;;  %v7453_v43 = vld [vmem:[#allocation7 + $0x70] ss:$48 sps:$4 sm:$0xff]   ;;  %v7456_v44 = vld [vmem:[#allocation7 + $0x78] ss:$48 sps:$4 sm:$0xff]  }
 0x15e   :  { %v8469_v50 = vpop.f32.mrb[0].mxu0  ;;  %v8471_v51 = vpop.f32.mrb[0].mxu1 }
 0x15f   :  { %v8473_v54 = vpop.f32.mrb[1].mxu0  ;;  %v8475_v55 = vpop.f32.mrb[1].mxu1 }
 0x160   :  { %v546_v58 = vpop.f32.mrb[2].mxu0  ;;  %v587_v59 = vpop.f32.mrb[2].mxu1  ;;  %2613 = vmatpush1.bf16.msra.mxu0 %v7381_v45  ;;  %2654 = vmatpush1.bf16.msra.mxu1 %v7384_v46  ;;  %v7461_v45 = vld [vmem:[#allocation7 + $0xd4] ss:$48 sps:$4 sm:$0xff]   ;;  %v7464_v46 = vld [vmem:[#allocation7 + $0xdc] ss:$48 sps:$4 sm:$0xff]  }
 0x161   :  { %v547_v60 = vpop.f32.mrb[3].mxu0  ;;  %v588_v61 = vpop.f32.mrb[3].mxu1  ;;  %2614 = vmatprep.subr.bf16.mxu0 %v7389_v47  ;;  %2655 = vmatprep.subr.bf16.mxu1 %v7392_v49  ;;  %v161_v47 = vlaneseq  ;;  %v7459_v49 = vld [vmem:[#allocation7 + $0xd0] ss:$48 sps:$4 sm:$0xff]   ;;  %v7468_v59 = vld [vmem:[#allocation7 + $0x138] ss:$48 sps:$4 sm:$0xff]  }
 0x162   :  { %v7465_v58 = vld [vmem:[#allocation7 + $0x130] ss:$48 sps:$4 sm:$0xff]   ;;  %v7473_v60 = vld [vmem:[#allocation7 + $0x194] ss:$48 sps:$4 sm:$0xff]   ;;  %v7476_v61 = vld [vmem:[#allocation7 + $0x19c] ss:$48 sps:$4 sm:$0xff]  }
 0x164   :  { %2615 = vmatpush1.bf16.msra.mxu0 %v7387_v52  ;;  %2656 = vmatpush1.bf16.msra.mxu1 %v7390_v53  ;;  %v7462_v52 = vld [vmem:[#allocation7 + $0xd8] ss:$48 sps:$4 sm:$0xff]   ;;  %v7467_v53 = vld [vmem:[#allocation7 + $0x134] ss:$48 sps:$4 sm:$0xff]  }
 0x165   :  { %2616 = vmatprep.subr.bf16.mxu0 %v7395_v56  ;;  %2657 = vmatprep.subr.bf16.mxu1 %v7398_v57  ;;  %v7470_v56 = vld [vmem:[#allocation7 + $0x13c] ss:$48 sps:$4 sm:$0xff]   ;;  %v8482_v57 = vshrl.u32 %v161_v47, 7 }
 0x168   :  { %2617 = vmatpush1.bf16.msra.mxu0 %v7393_v62  ;;  %2658 = vmatpush1.bf16.msra.mxu1 %v7396_v63  ;;  %v159_v62 = vld [vmem:[%s8674_s6] ss:$4 sm:$0xf]  ;;  %v8488_v63 = vsub.s32 0, %v8482_v57 }
 0x169   :  { %2618 = vmatprep.subr.bf16.mxu0 %v7401_v0  ;;  %2659 = vmatprep.subr.bf16.mxu1 %v7404_v1  ;;  %v7471_v0 = vld [vmem:[#allocation7 + $0x190] ss:$48 sps:$4 sm:$0xff]   ;;  %v7474_v1 = vld [vmem:[#allocation7 + $0x198] ss:$48 sps:$4 sm:$0xff]  }
 0x16c   :  { %2619 = vmatpush1.bf16.msra.mxu0 %v7399_v2  ;;  %2660 = vmatpush1.bf16.msra.mxu1 %v7402_v3  ;;  %v6233_v2 = vld [vmem:[%s8674_s6 + $0x1] ss:$4 sm:$0xf]  ;;  %v8494_v3 = vsub.s32 2, %v8482_v57 }
 0x16d   :  { %2620 = vmatprep.subr.bf16.mxu0 %v7407_v5  ;;  %2661 = vmatprep.subr.bf16.mxu1 %v7410_v6  ;;  %v8497_v5 = vsub.s32 1, %v8482_v57  ;;  %v7479_v6 = vld [vmem:[#allocation7 + $0x1f4] ss:$48 sps:$4 sm:$0xff]  }
 0x170   :  { %2621 = vmatpush1.bf16.msra.mxu0 %v7405_v7  ;;  %2662 = vmatpush1.bf16.msra.mxu1 %v7408_v8  ;;  %v7482_v7 = vld [vmem:[#allocation7 + $0x1fc] ss:$48 sps:$4 sm:$0xff]   ;;  %v8500_v8 = vsub.s32 3, %v8482_v57 }
 0x171   :  { %2622 = vmatprep.subr.bf16.mxu0 %v7413_v10  ;;  %2663 = vmatprep.subr.bf16.mxu1 %v7416_v11  ;;  %v164_v10 = vrot.slane %v159_v62, %v8488_v63  ;;  %v7477_v11 = vld [vmem:[#allocation7 + $0x1f0] ss:$48 sps:$4 sm:$0xff]  }
 0x174   :  { %2623 = vmatpush1.bf16.msra.mxu0 %v7411_v12  ;;  %2664 = vmatpush1.bf16.msra.mxu1 %v7414_v14  ;;  %v7480_v12 = vld [vmem:[#allocation7 + $0x1f8] ss:$48 sps:$4 sm:$0xff]   ;;  %v172_v14 = vrot.slane %v159_v62, %v8494_v3 }
 0x175   :  { %2624 = vmatprep.subr.bf16.mxu0 %v7419_v16  ;;  %2665 = vmatprep.subr.bf16.mxu1 %v7422_v17  ;;  %v168_v16 = vrot.slane %v159_v62, %v8497_v5  ;;  %v660_v17 = vrot.slane %v6233_v2, %v8488_v63 }
 0x178   :  { %2625 = vmatpush1.bf16.msra.mxu0 %v7417_v19  ;;  %2666 = vmatpush1.bf16.msra.mxu1 %v7420_v20  ;;  %v668_v19 = vrot.slane %v6233_v2, %v8494_v3  ;;  %v7485_v20 = vld [vmem:[#allocation7 + $0x254] ss:$48 sps:$4 sm:$0xff]  }
 0x179   :  { %2626 = vmatprep.subr.bf16.mxu0 %v7425_v21  ;;  %2667 = vmatprep.subr.bf16.mxu1 %v7428_v22  ;;  %v176_v21 = vrot.slane %v159_v62, %v8500_v8  ;;  %v664_v22 = vrot.slane %v6233_v2, %v8497_v5  ;;  %v7497_v62 = vld [vmem:[#allocation7 + $0x314] ss:$48 sps:$4 sm:$0xff]  }
 0x17c   :  { %2627 = vmatpush1.bf16.msra.mxu0 %v7423_v23  ;;  %2668 = vmatpush1.bf16.msra.mxu1 %v7426_v24  ;;  %v672_v23 = vrot.slane %v6233_v2, %v8500_v8  ;;  %v7488_v24 = vld [vmem:[#allocation7 + $0x25c] ss:$48 sps:$4 sm:$0xff]  }
 0x17d   :  { %2628 = vmatprep.subr.bf16.mxu0 %v7431_v25  ;;  %2669 = vmatprep.subr.bf16.mxu1 %v7434_v13  ;;  %v543_v25 = vadd.f32 %v8469_v50, %v164_v10 }
 0x180   :  { %2629 = vmatpush1.bf16.msra.mxu0 %v7429_v26  ;;  %2670 = vmatpush1.bf16.msra.mxu1 %v7432_v27  ;;  %v7483_v27 = vld [vmem:[#allocation7 + $0x250] ss:$48 sps:$4 sm:$0xff]  }
 0x181   :  { %2630 = vmatprep.subr.bf16.mxu0 %v7437_v28  ;;  %2671 = vmatprep.subr.bf16.mxu1 %v7440_v29  ;;  %v7486_v28 = vld [vmem:[#allocation7 + $0x258] ss:$48 sps:$4 sm:$0xff]   ;;  %v584_v29 = vadd.f32 %v8471_v51, %v172_v14 }
 0x184   :  { %2631 = vmatpush1.bf16.msra.mxu0 %v7435_v31  ;;  %2672 = vmatpush1.bf16.msra.mxu1 %v7438_v32  ;;  %v545_v31 = vadd.f32 %v8473_v54, %v168_v16  ;;  %v7494_v54 = vld [vmem:[#allocation7 + $0x2bc] ss:$48 sps:$4 sm:$0xff]   ;;  %v7495_v16 = vld [vmem:[#allocation7 + $0x310] ss:$48 sps:$4 sm:$0xff]  }
 0x185   :  { %2632 = vmatprep.subr.bf16.mxu0 %v7443_v33  ;;  %2673 = vmatprep.subr.bf16.mxu1 %v7446_v34 }
 0x188   :  { %2633 = vmatpush1.bf16.msra.mxu0 %v7441_v35  ;;  %2674 = vmatpush1.bf16.msra.mxu1 %v7444_v36  ;;  %v7491_v36 = vld [vmem:[#allocation7 + $0x2b4] ss:$48 sps:$4 sm:$0xff]  }
 0x189   :  { %3091 = vmatprep.subr.bf16.mxu0 %v7449_v37  ;;  %3132 = vmatprep.subr.bf16.mxu1 %v7452_v38  ;;  %v586_v37 = vadd.f32 %v8475_v55, %v176_v21  ;;  %v7489_v55 = vld [vmem:[#allocation7 + $0x2b0] ss:$48 sps:$4 sm:$0xff]  }
 0x18a   :  { %v7501_v21 = vld [vmem:[#allocation7 + $0x370] ss:$48 sps:$4 sm:$0xff]  }
 0x18b   :  { %2635 = vmatmul.mubr.bf16.vlgmr.msra.gmra.mrb[16].mxu0 %v8442_v9  ;;  %2676 = vmatmul.mubr.bf16.vlgmr.msra.gmra.mrb[16].mxu1 %v8442_v9 }
 0x18c   :  { %3092 = vmatpush1.bf16.msra.mxu0 %v7447_v39  ;;  %3133 = vmatpush1.bf16.msra.mxu1 %v7450_v40 }
 0x18d   :  { %3093 = vmatprep.subr.bf16.mxu0 %v7455_v41  ;;  %3134 = vmatprep.subr.bf16.mxu1 %v7458_v42 }
 0x18e   :  { %3123 = vmatprep.mubr.bf16.mxu0 %v8451_v15  ;;  %3164 = vmatprep.mubr.bf16.mxu1 %v8451_v15 }
 0x190   :  { %3094 = vmatpush1.bf16.msra.mxu0 %v7453_v43  ;;  %3135 = vmatpush1.bf16.msra.mxu1 %v7456_v44 }
 0x191   :  { %3095 = vmatprep.subr.bf16.mxu0 %v7461_v45  ;;  %3136 = vmatprep.subr.bf16.mxu1 %v7464_v46 }
 0x194   :  { %3096 = vmatpush1.bf16.msra.mxu0 %v7459_v49  ;;  %3137 = vmatpush1.bf16.msra.mxu1 %v7462_v52 }
 0x195   :  { %3097 = vmatprep.subr.bf16.mxu0 %v7467_v53  ;;  %3138 = vmatprep.subr.bf16.mxu1 %v7470_v56  ;;  %v7492_v56 = vld [vmem:[#allocation7 + $0x2b8] ss:$48 sps:$4 sm:$0xff]  }
 0x198   :  { %3098 = vmatpush1.bf16.msra.mxu0 %v7465_v58  ;;  %3139 = vmatpush1.bf16.msra.mxu1 %v7468_v59 }
 0x199   :  { %3099 = vmatprep.subr.bf16.mxu0 %v7473_v60  ;;  %3140 = vmatprep.subr.bf16.mxu1 %v7476_v61 }
 0x19c   :  { %3100 = vmatpush1.bf16.msra.mxu0 %v7471_v0  ;;  %3141 = vmatpush1.bf16.msra.mxu1 %v7474_v1  ;;  %v7500_v0 = vld [vmem:[#allocation7 + $0x31c] ss:$48 sps:$4 sm:$0xff]  }
 0x19d   :  { %3101 = vmatprep.subr.bf16.mxu0 %v7479_v6  ;;  %3142 = vmatprep.subr.bf16.mxu1 %v7482_v7 }
 0x19e   :  { %v1038_v13 = vpop.f32.mrb[4].mxu0  ;;  %v1079_v26 = vpop.f32.mrb[4].mxu1 }
 0x19f   :  { %v1039_v32 = vadd.f32 %v1038_v13, %v660_v17  ;;  %v1080_v33 = vadd.f32 %v1079_v26, %v668_v19  ;;  %v1040_v34 = vpop.f32.mrb[5].mxu0  ;;  %v1081_v35 = vpop.f32.mrb[5].mxu1  ;;  %v7498_v17 = vld [vmem:[#allocation7 + $0x318] ss:$48 sps:$4 sm:$0xff]   ;;  %v7503_v19 = vld [vmem:[#allocation7 + $0x374] ss:$48 sps:$4 sm:$0xff]  }
 0x1a0   :  { %v1041_v38 = vadd.f32 %v1040_v34, %v664_v22  ;;  %v1082_v39 = vadd.f32 %v1081_v35, %v672_v23  ;;  %v1042_v40 = vpop.f32.mrb[6].mxu0  ;;  %v1083_v41 = vpop.f32.mrb[6].mxu1  ;;  %3102 = vmatpush1.bf16.msra.mxu0 %v7477_v11  ;;  %3143 = vmatpush1.bf16.msra.mxu1 %v7480_v12  ;;  %v7504_v22 = vld [vmem:[#allocation7 + $0x378] ss:$48 sps:$4 sm:$0xff]   ;;  %v7509_v23 = vld [vmem:[#allocation7 + $0x3d4] ss:$48 sps:$4 sm:$0xff]  }
 0x1a1   :  { %v1582_v50 = vsub.f32 %v543_v25, %v1039_v32  ;;  %v1586_v42 = vadd.f32 %v1039_v32, %v543_v25  ;;  %v1584_v43 = vsub.f32 %v584_v29, %v1080_v33  ;;  %v1588_v44 = vadd.f32 %v1080_v33, %v584_v29  ;;  %v1043_v51 = vpop.f32.mrb[7].mxu0  ;;  %v1084_v45 = vpop.f32.mrb[7].mxu1  ;;  %3103 = vmatprep.subr.bf16.mxu0 %v7485_v20  ;;  %v7506_v20 = vld [vmem:[#allocation7 + $0x37c] ss:$48 sps:$4 sm:$0xff]   ;;  %v7507_v25 = vld [vmem:[#allocation7 + $0x3d0] ss:$48 sps:$4 sm:$0xff]  }
 0x1a2   :  { %v1583_v46 = vsub.f32 %v545_v31, %v1041_v38  ;;  %v1587_v49 = vadd.f32 %v1041_v38, %v545_v31  ;;  %v1585_v52 = vsub.f32 %v586_v37, %v1082_v39  ;;  %v1589_v53 = vadd.f32 %v1082_v39, %v586_v37  ;;  %3144 = vmatprep.subr.bf16.mxu1 %v7488_v24  ;;  %v7512_v24 = vld [vmem:[#allocation7 + $0x3dc] ss:$48 sps:$4 sm:$0xff]   ;;  %v7510_v13 = vld [vmem:[#allocation7 + $0x3d8] ss:$48 sps:$4 sm:$0xff]   ;;  %v7515_v26 = vld [vmem:[#allocation7 + $0x434] ss:$48 sps:$4 sm:$0xff]  }
 0x1a3   :  { %v1590_v58 = vmax.f32 %v1586_v42, 0.0  ;;  %v1594_v59 = vmul.f32 %v1582_v50, %v1582_v50  ;;  %v1592_v60 = vmax.f32 %v1588_v44, 0.0  ;;  %v1596_v61 = vmul.f32 %v1584_v43, %v1584_v43  ;;  %v7516_v29 = vld [vmem:[#allocation7 + $0x438] ss:$48 sps:$4 sm:$0xff]   ;;  %v7521_v31 = vld [vmem:[#allocation7 + $0x494] ss:$48 sps:$4 sm:$0xff]  }
 0x1a4   :  { %v1591_v1 = vmax.f32 %v1587_v49, 0.0  ;;  %v1595_v2 = vmul.f32 %v1583_v46, %v1583_v46  ;;  %v1593_v6 = vmax.f32 %v1589_v53, 0.0  ;;  %v1597_v7 = vmul.f32 %v1585_v52, %v1585_v52  ;;  %3104 = vmatpush1.bf16.msra.mxu0 %v7483_v27  ;;  %3145 = vmatpush1.bf16.msra.mxu1 %v7486_v28  ;;  %v7518_v27 = vld [vmem:[#allocation7 + $0x43c] ss:$48 sps:$4 sm:$0xff]   ;;  %v7513_v28 = vld [vmem:[#allocation7 + $0x430] ss:$48 sps:$4 sm:$0xff]  }
 0x1a5   :  { %v8514_v10 = vsub.f32 %v1590_v58, %v1594_v59  ;;  %v8516_v11 = vsub.f32 %v1592_v60, %v1596_v61  ;;  %3105 = vmatprep.subr.bf16.mxu0 %v7491_v36  ;;  %3146 = vmatprep.subr.bf16.mxu1 %v7494_v54  ;;  %v7524_v32 = vld [vmem:[#allocation7 + $0x49c] ss:$48 sps:$4 sm:$0xff]   ;;  %v7519_v33 = vld [vmem:[#allocation7 + $0x490] ss:$48 sps:$4 sm:$0xff]   ;;  %v7522_v34 = vld [vmem:[#allocation7 + $0x498] ss:$48 sps:$4 sm:$0xff]  }
 0x1a6   :  { %v8518_v12 = vsub.f32 %v1591_v1, %v1595_v2  ;;  %v8520_v14 = vsub.f32 %v1593_v6, %v1597_v7  ;;  %v7527_v35 = vld [vmem:[#allocation7 + $0x4f4] ss:$48 sps:$4 sm:$0xff]   ;;  %v7530_v36 = vld [vmem:[#allocation7 + $0x4fc] ss:$48 sps:$4 sm:$0xff]   ;;  %v7525_v37 = vld [vmem:[#allocation7 + $0x4f0] ss:$48 sps:$4 sm:$0xff]  }
 0x1a7   :  { %v7528_v38 = vld [vmem:[#allocation7 + $0x4f8] ss:$48 sps:$4 sm:$0xff]   ;;  %v7533_v39 = vld [vmem:[#allocation7 + $0x554] ss:$48 sps:$4 sm:$0xff]   ;;  %v7536_v40 = vld [vmem:[#allocation7 + $0x55c] ss:$48 sps:$4 sm:$0xff]  }
 0x1a8   :  { %3106 = vmatpush1.bf16.msra.mxu0 %v7489_v55  ;;  %3147 = vmatpush1.bf16.msra.mxu1 %v7492_v56  ;;  %v7531_v41 = vld [vmem:[#allocation7 + $0x550] ss:$48 sps:$4 sm:$0xff]   ;;  %v7534_v50 = vld [vmem:[#allocation7 + $0x558] ss:$48 sps:$4 sm:$0xff]   ;;  %v7539_v42 = vld [vmem:[#allocation7 + $0x5b4] ss:$48 sps:$4 sm:$0xff]  }
 0x1a9   :  { %3107 = vmatprep.subr.bf16.mxu0 %v7497_v62  ;;  %3148 = vmatprep.subr.bf16.mxu1 %v7500_v0  ;;  %v7542_v43 = vld [vmem:[#allocation7 + $0x5bc] ss:$48 sps:$4 sm:$0xff]   ;;  %v7537_v44 = vld [vmem:[#allocation7 + $0x5b0] ss:$48 sps:$4 sm:$0xff]   ;;  %v7540_v51 = vld [vmem:[#allocation7 + $0x5b8] ss:$48 sps:$4 sm:$0xff]  }
 0x1aa   :  { %v6300_v45 = vld [vmem:[%s8674_s6 + $0x2] ss:$4 sm:$0xf]  ;;  %v1602_v54 = vmul.f32 0.5, %v8514_v10  ;;  %v1604_v52 = vmul.f32 0.5, %v8516_v11  ;;  %v1603_v56 = vmul.f32 0.5, %v8518_v12 }
 0x1ab   :  { %v1156_v46 = vrot.slane %v6300_v45, %v8488_v63  ;;  %v1164_v49 = vrot.slane %v6300_v45, %v8494_v3  ;;  %v1160_v53 = vrot.slane %v6300_v45, %v8497_v5  ;;  %v1168_v55 = vrot.slane %v6300_v45, %v8500_v8 }
 0x1ac   :  { %3108 = vmatpush1.bf16.msra.mxu0 %v7495_v16  ;;  %3149 = vmatpush1.bf16.msra.mxu1 %v7498_v17  ;;  %v1605_v58 = vmul.f32 0.5, %v8520_v14  ;;  %8119 = vtanh.f32 %v1602_v54  ;;  %v7546_v54 = vld [vmem:[#allocation8 + $0x300] ss:$8 sps:$4 sm:$0xff]  }
 0x1ad   :  { %3109 = vmatprep.subr.bf16.mxu0 %v7503_v19  ;;  %3150 = vmatprep.subr.bf16.mxu1 %v7506_v20  ;;  %8121 = vtanh.f32 %v1604_v52  ;;  %v7551_v52 = vld [vmem:[#allocation8 + $0x214] ss:$8 sps:$4 sm:$0xff]  }
 0x1ae   :  { %8123 = vtanh.f32 %v1603_v56  ;;  %v7549_v56 = vld [vmem:[#allocation8 + $0x210] ss:$8 sps:$4 sm:$0xff]  }
 0x1af   :  { %8125 = vtanh.f32 %v1605_v58  ;;  %v7552_v58 = vld [vmem:[#allocation8 + $0x310] ss:$8 sps:$4 sm:$0xff]  }
 0x1b0   :  { %3110 = vmatpush1.bf16.msra.mxu0 %v7501_v21  ;;  %3151 = vmatpush1.bf16.msra.mxu1 %v7504_v22 }
 0x1b1   :  { %3111 = vmatprep.subr.bf16.mxu0 %v7509_v23  ;;  %3152 = vmatprep.subr.bf16.mxu1 %v7512_v24 }
 0x1b4   :  { %3112 = vmatpush1.bf16.msra.mxu0 %v7507_v25  ;;  %3153 = vmatpush1.bf16.msra.mxu1 %v7510_v13 }
 0x1b5   :  { %3113 = vmatprep.subr.bf16.mxu0 %v7515_v26  ;;  %3154 = vmatprep.subr.bf16.mxu1 %v7518_v27 }
 0x1b6   :  { %v8120_v20 = vpop.eup %8119 }
 0x1b7   :  { %v8122_v21 = vpop.eup %8121  ;;  %v1610_v24 = vmul.f32 0.5, %v8120_v20  ;;  %v7581_v20 = vld [vmem:[#allocation8 + $0x264] ss:$8 sps:$4 sm:$0xff]  }
 0x1b8   :  { %3114 = vmatpush1.bf16.msra.mxu0 %v7513_v28  ;;  %3155 = vmatpush1.bf16.msra.mxu1 %v7516_v29  ;;  %v8124_v22 = vpop.eup %8123  ;;  %v1612_v13 = vmul.f32 0.5, %v8122_v21  ;;  %v7584_v21 = vld [vmem:[#allocation8 + $0x364] ss:$8 sps:$4 sm:$0xff]  }
 0x1b9   :  { %3115 = vmatprep.subr.bf16.mxu0 %v7521_v31  ;;  %3156 = vmatprep.subr.bf16.mxu1 %v7524_v32  ;;  %v8126_v23 = vpop.eup %8125  ;;  %v1611_v28 = vmul.f32 0.5, %v8124_v22  ;;  %v7579_v22 = vld [vmem:[#allocation8 + $0x260] ss:$8 sps:$4 sm:$0xff]  }
 0x1ba   :  { %v1613_v32 = vmul.f32 0.5, %v8126_v23  ;;  %v7582_v23 = vld [vmem:[#allocation8 + $0x360] ss:$8 sps:$4 sm:$0xff]  }
 0x1bc   :  { %3116 = vmatpush1.bf16.msra.mxu0 %v7519_v33  ;;  %3157 = vmatpush1.bf16.msra.mxu1 %v7522_v34  ;;  %v1614_v34 = vadd.f32 0.5, %v1610_v24  ;;  %v1617_v45 = vadd.f32 0.5, %v1613_v32  ;;  %v7587_v24 = vld [vmem:[#allocation8 + $0x274] ss:$8 sps:$4 sm:$0xff]  }
 0x1bd   :  { %3117 = vmatprep.subr.bf16.mxu0 %v7527_v35  ;;  %3158 = vmatprep.subr.bf16.mxu1 %v7530_v36 }
 0x1c0   :  { %3118 = vmatpush1.bf16.msra.mxu0 %v7525_v37  ;;  %3159 = vmatpush1.bf16.msra.mxu1 %v7528_v38  ;;  %v1616_v37 = vadd.f32 0.5, %v1612_v13  ;;  %v7585_v13 = vld [vmem:[#allocation8 + $0x270] ss:$8 sps:$4 sm:$0xff]  }
 0x1c1   :  { %3119 = vmatprep.subr.bf16.mxu0 %v7533_v39  ;;  %3160 = vmatprep.subr.bf16.mxu1 %v7536_v40 }
 0x1c4   :  { %3120 = vmatpush1.bf16.msra.mxu0 %v7531_v41  ;;  %3161 = vmatpush1.bf16.msra.mxu1 %v7534_v50  ;;  %v1615_v50 = vadd.f32 0.5, %v1611_v28  ;;  %v7596_v28 = vld [vmem:[#allocation8 + $0x384] ss:$8 sps:$4 sm:$0xff]  }
 0x1c5   :  { %3121 = vmatprep.subr.bf16.mxu0 %v7539_v42  ;;  %3162 = vmatprep.subr.bf16.mxu1 %v7542_v43 }
 0x1c8   :  { %3122 = vmatpush1.bf16.msra.mxu0 %v7537_v44  ;;  %3163 = vmatpush1.bf16.msra.mxu1 %v7540_v51  ;;  %v7543_v44 = vld [vmem:[#allocation8 + $0x200] ss:$8 sps:$4 sm:$0xff]   ;;  %v7545_v51 = vld [vmem:[#allocation8 + $0x204] ss:$8 sps:$4 sm:$0xff]  }
 0x1c9   :  { %3617 = vmatprep.subr.bf16.mxu0 %v7545_v51  ;;  %v7605_v51 = vld [vmem:[#allocation8 + $0x2a4] ss:$8 sps:$4 sm:$0xff]  }
 0x1cb   :  { %3124 = vmatmul.mubr.bf16.vlgmr.msra.gmra.mrb[20].mxu0 %v8459_v18  ;;  %3165 = vmatmul.mubr.bf16.vlgmr.msra.gmra.mrb[20].mxu1 %v8459_v18 }
 0x1cc   :  { %3618 = vmatpush1.bf16.msra.mxu0 %v7543_v44  ;;  %v7600_v44 = vld [vmem:[#allocation8 + $0x390] ss:$8 sps:$4 sm:$0xff]  }
 0x1cd   :  { %3619 = vmatprep.subr.bf16.mxu0 %v7551_v52  ;;  %v7611_v52 = vld [vmem:[#allocation8 + $0x2b4] ss:$8 sps:$4 sm:$0xff]  }
 0x1d0   :  { %3620 = vmatpush1.bf16.msra.mxu0 %v7549_v56  ;;  %v7609_v56 = vld [vmem:[#allocation8 + $0x2b0] ss:$8 sps:$4 sm:$0xff]  }
 0x1de   :  { %v1534_v59 = vpop.f32.mrb[8].mxu0  ;;  %v1575_v60 = vpop.f32.mrb[8].mxu1 }
 0x1df   :  { %v1535_v61 = vadd.f32 %v1534_v59, %v1156_v46  ;;  %v1576_v62 = vadd.f32 %v1575_v60, %v1164_v49  ;;  %v1536_v0 = vpop.f32.mrb[9].mxu0  ;;  %v1577_v1 = vpop.f32.mrb[9].mxu1  ;;  %v7548_v46 = vld [vmem:[#allocation8 + $0x304] ss:$8 sps:$4 sm:$0xff]  }
 0x1e0   :  { %v1537_v2 = vadd.f32 %v1536_v0, %v1160_v53  ;;  %v1578_v6 = vadd.f32 %v1577_v1, %v1168_v55  ;;  %v1538_v7 = vpop.f32.mrb[10].mxu0  ;;  %v1579_v10 = vpop.f32.mrb[10].mxu1  ;;  %v7554_v53 = vld [vmem:[#allocation8 + $0x314] ss:$8 sps:$4 sm:$0xff]   ;;  %3658 = vmatprep.subr.bf16.mxu1 %v7548_v46  ;;  %v7557_v59 = vld [vmem:[#allocation8 + $0x224] ss:$8 sps:$4 sm:$0xff]  }
 0x1e1   :  { %v1618_v11 = vmul.f32 0.5, %v1535_v61  ;;  %v1620_v16 = vmul.f32 0.5, %v1576_v62  ;;  %v1539_v17 = vpop.f32.mrb[11].mxu0  ;;  %v1580_v19 = vpop.f32.mrb[11].mxu1  ;;  %3659 = vmatpush1.bf16.msra.mxu1 %v7546_v54  ;;  %v7560_v60 = vld [vmem:[#allocation8 + $0x324] ss:$8 sps:$4 sm:$0xff]   ;;  %3621 = vmatprep.subr.bf16.mxu0 %v7557_v59 }
 0x1e2   :  { %v1619_v12 = vmul.f32 0.5, %v1537_v2  ;;  %v1621_v14 = vmul.f32 0.5, %v1578_v6  ;;  %3660 = vmatprep.subr.bf16.mxu1 %v7554_v53  ;;  %v7555_v61 = vld [vmem:[#allocation8 + $0x220] ss:$8 sps:$4 sm:$0xff]   ;;  %v7563_v0 = vld [vmem:[#allocation8 + $0x234] ss:$8 sps:$4 sm:$0xff]  }
 0x1e3   :  { %8127 = vtanh.f32 %v1618_v11  ;;  %v7558_v62 = vld [vmem:[#allocation8 + $0x320] ss:$8 sps:$4 sm:$0xff]   ;;  %v7566_v1 = vld [vmem:[#allocation8 + $0x334] ss:$8 sps:$4 sm:$0xff]   ;;  %3622 = vmatpush1.bf16.msra.mxu0 %v7555_v61  ;;  %v7561_v2 = vld [vmem:[#allocation8 + $0x230] ss:$8 sps:$4 sm:$0xff]  }
 0x1e4   :  { %8129 = vtanh.f32 %v1620_v16  ;;  %3623 = vmatprep.subr.bf16.mxu0 %v7563_v0  ;;  %v7564_v6 = vld [vmem:[#allocation8 + $0x330] ss:$8 sps:$4 sm:$0xff]   ;;  %v7569_v7 = vld [vmem:[#allocation8 + $0x244] ss:$8 sps:$4 sm:$0xff]   ;;  %v7567_v11 = vld [vmem:[#allocation8 + $0x240] ss:$8 sps:$4 sm:$0xff]  }
 0x1e5   :  { %8131 = vtanh.f32 %v1619_v12  ;;  %3661 = vmatpush1.bf16.msra.mxu1 %v7552_v58  ;;  %v7572_v10 = vld [vmem:[#allocation8 + $0x344] ss:$8 sps:$4 sm:$0xff]   ;;  %v7570_v16 = vld [vmem:[#allocation8 + $0x340] ss:$8 sps:$4 sm:$0xff]   ;;  %v7575_v17 = vld [vmem:[#allocation8 + $0x254] ss:$8 sps:$4 sm:$0xff]  }
 0x1e6   :  { %8133 = vtanh.f32 %v1621_v14  ;;  %3662 = vmatprep.subr.bf16.mxu1 %v7560_v60  ;;  %v7578_v19 = vld [vmem:[#allocation8 + $0x354] ss:$8 sps:$4 sm:$0xff]   ;;  %v7573_v12 = vld [vmem:[#allocation8 + $0x250] ss:$8 sps:$4 sm:$0xff]   ;;  %v7603_v54 = vld [vmem:[#allocation8 + $0x2a0] ss:$8 sps:$4 sm:$0xff]  }
 0x1e7   :  { %3624 = vmatpush1.bf16.msra.mxu0 %v7561_v2  ;;  %v7576_v14 = vld [vmem:[#allocation8 + $0x350] ss:$8 sps:$4 sm:$0xff]   ;;  %v7606_v46 = vld [vmem:[#allocation8 + $0x3a0] ss:$8 sps:$4 sm:$0xff]   ;;  %v7614_v53 = vld [vmem:[#allocation8 + $0x3b4] ss:$8 sps:$4 sm:$0xff]  }
 0x1e8   :  { %3625 = vmatprep.subr.bf16.mxu0 %v7569_v7  ;;  %v7612_v58 = vld [vmem:[#allocation8 + $0x3b0] ss:$8 sps:$4 sm:$0xff]   ;;  %v7617_v59 = vld [vmem:[#allocation8 + $0x2c4] ss:$8 sps:$4 sm:$0xff]   ;;  %v7615_v61 = vld [vmem:[#allocation8 + $0x2c0] ss:$8 sps:$4 sm:$0xff]  }
 0x1e9   :  { %3663 = vmatpush1.bf16.msra.mxu1 %v7558_v62  ;;  %v7620_v60 = vld [vmem:[#allocation8 + $0x3c4] ss:$8 sps:$4 sm:$0xff]   ;;  %v7618_v62 = vld [vmem:[#allocation8 + $0x3c0] ss:$8 sps:$4 sm:$0xff]   ;;  %v7623_v0 = vld [vmem:[#allocation8 + $0x2d4] ss:$8 sps:$4 sm:$0xff]  }
 0x1ea   :  { %3664 = vmatprep.subr.bf16.mxu1 %v7566_v1  ;;  %v7626_v1 = vld [vmem:[#allocation8 + $0x3d4] ss:$8 sps:$4 sm:$0xff]   ;;  %v7621_v2 = vld [vmem:[#allocation8 + $0x2d0] ss:$8 sps:$4 sm:$0xff]   ;;  %v7629_v7 = vld [vmem:[#allocation8 + $0x2e4] ss:$8 sps:$4 sm:$0xff]  }
 0x1eb   :  { %3626 = vmatpush1.bf16.msra.mxu0 %v7567_v11  ;;  %v7627_v11 = vld [vmem:[#allocation8 + $0x2e0] ss:$8 sps:$4 sm:$0xff]  }
 0x1ec   :  { %3627 = vmatprep.subr.bf16.mxu0 %v7575_v17  ;;  %v7635_v17 = vld [vmem:[#allocation8 + $0x2f4] ss:$8 sps:$4 sm:$0xff]  }
 0x1ed   :  { %v8128_v25 = vpop.eup %8127  ;;  %3665 = vmatpush1.bf16.msra.mxu1 %v7564_v6  ;;  %v7624_v6 = vld [vmem:[#allocation8 + $0x3d0] ss:$8 sps:$4 sm:$0xff]  }
 0x1ee   :  { %v8130_v26 = vpop.eup %8129  ;;  %v1626_v27 = vmul.f32 0.5, %v8128_v25  ;;  %3666 = vmatprep.subr.bf16.mxu1 %v7572_v10  ;;  %v7590_v25 = vld [vmem:[#allocation8 + $0x374] ss:$8 sps:$4 sm:$0xff]   ;;  %v7632_v10 = vld [vmem:[#allocation8 + $0x3e4] ss:$8 sps:$4 sm:$0xff]  }
 0x1ef   :  { %v8132_v29 = vpop.eup %8131  ;;  %v1628_v31 = vmul.f32 0.5, %v8130_v26  ;;  %3628 = vmatpush1.bf16.msra.mxu0 %v7573_v12  ;;  %v7588_v26 = vld [vmem:[#allocation8 + $0x370] ss:$8 sps:$4 sm:$0xff]  }
 0x1f0   :  { %v8134_v33 = vpop.eup %8133  ;;  %v1630_v35 = vadd.f32 0.5, %v1626_v27  ;;  %v1627_v36 = vmul.f32 0.5, %v8132_v29  ;;  %3629 = vmatprep.subr.bf16.mxu0 %v7581_v20  ;;  %v7593_v27 = vld [vmem:[#allocation8 + $0x284] ss:$8 sps:$4 sm:$0xff]   ;;  %v7591_v29 = vld [vmem:[#allocation8 + $0x280] ss:$8 sps:$4 sm:$0xff]  }
 0x1f1   :  { %v1632_v38 = vadd.f32 0.5, %v1628_v31  ;;  %v1629_v39 = vmul.f32 0.5, %v8134_v33  ;;  %3667 = vmatpush1.bf16.msra.mxu1 %v7570_v16  ;;  %v7594_v31 = vld [vmem:[#allocation8 + $0x380] ss:$8 sps:$4 sm:$0xff]   ;;  %v7636_v12 = vld [vmem:[#allocation8 + $0x3f0] ss:$8 sps:$4 sm:$0xff]  }
 0x1f2   :  { %v8535_v40 = vmul.f32 %v1630_v35, %v1614_v34  ;;  %v1631_v41 = vadd.f32 0.5, %v1627_v36  ;;  %3668 = vmatprep.subr.bf16.mxu1 %v7578_v19  ;;  %v7630_v16 = vld [vmem:[#allocation8 + $0x3e0] ss:$8 sps:$4 sm:$0xff]   ;;  %v7633_v19 = vld [vmem:[#allocation8 + $0x2f0] ss:$8 sps:$4 sm:$0xff]  }
 0x1f3   :  { %v8537_v42 = vmul.f32 %v1632_v38, %v1616_v37  ;;  %v1633_v43 = vadd.f32 0.5, %v1629_v39  ;;  %3630 = vmatpush1.bf16.msra.mxu0 %v7579_v22  ;;  %v7641_v20 = vld [vmem:[#allocation8 + $0x4] ss:$8 sps:$4 sm:$0xff]  }
 0x1f4   :  { %v8539_v49 = vmul.f32 %v1631_v41, %v1615_v50  ;;  %3631 = vmatprep.subr.bf16.mxu0 %v7587_v24  ;;  %v7599_v41 = vld [vmem:[#allocation8 + $0x294] ss:$8 sps:$4 sm:$0xff]  }
 0x1f5   :  { %v8541_v55 = vmul.f32 %v1633_v43, %v1617_v45  ;;  %3669 = vmatpush1.bf16.msra.mxu1 %v7576_v14  ;;  %v7602_v50 = vld [vmem:[#allocation8 + $0x394] ss:$8 sps:$4 sm:$0xff]   ;;  %v7597_v43 = vld [vmem:[#allocation8 + $0x290] ss:$8 sps:$4 sm:$0xff]   ;;  %v7608_v45 = vld [vmem:[#allocation8 + $0x3a4] ss:$8 sps:$4 sm:$0xff]  }
 0x1f6   :  { %3670 = vmatprep.subr.bf16.mxu1 %v7584_v21  ;;  %v7638_v14 = vld [vmem:[#allocation8 + $0x3f4] ss:$8 sps:$4 sm:$0xff]   ;;  %v7644_v21 = vld [vmem:[#allocation8 + $0x104] ss:$8 sps:$4 sm:$0xff]  }
 0x1f7   :  { %3632 = vmatpush1.bf16.msra.mxu0 %v7585_v13 }
 0x1f8   :  { %3633 = vmatprep.subr.bf16.mxu0 %v7593_v27 }
 0x1f9   :  { %3671 = vmatpush1.bf16.msra.mxu1 %v7582_v23 }
 0x1fa   :  { %3672 = vmatprep.subr.bf16.mxu1 %v7590_v25 }
 0x1fb   :  { %3634 = vmatpush1.bf16.msra.mxu0 %v7591_v29  ;;  %v6432_v29 = vld [vmem:[%s8674_s6 + $0x11] ss:$4 sm:$0xf] }
 0x1fc   :  { %3635 = vmatprep.subr.bf16.mxu0 %v7599_v41  ;;  %v6497_v41 = vld [vmem:[%s8674_s6 + $0x12] ss:$4 sm:$0xf] }
 0x1fd   :  { %3673 = vmatpush1.bf16.msra.mxu1 %v7588_v26 }
 0x1fe   :  { %3674 = vmatprep.subr.bf16.mxu1 %v7596_v28 }
 0x1ff   :  { %3636 = vmatpush1.bf16.msra.mxu0 %v7597_v43 }
 0x200   :  { %3637 = vmatprep.subr.bf16.mxu0 %v7605_v51 }
 0x201   :  { %3675 = vmatpush1.bf16.msra.mxu1 %v7594_v31  ;;  %v6367_v31 = vld [vmem:[%s8674_s6 + $0x10] ss:$4 sm:$0xf] }
 0x202   :  { %3676 = vmatprep.subr.bf16.mxu1 %v7602_v50  ;;  %v1776_v50 = vrot.slane %v6367_v31, %v8488_v63  ;;  %v1784_v43 = vrot.slane %v6367_v31, %v8494_v3  ;;  %v1788_v51 = vrot.slane %v6367_v31, %v8500_v8 }
 0x203   :  { %3638 = vmatpush1.bf16.msra.mxu0 %v7603_v54 }
 0x204   :  { %3639 = vmatprep.subr.bf16.mxu0 %v7611_v52  ;;  %v2762_v52 = vrot.slane %v6497_v41, %v8494_v3 }
 0x205   :  { %3677 = vmatpush1.bf16.msra.mxu1 %v7600_v44  ;;  %v1780_v44 = vrot.slane %v6367_v31, %v8497_v5 }
 0x206   :  { %3678 = vmatprep.subr.bf16.mxu1 %v7608_v45 }
 0x207   :  { %3640 = vmatpush1.bf16.msra.mxu0 %v7609_v56 }
 0x208   :  { %3641 = vmatprep.subr.bf16.mxu0 %v7617_v59  ;;  %v2766_v59 = vrot.slane %v6497_v41, %v8500_v8 }
 0x209   :  { %3679 = vmatpush1.bf16.msra.mxu1 %v7606_v46  ;;  %v2754_v46 = vrot.slane %v6497_v41, %v8488_v63 }
 0x20a   :  { %3680 = vmatprep.subr.bf16.mxu1 %v7614_v53 }
 0x20b   :  { %3642 = vmatpush1.bf16.msra.mxu0 %v7615_v61 }
 0x20c   :  { %3643 = vmatprep.subr.bf16.mxu0 %v7623_v0 }
 0x20d   :  { %3681 = vmatpush1.bf16.msra.mxu1 %v7612_v58  ;;  %v2758_v58 = vrot.slane %v6497_v41, %v8497_v5 }
 0x20e   :  { %3682 = vmatprep.subr.bf16.mxu1 %v7620_v60 }
 0x20f   :  { %3644 = vmatpush1.bf16.msra.mxu0 %v7621_v2 }
 0x210   :  { %3645 = vmatprep.subr.bf16.mxu0 %v7629_v7 }
 0x211   :  { %3683 = vmatpush1.bf16.msra.mxu1 %v7618_v62 }
 0x212   :  { %3684 = vmatprep.subr.bf16.mxu1 %v7626_v1 }
 0x213   :  { %3646 = vmatpush1.bf16.msra.mxu0 %v7627_v11 }
 0x214   :  { %3647 = vmatprep.subr.bf16.mxu0 %v7635_v17 }
 0x215   :  { %3685 = vmatpush1.bf16.msra.mxu1 %v7624_v6 }
 0x216   :  { %3686 = vmatprep.subr.bf16.mxu1 %v7632_v10 }
 0x217   :  { %3648 = vmatpush1.bf16.msra.mxu0 %v7633_v19 }
 0x218   :  { %4019 = vmatprep.subr.bf16.mxu0 %v7641_v20 }
 0x219   :  { %3687 = vmatpush1.bf16.msra.mxu1 %v7630_v16 }
 0x21a   :  { %3688 = vmatprep.subr.bf16.mxu1 %v7638_v14 }
 0x21d   :  { %3689 = vmatpush1.bf16.msra.mxu1 %v7636_v12 }
 0x21e   :  { %v8543_v32 = vpop.f32.mrb[12].mxu0  ;;  %v8545_v33 = vpop.f32.mrb[12].mxu1  ;;  %4060 = vmatprep.subr.bf16.mxu1 %v7644_v21 }
 0x21f   :  { %v8547_v34 = vpop.f32.mrb[13].mxu0  ;;  %v8549_v35 = vpop.f32.mrb[13].mxu1  ;;  %v2148_v60 = vadd.f32 %v8543_v32, %v1776_v50  ;;  %v2189_v61 = vadd.f32 %v8545_v33, %v1784_v43 }
 0x220   :  { %v2151_v36 = vpop.f32.mrb[14].mxu0  ;;  %v2192_v37 = vpop.f32.mrb[14].mxu1  ;;  %v2150_v62 = vadd.f32 %v8547_v34, %v1780_v44  ;;  %v2191_v0 = vadd.f32 %v8549_v35, %v1788_v51 }
 0x221   :  { %v2152_v38 = vpop.f32.mrb[15].mxu0  ;;  %v2193_v39 = vpop.f32.mrb[15].mxu1  ;;  %v2265_v36 = vrot.slane %v6432_v29, %v8488_v63  ;;  %v2273_v37 = vrot.slane %v6432_v29, %v8494_v3 }
 0x222   :  { %v2269_v38 = vrot.slane %v6432_v29, %v8497_v5  ;;  %v2277_v39 = vrot.slane %v6432_v29, %v8500_v8 }
 0x25e   :  { %v2636_v22 = vpop.f32.mrb[16].mxu0  ;;  %v2677_v23 = vpop.f32.mrb[16].mxu1 }
 0x25f   :  { %v2638_v24 = vpop.f32.mrb[17].mxu0  ;;  %v2679_v25 = vpop.f32.mrb[17].mxu1  ;;  %v2637_v45 = vadd.f32 %v2636_v22, %v2265_v36  ;;  %v2678_v54 = vadd.f32 %v2677_v23, %v2273_v37 }
 0x260   :  { %v2640_v13 = vpop.f32.mrb[18].mxu0  ;;  %v2681_v26 = vpop.f32.mrb[18].mxu1  ;;  %v2639_v53 = vadd.f32 %v2638_v24, %v2269_v38  ;;  %v2680_v56 = vadd.f32 %v2679_v25, %v2277_v39 }
 0x261   :  { %v2641_v27 = vpop.f32.mrb[19].mxu0  ;;  %v2682_v28 = vpop.f32.mrb[19].mxu1  ;;  %v3209_v6 = vmul.f32 0.5, %v2637_v45  ;;  %v3211_v7 = vmul.f32 0.5, %v2678_v54 }
 0x262   :  { %v3210_v19 = vmul.f32 0.5, %v2639_v53  ;;  %v3212_v12 = vmul.f32 0.5, %v2680_v56 }
 0x263   :  { %8135 = vtanh.f32 %v3209_v6 }
 0x264   :  { %8137 = vtanh.f32 %v3211_v7 }
 0x265   :  { %8139 = vtanh.f32 %v3210_v19 }
 0x266   :  { %8141 = vtanh.f32 %v3212_v12 }
 0x26d   :  { %v8136_v53 = vpop.eup %8135 }
 0x26e   :  { %v8138_v56 = vpop.eup %8137 }
 0x29e   :  { %v3125_v1 = vpop.f32.mrb[20].mxu0  ;;  %v3166_v2 = vpop.f32.mrb[20].mxu1 }
 0x29f   :  { %v3126_v10 = vadd.f32 %v3125_v1, %v2754_v46  ;;  %v3167_v11 = vadd.f32 %v3166_v2, %v2762_v52  ;;  %v3127_v16 = vpop.f32.mrb[21].mxu0  ;;  %v3168_v17 = vpop.f32.mrb[21].mxu1 }
 0x2a0   :  { %v3128_v14 = vadd.f32 %v3127_v16, %v2758_v58  ;;  %v3169_v20 = vadd.f32 %v3168_v17, %v2766_v59  ;;  %v3129_v21 = vpop.f32.mrb[22].mxu0  ;;  %v3170_v32 = vpop.f32.mrb[22].mxu1 }
 0x2a1   :  { %v3173_v22 = vsub.f32 %v2148_v60, %v3126_v10  ;;  %v3177_v33 = vadd.f32 %v3126_v10, %v2148_v60  ;;  %v3175_v23 = vsub.f32 %v2189_v61, %v3167_v11  ;;  %v3179_v34 = vadd.f32 %v3167_v11, %v2189_v61  ;;  %v3130_v24 = vpop.f32.mrb[23].mxu0  ;;  %v3171_v35 = vpop.f32.mrb[23].mxu1 }
 0x2a2   :  { %v3174_v25 = vsub.f32 %v2150_v62, %v3128_v14  ;;  %v3178_v13 = vadd.f32 %v3128_v14, %v2150_v62  ;;  %v3176_v26 = vsub.f32 %v2191_v0, %v3169_v20  ;;  %v3180_v27 = vadd.f32 %v3169_v20, %v2191_v0  ;;  %v8140_v58 = vpop.eup %8139 }
 0x2a3   :  { %v3181_v28 = vmax.f32 %v3177_v33, 0.0  ;;  %v3185_v29 = vmul.f32 %v3173_v22, %v3173_v22  ;;  %v3183_v31 = vmax.f32 %v3179_v34, 0.0  ;;  %v3187_v36 = vmul.f32 %v3175_v23, %v3175_v23  ;;  %v8142_v59 = vpop.eup %8141 }
 0x2a4   :  { %v3182_v37 = vmax.f32 %v3178_v13, 0.0  ;;  %v3186_v38 = vmul.f32 %v3174_v25, %v3174_v25  ;;  %v3184_v39 = vmax.f32 %v3180_v27, 0.0  ;;  %v3188_v41 = vmul.f32 %v3176_v26, %v3176_v26  ;;  %v7639_v13 = vld [vmem:[#allocation8] ss:$8 sps:$4 sm:$0xff]  }
 0x2a5   :  { %v3189_v50 = vsub.f32 %v3181_v28, %v3185_v29  ;;  %v3191_v43 = vsub.f32 %v3183_v31, %v3187_v36  ;;  %v3217_v60 = vmul.f32 0.5, %v8136_v53  ;;  %v3219_v62 = vmul.f32 0.5, %v8138_v56  ;;  %v7642_v27 = vld [vmem:[#allocation8 + $0x100] ss:$8 sps:$4 sm:$0xff]   ;;  %v7647_v31 = vld [vmem:[#allocation8 + $0x14] ss:$8 sps:$4 sm:$0xff]  }
 0x2a6   :  { %v3190_v44 = vsub.f32 %v3182_v37, %v3186_v38  ;;  %v3192_v51 = vsub.f32 %v3184_v39, %v3188_v41  ;;  %v3218_v1 = vmul.f32 0.5, %v8140_v58  ;;  %v3220_v7 = vmul.f32 0.5, %v8142_v59  ;;  %v7650_v37 = vld [vmem:[#allocation8 + $0x114] ss:$8 sps:$4 sm:$0xff]   ;;  %v7645_v39 = vld [vmem:[#allocation8 + $0x10] ss:$8 sps:$4 sm:$0xff]  }
 0x2a7   :  { %v3193_v45 = vmul.f32 0.5, %v3189_v50  ;;  %v3195_v54 = vmul.f32 0.5, %v3191_v43  ;;  %v3221_v16 = vadd.f32 0.5, %v3217_v60  ;;  %v3223_v12 = vadd.f32 0.5, %v3219_v62  ;;  %v7648_v41 = vld [vmem:[#allocation8 + $0x110] ss:$8 sps:$4 sm:$0xff]  }
 0x2a8   :  { %v3194_v46 = vmul.f32 0.5, %v3190_v44  ;;  %v3196_v52 = vmul.f32 0.5, %v3192_v51  ;;  %v3222_v21 = vadd.f32 0.5, %v3218_v1  ;;  %v3224_v33 = vadd.f32 0.5, %v3220_v7  ;;  %v7653_v50 = vld [vmem:[#allocation8 + $0x24] ss:$8 sps:$4 sm:$0xff]  }
 0x2a9   :  { %8143 = vtanh.f32 %v3193_v45  ;;  %v1639_v36 = vpack.c.bf16 %v8539_v49, %v8539_v49  ;;  %v1641_v38 = vpack.c.bf16 %v8541_v55, %v8541_v55  ;;  %v7656_v43 = vld [vmem:[#allocation8 + $0x124] ss:$8 sps:$4 sm:$0xff]   ;;  %v7651_v44 = vld [vmem:[#allocation8 + $0x20] ss:$8 sps:$4 sm:$0xff]   ;;  %v7659_v51 = vld [vmem:[#allocation8 + $0x34] ss:$8 sps:$4 sm:$0xff]  }
 0x2aa   :  { %8145 = vtanh.f32 %v3195_v54  ;;  %v7654_v49 = vld [vmem:[#allocation8 + $0x120] ss:$8 sps:$4 sm:$0xff]   ;;  %v7662_v45 = vld [vmem:[#allocation8 + $0x134] ss:$8 sps:$4 sm:$0xff]   ;;  %v7657_v54 = vld [vmem:[#allocation8 + $0x30] ss:$8 sps:$4 sm:$0xff]  }
 0x2ab   :  { %8147 = vtanh.f32 %v3194_v46  ;;  %v7660_v55 = vld [vmem:[#allocation8 + $0x130] ss:$8 sps:$4 sm:$0xff]   ;;  %v7665_v46 = vld [vmem:[#allocation8 + $0x44] ss:$8 sps:$4 sm:$0xff]   ;;  %v7663_v53 = vld [vmem:[#allocation8 + $0x40] ss:$8 sps:$4 sm:$0xff]  }
 0x2ac   :  { %8149 = vtanh.f32 %v3196_v52  ;;  %v7668_v52 = vld [vmem:[#allocation8 + $0x144] ss:$8 sps:$4 sm:$0xff]   ;;  %v7666_v56 = vld [vmem:[#allocation8 + $0x140] ss:$8 sps:$4 sm:$0xff]   ;;  %v7671_v58 = vld [vmem:[#allocation8 + $0x54] ss:$8 sps:$4 sm:$0xff]  }
 0x2ad   :  { %v7674_v59 = vld [vmem:[#allocation8 + $0x154] ss:$8 sps:$4 sm:$0xff]   ;;  %v7669_v60 = vld [vmem:[#allocation8 + $0x50] ss:$8 sps:$4 sm:$0xff]   ;;  %v7677_v62 = vld [vmem:[#allocation8 + $0x64] ss:$8 sps:$4 sm:$0xff]  }
 0x2ae   :  { %v7675_v1 = vld [vmem:[#allocation8 + $0x60] ss:$8 sps:$4 sm:$0xff]   ;;  %v7686_v7 = vld [vmem:[#allocation8 + $0x174] ss:$8 sps:$4 sm:$0xff]  }
 0x2b3   :  { %v8144_v61 = vpop.eup %8143 }
 0x2b4   :  { %v8146_v0 = vpop.eup %8145  ;;  %v3201_v2 = vmul.f32 0.5, %v8144_v61  ;;  %v7672_v61 = vld [vmem:[#allocation8 + $0x150] ss:$8 sps:$4 sm:$0xff]  }
 0x2b5   :  { %v8148_v6 = vpop.eup %8147  ;;  %v3203_v10 = vmul.f32 0.5, %v8146_v0  ;;  %v7680_v0 = vld [vmem:[#allocation8 + $0x164] ss:$8 sps:$4 sm:$0xff]  }
 0x2b6   :  { %v8150_v11 = vpop.eup %8149  ;;  %v3205_v17 = vadd.f32 0.5, %v3201_v2  ;;  %v3202_v19 = vmul.f32 0.5, %v8148_v6  ;;  %v7678_v2 = vld [vmem:[#allocation8 + $0x160] ss:$8 sps:$4 sm:$0xff]   ;;  %v7683_v6 = vld [vmem:[#allocation8 + $0x74] ss:$8 sps:$4 sm:$0xff]  }
 0x2b7   :  { %v3207_v14 = vadd.f32 0.5, %v3203_v10  ;;  %v3204_v20 = vmul.f32 0.5, %v8150_v11  ;;  %v7681_v10 = vld [vmem:[#allocation8 + $0x70] ss:$8 sps:$4 sm:$0xff]  }
 0x2b8   :  { %v3206_v32 = vadd.f32 0.5, %v3202_v19  ;;  %v3225_v22 = vmul.f32 %v3221_v16, %v3205_v17  ;;  %v7684_v11 = vld [vmem:[#allocation8 + $0x170] ss:$8 sps:$4 sm:$0xff]   ;;  %v7689_v16 = vld [vmem:[#allocation8 + $0x84] ss:$8 sps:$4 sm:$0xff]  }
 0x2b9   :  { %v3208_v23 = vadd.f32 0.5, %v3204_v20  ;;  %v3227_v34 = vmul.f32 %v3223_v12, %v3207_v14  ;;  %v7692_v17 = vld [vmem:[#allocation8 + $0x184] ss:$8 sps:$4 sm:$0xff]   ;;  %v7687_v19 = vld [vmem:[#allocation8 + $0x80] ss:$8 sps:$4 sm:$0xff]  }
 0x2ba   :  { %v3226_v24 = vmul.f32 %v3222_v21, %v3206_v32  ;;  %v3229_v28 = vpack.c.bf16 %v3225_v22, %v3225_v22  ;;  %v7690_v12 = vld [vmem:[#allocation8 + $0x180] ss:$8 sps:$4 sm:$0xff]   ;;  %v7695_v14 = vld [vmem:[#allocation8 + $0x94] ss:$8 sps:$4 sm:$0xff]   ;;  %v7693_v21 = vld [vmem:[#allocation8 + $0x90] ss:$8 sps:$4 sm:$0xff]  }
 0x2bb   :  { %v3228_v35 = vmul.f32 %v3224_v33, %v3208_v23  ;;  %v3231_v29 = vpack.c.bf16 %v3227_v34, %v3227_v34  ;;  %v7698_v20 = vld [vmem:[#allocation8 + $0x194] ss:$8 sps:$4 sm:$0xff]   ;;  %v7696_v32 = vld [vmem:[#allocation8 + $0x190] ss:$8 sps:$4 sm:$0xff]   ;;  %v7701_v22 = vld [vmem:[#allocation8 + $0xa4] ss:$8 sps:$4 sm:$0xff]  }
 0x2bc   :  { %v3230_v25 = vpack.c.bf16 %v3226_v24, %v3226_v24  ;;  %v7704_v33 = vld [vmem:[#allocation8 + $0x1a4] ss:$8 sps:$4 sm:$0xff]   ;;  %v7699_v23 = vld [vmem:[#allocation8 + $0xa0] ss:$8 sps:$4 sm:$0xff]   ;;  %v7707_v24 = vld [vmem:[#allocation8 + $0xb4] ss:$8 sps:$4 sm:$0xff]  }
 0x2bd   :  { %v3232_v26 = vpack.c.bf16 %v3228_v35, %v3228_v35  ;;  %v7702_v34 = vld [vmem:[#allocation8 + $0x1a0] ss:$8 sps:$4 sm:$0xff]   ;;  %v7710_v35 = vld [vmem:[#allocation8 + $0x1b4] ss:$8 sps:$4 sm:$0xff]  }
 0x2be   :  { %3649 = vmatprep.mubr.bf16.mxu0 %v3230_v25  ;;  %v7705_v25 = vld [vmem:[#allocation8 + $0xb0] ss:$8 sps:$4 sm:$0xff]  }
 0x2bf   :  { %3690 = vmatprep.mubr.bf16.mxu1 %v3232_v26  ;;  %3650 = vmatmul.mubr.bf16.vlgmr.msra.gmra.mrb[24].mxu0 %v3229_v28  ;;  %v7713_v26 = vld [vmem:[#allocation8 + $0xc4] ss:$8 sps:$4 sm:$0xff]   ;;  %v7711_v28 = vld [vmem:[#allocation8 + $0xc0] ss:$8 sps:$4 sm:$0xff]  }
 0x2c0   :  { %3691 = vmatmul.mubr.bf16.vlgmr.msra.gmra.mrb[24].mxu1 %v3231_v29  ;;  %4020 = vmatpush1.bf16.msra.mxu0 %v7639_v13  ;;  %v7708_v13 = vld [vmem:[#allocation8 + $0x1b0] ss:$8 sps:$4 sm:$0xff]   ;;  %v7714_v29 = vld [vmem:[#allocation8 + $0x1c0] ss:$8 sps:$4 sm:$0xff]  }
 0x2c1   :  { %4061 = vmatpush1.bf16.msra.mxu1 %v7642_v27  ;;  %4051 = vmatprep.mubr.bf16.mxu0 %v1639_v36  ;;  %v7716_v27 = vld [vmem:[#allocation8 + $0x1c4] ss:$8 sps:$4 sm:$0xff]   ;;  %v7722_v36 = vld [vmem:[#allocation8 + $0x1d4] ss:$8 sps:$4 sm:$0xff]  }
 0x2c2   :  { %4092 = vmatprep.mubr.bf16.mxu1 %v1641_v38  ;;  %4021 = vmatprep.subr.bf16.mxu0 %v7647_v31  ;;  %v7719_v31 = vld [vmem:[#allocation8 + $0xd4] ss:$8 sps:$4 sm:$0xff]   ;;  %v7720_v38 = vld [vmem:[#allocation8 + $0x1d0] ss:$8 sps:$4 sm:$0xff]  }
 0x2c3   :  { %4062 = vmatprep.subr.bf16.mxu1 %v7650_v37  ;;  %v7717_v37 = vld [vmem:[#allocation8 + $0xd0] ss:$8 sps:$4 sm:$0xff]  }
 0x2c4   :  { %4022 = vmatpush1.bf16.msra.mxu0 %v7645_v39  ;;  %v7725_v39 = vld [vmem:[#allocation8 + $0xe4] ss:$8 sps:$4 sm:$0xff]  }
 0x2c5   :  { %4063 = vmatpush1.bf16.msra.mxu1 %v7648_v41  ;;  %4023 = vmatprep.subr.bf16.mxu0 %v7653_v50  ;;  %v7728_v41 = vld [vmem:[#allocation8 + $0x1e4] ss:$8 sps:$4 sm:$0xff]   ;;  %v7723_v50 = vld [vmem:[#allocation8 + $0xe0] ss:$8 sps:$4 sm:$0xff]  }
 0x2c6   :  { %4064 = vmatprep.subr.bf16.mxu1 %v7656_v43  ;;  %v7726_v43 = vld [vmem:[#allocation8 + $0x1e0] ss:$8 sps:$4 sm:$0xff]  }
 0x2c8   :  { %4024 = vmatpush1.bf16.msra.mxu0 %v7651_v44  ;;  %v7731_v44 = vld [vmem:[#allocation8 + $0xf4] ss:$8 sps:$4 sm:$0xff]  }
 0x2c9   :  { %4065 = vmatpush1.bf16.msra.mxu1 %v7654_v49  ;;  %4025 = vmatprep.subr.bf16.mxu0 %v7659_v51  ;;  %v7734_v49 = vld [vmem:[#allocation8 + $0x1f4] ss:$8 sps:$4 sm:$0xff]   ;;  %v7729_v51 = vld [vmem:[#allocation8 + $0xf0] ss:$8 sps:$4 sm:$0xff]  }
 0x2ca   :  { %4066 = vmatprep.subr.bf16.mxu1 %v7662_v45  ;;  %v7732_v45 = vld [vmem:[#allocation8 + $0x1f0] ss:$8 sps:$4 sm:$0xff]  }
 0x2cc   :  { %4026 = vmatpush1.bf16.msra.mxu0 %v7657_v54  ;;  %v7737_v54 = vld [vmem:[#allocation2 + $0x24] ss:$48 sps:$4 sm:$0xff]  }
 0x2cd   :  { %4067 = vmatpush1.bf16.msra.mxu1 %v7660_v55  ;;  %4027 = vmatprep.subr.bf16.mxu0 %v7665_v46  ;;  %v7740_v55 = vld [vmem:[#allocation2 + $0x2c] ss:$48 sps:$4 sm:$0xff]   ;;  %v7735_v46 = vld [vmem:[#allocation2 + $0x20] ss:$48 sps:$4 sm:$0xff]  }
 0x2ce   :  { %4068 = vmatprep.subr.bf16.mxu1 %v7668_v52  ;;  %v1638_v52 = vpack.c.bf16 %v8535_v40, %v8535_v40  ;;  %v7747_v40 = vld [vmem:[#allocation2 + $0xe0] ss:$48 sps:$4 sm:$0xff]  }
 0x2d0   :  { %4028 = vmatpush1.bf16.msra.mxu0 %v7663_v53  ;;  %v7738_v53 = vld [vmem:[#allocation2 + $0x28] ss:$48 sps:$4 sm:$0xff]  }
 0x2d1   :  { %4069 = vmatpush1.bf16.msra.mxu1 %v7666_v56  ;;  %4029 = vmatprep.subr.bf16.mxu0 %v7671_v58  ;;  %v7743_v56 = vld [vmem:[#allocation2 + $0x84] ss:$48 sps:$4 sm:$0xff]   ;;  %v1640_v58 = vpack.c.bf16 %v8537_v42, %v8537_v42  ;;  %v7750_v42 = vld [vmem:[#allocation2 + $0xe8] ss:$48 sps:$4 sm:$0xff]  }
 0x2d2   :  { %4070 = vmatprep.subr.bf16.mxu1 %v7674_v59  ;;  %v7746_v59 = vld [vmem:[#allocation2 + $0x8c] ss:$48 sps:$4 sm:$0xff]  }
 0x2d4   :  { %4030 = vmatpush1.bf16.msra.mxu0 %v7669_v60  ;;  %v7741_v60 = vld [vmem:[#allocation2 + $0x80] ss:$48 sps:$4 sm:$0xff]  }
 0x2d5   :  { %4071 = vmatpush1.bf16.msra.mxu1 %v7672_v61  ;;  %4031 = vmatprep.subr.bf16.mxu0 %v7677_v62  ;;  %v7744_v61 = vld [vmem:[#allocation2 + $0x88] ss:$48 sps:$4 sm:$0xff]   ;;  %v7749_v62 = vld [vmem:[#allocation2 + $0xe4] ss:$48 sps:$4 sm:$0xff]  }
 0x2d6   :  { %4072 = vmatprep.subr.bf16.mxu1 %v7680_v0  ;;  %v7752_v0 = vld [vmem:[#allocation2 + $0xec] ss:$48 sps:$4 sm:$0xff]  }
 0x2d8   :  { %4032 = vmatpush1.bf16.msra.mxu0 %v7675_v1  ;;  %v7755_v1 = vld [vmem:[#allocation2 + $0x144] ss:$48 sps:$4 sm:$0xff]  }
 0x2d9   :  { %4073 = vmatpush1.bf16.msra.mxu1 %v7678_v2  ;;  %4033 = vmatprep.subr.bf16.mxu0 %v7683_v6  ;;  %v7758_v2 = vld [vmem:[#allocation2 + $0x14c] ss:$48 sps:$4 sm:$0xff]   ;;  %v7753_v6 = vld [vmem:[#allocation2 + $0x140] ss:$48 sps:$4 sm:$0xff]  }
 0x2da   :  { %4074 = vmatprep.subr.bf16.mxu1 %v7686_v7  ;;  %v7756_v7 = vld [vmem:[#allocation2 + $0x148] ss:$48 sps:$4 sm:$0xff]  }
 0x2dc   :  { %4034 = vmatpush1.bf16.msra.mxu0 %v7681_v10  ;;  %v7761_v10 = vld [vmem:[#allocation2 + $0x1a4] ss:$48 sps:$4 sm:$0xff]  }
 0x2dd   :  { %4075 = vmatpush1.bf16.msra.mxu1 %v7684_v11  ;;  %4035 = vmatprep.subr.bf16.mxu0 %v7689_v16  ;;  %v7764_v11 = vld [vmem:[#allocation2 + $0x1ac] ss:$48 sps:$4 sm:$0xff]   ;;  %v7759_v16 = vld [vmem:[#allocation2 + $0x1a0] ss:$48 sps:$4 sm:$0xff]  }
 0x2de   :  { %4076 = vmatprep.subr.bf16.mxu1 %v7692_v17  ;;  %v7767_v17 = vld [vmem:[#allocation2 + $0x204] ss:$48 sps:$4 sm:$0xff]  }
 0x2e0   :  { %4036 = vmatpush1.bf16.msra.mxu0 %v7687_v19  ;;  %v7770_v19 = vld [vmem:[#allocation2 + $0x20c] ss:$48 sps:$4 sm:$0xff]  }
 0x2e1   :  { %4077 = vmatpush1.bf16.msra.mxu1 %v7690_v12  ;;  %4037 = vmatprep.subr.bf16.mxu0 %v7695_v14  ;;  %v7765_v12 = vld [vmem:[#allocation2 + $0x200] ss:$48 sps:$4 sm:$0xff]   ;;  %v7768_v14 = vld [vmem:[#allocation2 + $0x208] ss:$48 sps:$4 sm:$0xff]  }
 0x2e2   :  { %4078 = vmatprep.subr.bf16.mxu1 %v7698_v20  ;;  %v7773_v20 = vld [vmem:[#allocation2 + $0x264] ss:$48 sps:$4 sm:$0xff]  }
 0x2e4   :  { %4038 = vmatpush1.bf16.msra.mxu0 %v7693_v21  ;;  %v7776_v21 = vld [vmem:[#allocation2 + $0x26c] ss:$48 sps:$4 sm:$0xff]  }
 0x2e5   :  { %4079 = vmatpush1.bf16.msra.mxu1 %v7696_v32  ;;  %4039 = vmatprep.subr.bf16.mxu0 %v7701_v22  ;;  %v7771_v32 = vld [vmem:[#allocation2 + $0x260] ss:$48 sps:$4 sm:$0xff]   ;;  %v7774_v22 = vld [vmem:[#allocation2 + $0x268] ss:$48 sps:$4 sm:$0xff]  }
 0x2e6   :  { %4080 = vmatprep.subr.bf16.mxu1 %v7704_v33  ;;  %v7779_v33 = vld [vmem:[#allocation2 + $0x2c4] ss:$48 sps:$4 sm:$0xff]  }
 0x2e8   :  { %4040 = vmatpush1.bf16.msra.mxu0 %v7699_v23  ;;  %v7782_v23 = vld [vmem:[#allocation2 + $0x2cc] ss:$48 sps:$4 sm:$0xff]  }
 0x2e9   :  { %4081 = vmatpush1.bf16.msra.mxu1 %v7702_v34  ;;  %4041 = vmatprep.subr.bf16.mxu0 %v7707_v24  ;;  %v7777_v34 = vld [vmem:[#allocation2 + $0x2c0] ss:$48 sps:$4 sm:$0xff]   ;;  %v7780_v24 = vld [vmem:[#allocation2 + $0x2c8] ss:$48 sps:$4 sm:$0xff]  }
 0x2ea   :  { %4082 = vmatprep.subr.bf16.mxu1 %v7710_v35  ;;  %v7785_v35 = vld [vmem:[#allocation2 + $0x324] ss:$48 sps:$4 sm:$0xff]  }
 0x2ec   :  { %4042 = vmatpush1.bf16.msra.mxu0 %v7705_v25  ;;  %v7788_v25 = vld [vmem:[#allocation2 + $0x32c] ss:$48 sps:$4 sm:$0xff]  }
 0x2ed   :  { %4083 = vmatpush1.bf16.msra.mxu1 %v7708_v13  ;;  %4043 = vmatprep.subr.bf16.mxu0 %v7713_v26  ;;  %v7783_v13 = vld [vmem:[#allocation2 + $0x320] ss:$48 sps:$4 sm:$0xff]   ;;  %v7786_v26 = vld [vmem:[#allocation2 + $0x328] ss:$48 sps:$4 sm:$0xff]  }
 0x2ee   :  { %4084 = vmatprep.subr.bf16.mxu1 %v7716_v27  ;;  %v7791_v27 = vld [vmem:[#allocation2 + $0x384] ss:$48 sps:$4 sm:$0xff]  }
 0x2f0   :  { %4044 = vmatpush1.bf16.msra.mxu0 %v7711_v28  ;;  %v7794_v28 = vld [vmem:[#allocation2 + $0x38c] ss:$48 sps:$4 sm:$0xff]  }
 0x2f1   :  { %4085 = vmatpush1.bf16.msra.mxu1 %v7714_v29  ;;  %4045 = vmatprep.subr.bf16.mxu0 %v7719_v31  ;;  %v7789_v29 = vld [vmem:[#allocation2 + $0x380] ss:$48 sps:$4 sm:$0xff]   ;;  %v7792_v31 = vld [vmem:[#allocation2 + $0x388] ss:$48 sps:$4 sm:$0xff]  }
 0x2f2   :  { %4086 = vmatprep.subr.bf16.mxu1 %v7722_v36  ;;  %v7797_v36 = vld [vmem:[#allocation2 + $0x3e4] ss:$48 sps:$4 sm:$0xff]  }
 0x2f4   :  { %4046 = vmatpush1.bf16.msra.mxu0 %v7717_v37  ;;  %v7800_v37 = vld [vmem:[#allocation2 + $0x3ec] ss:$48 sps:$4 sm:$0xff]  }
 0x2f5   :  { %4087 = vmatpush1.bf16.msra.mxu1 %v7720_v38  ;;  %4047 = vmatprep.subr.bf16.mxu0 %v7725_v39  ;;  %v7795_v38 = vld [vmem:[#allocation2 + $0x3e0] ss:$48 sps:$4 sm:$0xff]   ;;  %v7798_v39 = vld [vmem:[#allocation2 + $0x3e8] ss:$48 sps:$4 sm:$0xff]  }
 0x2f6   :  { %4088 = vmatprep.subr.bf16.mxu1 %v7728_v41  ;;  %v7803_v41 = vld [vmem:[#allocation2 + $0x444] ss:$48 sps:$4 sm:$0xff]  }
 0x2f8   :  { %4048 = vmatpush1.bf16.msra.mxu0 %v7723_v50  ;;  %v7806_v50 = vld [vmem:[#allocation2 + $0x44c] ss:$48 sps:$4 sm:$0xff]  }
 0x2f9   :  { %4089 = vmatpush1.bf16.msra.mxu1 %v7726_v43  ;;  %4049 = vmatprep.subr.bf16.mxu0 %v7731_v44  ;;  %v7801_v43 = vld [vmem:[#allocation2 + $0x440] ss:$48 sps:$4 sm:$0xff]   ;;  %v7804_v44 = vld [vmem:[#allocation2 + $0x448] ss:$48 sps:$4 sm:$0xff]  }
 0x2fa   :  { %4090 = vmatprep.subr.bf16.mxu1 %v7734_v49  ;;  %v7809_v49 = vld [vmem:[#allocation2 + $0x4a4] ss:$48 sps:$4 sm:$0xff]  }
 0x2fc   :  { %4050 = vmatpush1.bf16.msra.mxu0 %v7729_v51  ;;  %v7812_v51 = vld [vmem:[#allocation2 + $0x4ac] ss:$48 sps:$4 sm:$0xff]  }
 0x2fd   :  { %4091 = vmatpush1.bf16.msra.mxu1 %v7732_v45  ;;  %4508 = vmatprep.subr.bf16.mxu0 %v7737_v54  ;;  %v7807_v45 = vld [vmem:[#allocation2 + $0x4a0] ss:$48 sps:$4 sm:$0xff]   ;;  %v7810_v54 = vld [vmem:[#allocation2 + $0x4a8] ss:$48 sps:$4 sm:$0xff]  }
 0x2fe   :  { %4549 = vmatprep.subr.bf16.mxu1 %v7740_v55  ;;  %v7815_v55 = vld [vmem:[#allocation2 + $0x504] ss:$48 sps:$4 sm:$0xff]  }
 0x2ff   :  { %4052 = vmatmul.mubr.bf16.vlgmr.msra.gmra.mrb[28].mxu0 %v1638_v52  ;;  %v7813_v52 = vld [vmem:[#allocation2 + $0x500] ss:$48 sps:$4 sm:$0xff]  }
 0x300   :  { %4093 = vmatmul.mubr.bf16.vlgmr.msra.gmra.mrb[28].mxu1 %v1640_v58  ;;  %4509 = vmatpush1.bf16.msra.mxu0 %v7735_v46  ;;  %v7818_v46 = vld [vmem:[#allocation2 + $0x50c] ss:$48 sps:$4 sm:$0xff]  }
 0x301   :  { %4550 = vmatpush1.bf16.msra.mxu1 %v7738_v53  ;;  %4510 = vmatprep.subr.bf16.mxu0 %v7743_v56  ;;  %v7816_v53 = vld [vmem:[#allocation2 + $0x508] ss:$48 sps:$4 sm:$0xff]   ;;  %v7821_v56 = vld [vmem:[#allocation2 + $0x564] ss:$48 sps:$4 sm:$0xff]   ;;  %v7824_v58 = vld [vmem:[#allocation2 + $0x56c] ss:$48 sps:$4 sm:$0xff]  }
 0x302   :  { %4551 = vmatprep.subr.bf16.mxu1 %v7746_v59  ;;  %4540 = vmatprep.mubr.bf16.mxu0 %v8421_v48  ;;  %v7819_v59 = vld [vmem:[#allocation2 + $0x560] ss:$48 sps:$4 sm:$0xff]  }
 0x303   :  { %4581 = vmatprep.mubr.bf16.mxu1 %v8421_v48  ;;  %v7762_v48 = vld [vmem:[#allocation2 + $0x1a8] ss:$48 sps:$4 sm:$0xff]  }
 0x304   :  { %4511 = vmatpush1.bf16.msra.mxu0 %v7741_v60  ;;  %v7822_v60 = vld [vmem:[#allocation2 + $0x568] ss:$48 sps:$4 sm:$0xff]  }
 0x305   :  { %4552 = vmatpush1.bf16.msra.mxu1 %v7744_v61  ;;  %4512 = vmatprep.subr.bf16.mxu0 %v7749_v62  ;;  %v7827_v61 = vld [vmem:[#allocation2 + $0x5c4] ss:$48 sps:$4 sm:$0xff]   ;;  %v7830_v62 = vld [vmem:[#allocation2 + $0x5cc] ss:$48 sps:$4 sm:$0xff]  }
 0x306   :  { %4553 = vmatprep.subr.bf16.mxu1 %v7752_v0  ;;  %v7825_v0 = vld [vmem:[#allocation2 + $0x5c0] ss:$48 sps:$4 sm:$0xff]  }
 0x308   :  { %4513 = vmatpush1.bf16.msra.mxu0 %v7747_v40  ;;  %v7828_v40 = vld [vmem:[#allocation2 + $0x5c8] ss:$48 sps:$4 sm:$0xff]  }
 0x309   :  { %4554 = vmatpush1.bf16.msra.mxu1 %v7750_v42  ;;  %4514 = vmatprep.subr.bf16.mxu0 %v7755_v1  ;;  %v7833_v42 = vld [vmem:[#allocation5 + $0x24] ss:$48 sps:$4 sm:$0xff]   ;;  %v7836_v1 = vld [vmem:[#allocation5 + $0x2c] ss:$48 sps:$4 sm:$0xff]  }
 0x30a   :  { %4555 = vmatprep.subr.bf16.mxu1 %v7758_v2  ;;  %v7831_v2 = vld [vmem:[#allocation5 + $0x20] ss:$48 sps:$4 sm:$0xff]  }
 0x30c   :  { %4515 = vmatpush1.bf16.msra.mxu0 %v7753_v6  ;;  %v7834_v6 = vld [vmem:[#allocation5 + $0x28] ss:$48 sps:$4 sm:$0xff]  }
 0x30d   :  { %4556 = vmatpush1.bf16.msra.mxu1 %v7756_v7  ;;  %4516 = vmatprep.subr.bf16.mxu0 %v7761_v10  ;;  %v7839_v7 = vld [vmem:[#allocation5 + $0x84] ss:$48 sps:$4 sm:$0xff]   ;;  %v7842_v10 = vld [vmem:[#allocation5 + $0x8c] ss:$48 sps:$4 sm:$0xff]  }
 0x30e   :  { %4557 = vmatprep.subr.bf16.mxu1 %v7764_v11  ;;  %v7837_v11 = vld [vmem:[#allocation5 + $0x80] ss:$48 sps:$4 sm:$0xff]  }
 0x310   :  { %4517 = vmatpush1.bf16.msra.mxu0 %v7759_v16  ;;  %v7840_v16 = vld [vmem:[#allocation5 + $0x88] ss:$48 sps:$4 sm:$0xff]  }
 0x311   :  { %4558 = vmatpush1.bf16.msra.mxu1 %v7762_v48  ;;  %4518 = vmatprep.subr.bf16.mxu0 %v7767_v17  ;;  %v7845_v48 = vld [vmem:[#allocation5 + $0xe4] ss:$48 sps:$4 sm:$0xff]   ;;  %v7848_v17 = vld [vmem:[#allocation5 + $0xec] ss:$48 sps:$4 sm:$0xff]  }
 0x312   :  { %4559 = vmatprep.subr.bf16.mxu1 %v7770_v19  ;;  %v7843_v19 = vld [vmem:[#allocation5 + $0xe0] ss:$48 sps:$4 sm:$0xff]  }
 0x314   :  { %4519 = vmatpush1.bf16.msra.mxu0 %v7765_v12  ;;  %v7846_v12 = vld [vmem:[#allocation5 + $0xe8] ss:$48 sps:$4 sm:$0xff]  }
 0x315   :  { %4560 = vmatpush1.bf16.msra.mxu1 %v7768_v14  ;;  %4520 = vmatprep.subr.bf16.mxu0 %v7773_v20  ;;  %v7851_v14 = vld [vmem:[#allocation5 + $0x144] ss:$48 sps:$4 sm:$0xff]   ;;  %v7849_v20 = vld [vmem:[#allocation5 + $0x140] ss:$48 sps:$4 sm:$0xff]  }
 0x316   :  { %4561 = vmatprep.subr.bf16.mxu1 %v7776_v21  ;;  %v7852_v21 = vld [vmem:[#allocation5 + $0x148] ss:$48 sps:$4 sm:$0xff]  }
 0x318   :  { %4521 = vmatpush1.bf16.msra.mxu0 %v7771_v32  ;;  %v7857_v32 = vld [vmem:[#allocation5 + $0x1a4] ss:$48 sps:$4 sm:$0xff]  }
 0x319   :  { %4562 = vmatpush1.bf16.msra.mxu1 %v7774_v22  ;;  %4522 = vmatprep.subr.bf16.mxu0 %v7779_v33  ;;  %v7860_v22 = vld [vmem:[#allocation5 + $0x1ac] ss:$48 sps:$4 sm:$0xff]   ;;  %v7855_v33 = vld [vmem:[#allocation5 + $0x1a0] ss:$48 sps:$4 sm:$0xff]  }
 0x31a   :  { %4563 = vmatprep.subr.bf16.mxu1 %v7782_v23  ;;  %v7863_v23 = vld [vmem:[#allocation5 + $0x204] ss:$48 sps:$4 sm:$0xff]  }
 0x31c   :  { %4523 = vmatpush1.bf16.msra.mxu0 %v7777_v34  ;;  %v7866_v34 = vld [vmem:[#allocation5 + $0x20c] ss:$48 sps:$4 sm:$0xff]  }
 0x31d   :  { %4564 = vmatpush1.bf16.msra.mxu1 %v7780_v24  ;;  %4524 = vmatprep.subr.bf16.mxu0 %v7785_v35  ;;  %v7861_v24 = vld [vmem:[#allocation5 + $0x200] ss:$48 sps:$4 sm:$0xff]   ;;  %v7864_v35 = vld [vmem:[#allocation5 + $0x208] ss:$48 sps:$4 sm:$0xff]  }
 0x31e   :  { %4565 = vmatprep.subr.bf16.mxu1 %v7788_v25  ;;  %v7869_v25 = vld [vmem:[#allocation5 + $0x264] ss:$48 sps:$4 sm:$0xff]  }
 0x320   :  { %4525 = vmatpush1.bf16.msra.mxu0 %v7783_v13  ;;  %v7872_v13 = vld [vmem:[#allocation5 + $0x26c] ss:$48 sps:$4 sm:$0xff]  }
 0x321   :  { %4566 = vmatpush1.bf16.msra.mxu1 %v7786_v26  ;;  %4526 = vmatprep.subr.bf16.mxu0 %v7791_v27  ;;  %v7867_v26 = vld [vmem:[#allocation5 + $0x260] ss:$48 sps:$4 sm:$0xff]   ;;  %v7870_v27 = vld [vmem:[#allocation5 + $0x268] ss:$48 sps:$4 sm:$0xff]  }
 0x322   :  { %4567 = vmatprep.subr.bf16.mxu1 %v7794_v28  ;;  %v7875_v28 = vld [vmem:[#allocation5 + $0x2c4] ss:$48 sps:$4 sm:$0xff]  }
 0x324   :  { %4527 = vmatpush1.bf16.msra.mxu0 %v7789_v29  ;;  %v7878_v29 = vld [vmem:[#allocation5 + $0x2cc] ss:$48 sps:$4 sm:$0xff]  }
 0x325   :  { %4568 = vmatpush1.bf16.msra.mxu1 %v7792_v31  ;;  %4528 = vmatprep.subr.bf16.mxu0 %v7797_v36  ;;  %v7873_v31 = vld [vmem:[#allocation5 + $0x2c0] ss:$48 sps:$4 sm:$0xff]   ;;  %v7876_v36 = vld [vmem:[#allocation5 + $0x2c8] ss:$48 sps:$4 sm:$0xff]  }
 0x326   :  { %4569 = vmatprep.subr.bf16.mxu1 %v7800_v37  ;;  %v7881_v37 = vld [vmem:[#allocation5 + $0x324] ss:$48 sps:$4 sm:$0xff]  }
 0x328   :  { %4529 = vmatpush1.bf16.msra.mxu0 %v7795_v38  ;;  %v7884_v38 = vld [vmem:[#allocation5 + $0x32c] ss:$48 sps:$4 sm:$0xff]  }
 0x329   :  { %4570 = vmatpush1.bf16.msra.mxu1 %v7798_v39  ;;  %4530 = vmatprep.subr.bf16.mxu0 %v7803_v41  ;;  %v7879_v39 = vld [vmem:[#allocation5 + $0x320] ss:$48 sps:$4 sm:$0xff]   ;;  %v7882_v41 = vld [vmem:[#allocation5 + $0x328] ss:$48 sps:$4 sm:$0xff]  }
 0x32a   :  { %4571 = vmatprep.subr.bf16.mxu1 %v7806_v50  ;;  %v7887_v50 = vld [vmem:[#allocation5 + $0x384] ss:$48 sps:$4 sm:$0xff]  }
 0x32c   :  { %4531 = vmatpush1.bf16.msra.mxu0 %v7801_v43  ;;  %v7890_v43 = vld [vmem:[#allocation5 + $0x38c] ss:$48 sps:$4 sm:$0xff]  }
 0x32d   :  { %4572 = vmatpush1.bf16.msra.mxu1 %v7804_v44  ;;  %4532 = vmatprep.subr.bf16.mxu0 %v7809_v49  ;;  %v7885_v44 = vld [vmem:[#allocation5 + $0x380] ss:$48 sps:$4 sm:$0xff]   ;;  %v7888_v49 = vld [vmem:[#allocation5 + $0x388] ss:$48 sps:$4 sm:$0xff]  }
 0x32e   :  { %4573 = vmatprep.subr.bf16.mxu1 %v7812_v51  ;;  %v7893_v51 = vld [vmem:[#allocation5 + $0x3e4] ss:$48 sps:$4 sm:$0xff]  }
 0x330   :  { %4533 = vmatpush1.bf16.msra.mxu0 %v7807_v45  ;;  %v7896_v45 = vld [vmem:[#allocation5 + $0x3ec] ss:$48 sps:$4 sm:$0xff]  }
 0x331   :  { %4574 = vmatpush1.bf16.msra.mxu1 %v7810_v54  ;;  %4534 = vmatprep.subr.bf16.mxu0 %v7815_v55  ;;  %v7891_v54 = vld [vmem:[#allocation5 + $0x3e0] ss:$48 sps:$4 sm:$0xff]   ;;  %v7894_v55 = vld [vmem:[#allocation5 + $0x3e8] ss:$48 sps:$4 sm:$0xff]  }
 0x332   :  { %4575 = vmatprep.subr.bf16.mxu1 %v7818_v46  ;;  %v7899_v46 = vld [vmem:[#allocation5 + $0x444] ss:$48 sps:$4 sm:$0xff]  }
 0x334   :  { %4535 = vmatpush1.bf16.msra.mxu0 %v7813_v52  ;;  %v7902_v52 = vld [vmem:[#allocation5 + $0x44c] ss:$48 sps:$4 sm:$0xff]  }
 0x335   :  { %4576 = vmatpush1.bf16.msra.mxu1 %v7816_v53  ;;  %4536 = vmatprep.subr.bf16.mxu0 %v7821_v56  ;;  %v7897_v53 = vld [vmem:[#allocation5 + $0x440] ss:$48 sps:$4 sm:$0xff]   ;;  %v7900_v56 = vld [vmem:[#allocation5 + $0x448] ss:$48 sps:$4 sm:$0xff]  }
 0x336   :  { %4577 = vmatprep.subr.bf16.mxu1 %v7824_v58  ;;  %v7905_v58 = vld [vmem:[#allocation5 + $0x4a4] ss:$48 sps:$4 sm:$0xff]  }
 0x338   :  { %4537 = vmatpush1.bf16.msra.mxu0 %v7819_v59  ;;  %v7908_v59 = vld [vmem:[#allocation5 + $0x4ac] ss:$48 sps:$4 sm:$0xff]  }
 0x339   :  { %4578 = vmatpush1.bf16.msra.mxu1 %v7822_v60  ;;  %4538 = vmatprep.subr.bf16.mxu0 %v7827_v61  ;;  %v7903_v60 = vld [vmem:[#allocation5 + $0x4a0] ss:$48 sps:$4 sm:$0xff]   ;;  %v7906_v61 = vld [vmem:[#allocation5 + $0x4a8] ss:$48 sps:$4 sm:$0xff]  }
 0x33a   :  { %4579 = vmatprep.subr.bf16.mxu1 %v7830_v62  ;;  %v7911_v62 = vld [vmem:[#allocation5 + $0x504] ss:$48 sps:$4 sm:$0xff]  }
 0x33c   :  { %4539 = vmatpush1.bf16.msra.mxu0 %v7825_v0  ;;  %v7914_v0 = vld [vmem:[#allocation5 + $0x50c] ss:$48 sps:$4 sm:$0xff]  }
 0x33d   :  { %4580 = vmatpush1.bf16.msra.mxu1 %v7828_v40  ;;  %4997 = vmatprep.subr.bf16.mxu0 %v7833_v42  ;;  %v7909_v40 = vld [vmem:[#allocation5 + $0x500] ss:$48 sps:$4 sm:$0xff]   ;;  %v7912_v42 = vld [vmem:[#allocation5 + $0x508] ss:$48 sps:$4 sm:$0xff]  }
 0x33e   :  { %5038 = vmatprep.subr.bf16.mxu1 %v7836_v1  ;;  %v7917_v1 = vld [vmem:[#allocation5 + $0x564] ss:$48 sps:$4 sm:$0xff]  }
 0x33f   :  { %4541 = vmatmul.mubr.bf16.vlgmr.msra.gmra.mrb[32].mxu0 %v8425_v4 }
 0x340   :  { %4582 = vmatmul.mubr.bf16.vlgmr.msra.gmra.mrb[32].mxu1 %v8425_v4  ;;  %4998 = vmatpush1.bf16.msra.mxu0 %v7831_v2  ;;  %v7854_v4 = vld [vmem:[#allocation5 + $0x14c] ss:$48 sps:$4 sm:$0xff]  }
 0x341   :  { %5039 = vmatpush1.bf16.msra.mxu1 %v7834_v6  ;;  %4999 = vmatprep.subr.bf16.mxu0 %v7839_v7  ;;  %v7920_v2 = vld [vmem:[#allocation5 + $0x56c] ss:$48 sps:$4 sm:$0xff]   ;;  %v7915_v6 = vld [vmem:[#allocation5 + $0x560] ss:$48 sps:$4 sm:$0xff]   ;;  %v7918_v7 = vld [vmem:[#allocation5 + $0x568] ss:$48 sps:$4 sm:$0xff]  }
 0x342   :  { %5040 = vmatprep.subr.bf16.mxu1 %v7842_v10  ;;  %5029 = vmatprep.mubr.bf16.mxu0 %v8436_v30  ;;  %v7923_v10 = vld [vmem:[#allocation5 + $0x5c4] ss:$48 sps:$4 sm:$0xff]  }
 0x343   :  { %5070 = vmatprep.mubr.bf16.mxu1 %v8436_v30  ;;  %v7858_v30 = vld [vmem:[#allocation5 + $0x1a8] ss:$48 sps:$4 sm:$0xff]  }
 0x344   :  { %5000 = vmatpush1.bf16.msra.mxu0 %v7837_v11  ;;  %v7926_v11 = vld [vmem:[#allocation5 + $0x5cc] ss:$48 sps:$4 sm:$0xff]  }
 0x345   :  { %5041 = vmatpush1.bf16.msra.mxu1 %v7840_v16  ;;  %5001 = vmatprep.subr.bf16.mxu0 %v7845_v48  ;;  %v7921_v16 = vld [vmem:[#allocation5 + $0x5c0] ss:$48 sps:$4 sm:$0xff]   ;;  %v7924_v48 = vld [vmem:[#allocation5 + $0x5c8] ss:$48 sps:$4 sm:$0xff]  }
 0x346   :  { %5042 = vmatprep.subr.bf16.mxu1 %v7848_v17  ;;  %v7929_v17 = vld [vmem:[#allocation7 + $0x24] ss:$48 sps:$4 sm:$0xff]  }
 0x348   :  { %5002 = vmatpush1.bf16.msra.mxu0 %v7843_v19  ;;  %v7932_v19 = vld [vmem:[#allocation7 + $0x2c] ss:$48 sps:$4 sm:$0xff]  }
 0x349   :  { %5043 = vmatpush1.bf16.msra.mxu1 %v7846_v12  ;;  %5003 = vmatprep.subr.bf16.mxu0 %v7851_v14  ;;  %v7927_v12 = vld [vmem:[#allocation7 + $0x20] ss:$48 sps:$4 sm:$0xff]   ;;  %v7930_v14 = vld [vmem:[#allocation7 + $0x28] ss:$48 sps:$4 sm:$0xff]  }
 0x34a   :  { %5044 = vmatprep.subr.bf16.mxu1 %v7854_v4  ;;  %v7935_v4 = vld [vmem:[#allocation7 + $0x84] ss:$48 sps:$4 sm:$0xff]  }
 0x34c   :  { %5004 = vmatpush1.bf16.msra.mxu0 %v7849_v20  ;;  %v7938_v20 = vld [vmem:[#allocation7 + $0x8c] ss:$48 sps:$4 sm:$0xff]  }
 0x34d   :  { %5045 = vmatpush1.bf16.msra.mxu1 %v7852_v21  ;;  %5005 = vmatprep.subr.bf16.mxu0 %v7857_v32  ;;  %v7933_v21 = vld [vmem:[#allocation7 + $0x80] ss:$48 sps:$4 sm:$0xff]   ;;  %v7936_v32 = vld [vmem:[#allocation7 + $0x88] ss:$48 sps:$4 sm:$0xff]  }
 0x34e   :  { %5046 = vmatprep.subr.bf16.mxu1 %v7860_v22  ;;  %v7941_v22 = vld [vmem:[#allocation7 + $0xe4] ss:$48 sps:$4 sm:$0xff]  }
 0x350   :  { %5006 = vmatpush1.bf16.msra.mxu0 %v7855_v33  ;;  %v7944_v33 = vld [vmem:[#allocation7 + $0xec] ss:$48 sps:$4 sm:$0xff]  }
 0x351   :  { %5047 = vmatpush1.bf16.msra.mxu1 %v7858_v30  ;;  %5007 = vmatprep.subr.bf16.mxu0 %v7863_v23  ;;  %v7939_v30 = vld [vmem:[#allocation7 + $0xe0] ss:$48 sps:$4 sm:$0xff]   ;;  %v7942_v23 = vld [vmem:[#allocation7 + $0xe8] ss:$48 sps:$4 sm:$0xff]  }
 0x352   :  { %5048 = vmatprep.subr.bf16.mxu1 %v7866_v34  ;;  %v7947_v34 = vld [vmem:[#allocation7 + $0x144] ss:$48 sps:$4 sm:$0xff]  }
 0x354   :  { %5008 = vmatpush1.bf16.msra.mxu0 %v7861_v24  ;;  %v7945_v24 = vld [vmem:[#allocation7 + $0x140] ss:$48 sps:$4 sm:$0xff]  }
 0x355   :  { %5049 = vmatpush1.bf16.msra.mxu1 %v7864_v35  ;;  %5009 = vmatprep.subr.bf16.mxu0 %v7869_v25  ;;  %v7948_v35 = vld [vmem:[#allocation7 + $0x148] ss:$48 sps:$4 sm:$0xff]   ;;  %v7953_v25 = vld [vmem:[#allocation7 + $0x1a4] ss:$48 sps:$4 sm:$0xff]  }
 0x356   :  { %5050 = vmatprep.subr.bf16.mxu1 %v7872_v13  ;;  %v7956_v13 = vld [vmem:[#allocation7 + $0x1ac] ss:$48 sps:$4 sm:$0xff]  }
 0x358   :  { %5010 = vmatpush1.bf16.msra.mxu0 %v7867_v26  ;;  %v7951_v26 = vld [vmem:[#allocation7 + $0x1a0] ss:$48 sps:$4 sm:$0xff]  }
 0x359   :  { %5051 = vmatpush1.bf16.msra.mxu1 %v7870_v27  ;;  %5011 = vmatprep.subr.bf16.mxu0 %v7875_v28  ;;  %v7959_v27 = vld [vmem:[#allocation7 + $0x204] ss:$48 sps:$4 sm:$0xff]   ;;  %v7962_v28 = vld [vmem:[#allocation7 + $0x20c] ss:$48 sps:$4 sm:$0xff]  }
 0x35a   :  { %5052 = vmatprep.subr.bf16.mxu1 %v7878_v29  ;;  %v7957_v29 = vld [vmem:[#allocation7 + $0x200] ss:$48 sps:$4 sm:$0xff]  }
 0x35c   :  { %5012 = vmatpush1.bf16.msra.mxu0 %v7873_v31  ;;  %v7960_v31 = vld [vmem:[#allocation7 + $0x208] ss:$48 sps:$4 sm:$0xff]  }
 0x35d   :  { %5053 = vmatpush1.bf16.msra.mxu1 %v7876_v36  ;;  %5013 = vmatprep.subr.bf16.mxu0 %v7881_v37  ;;  %v7965_v36 = vld [vmem:[#allocation7 + $0x264] ss:$48 sps:$4 sm:$0xff]  }
 0x35e   :  { %5054 = vmatprep.subr.bf16.mxu1 %v7884_v38  ;;  %v7968_v38 = vld [vmem:[#allocation7 + $0x26c] ss:$48 sps:$4 sm:$0xff]  }
 0x360   :  { %5014 = vmatpush1.bf16.msra.mxu0 %v7879_v39 }
 0x361   :  { %5055 = vmatpush1.bf16.msra.mxu1 %v7882_v41  ;;  %5015 = vmatprep.subr.bf16.mxu0 %v7887_v50 }
 0x362   :  { %5056 = vmatprep.subr.bf16.mxu1 %v7890_v43 }
 0x364   :  { %5016 = vmatpush1.bf16.msra.mxu0 %v7885_v44 }
 0x365   :  { %5057 = vmatpush1.bf16.msra.mxu1 %v7888_v49  ;;  %5017 = vmatprep.subr.bf16.mxu0 %v7893_v51  ;;  %v7963_v49 = vld [vmem:[#allocation7 + $0x260] ss:$48 sps:$4 sm:$0xff]  }
 0x366   :  { %5058 = vmatprep.subr.bf16.mxu1 %v7896_v45 }
 0x368   :  { %5018 = vmatpush1.bf16.msra.mxu0 %v7891_v54 }
 0x369   :  { %5059 = vmatpush1.bf16.msra.mxu1 %v7894_v55  ;;  %5019 = vmatprep.subr.bf16.mxu0 %v7899_v46  ;;  %v7966_v55 = vld [vmem:[#allocation7 + $0x268] ss:$48 sps:$4 sm:$0xff]   ;;  %v7971_v46 = vld [vmem:[#allocation7 + $0x2c4] ss:$48 sps:$4 sm:$0xff]  }
 0x36a   :  { %5060 = vmatprep.subr.bf16.mxu1 %v7902_v52 }
 0x36c   :  { %5020 = vmatpush1.bf16.msra.mxu0 %v7897_v53  ;;  %v7974_v53 = vld [vmem:[#allocation7 + $0x2cc] ss:$48 sps:$4 sm:$0xff]  }
 0x36d   :  { %5061 = vmatpush1.bf16.msra.mxu1 %v7900_v56  ;;  %5021 = vmatprep.subr.bf16.mxu0 %v7905_v58  ;;  %v7969_v56 = vld [vmem:[#allocation7 + $0x2c0] ss:$48 sps:$4 sm:$0xff]   ;;  %v7972_v58 = vld [vmem:[#allocation7 + $0x2c8] ss:$48 sps:$4 sm:$0xff]  }
 0x36e   :  { %5062 = vmatprep.subr.bf16.mxu1 %v7908_v59  ;;  %v7977_v59 = vld [vmem:[#allocation7 + $0x324] ss:$48 sps:$4 sm:$0xff]  }
 0x370   :  { %5022 = vmatpush1.bf16.msra.mxu0 %v7903_v60  ;;  %v7980_v60 = vld [vmem:[#allocation7 + $0x32c] ss:$48 sps:$4 sm:$0xff]  }
 0x371   :  { %5063 = vmatpush1.bf16.msra.mxu1 %v7906_v61  ;;  %5023 = vmatprep.subr.bf16.mxu0 %v7911_v62  ;;  %v7975_v61 = vld [vmem:[#allocation7 + $0x320] ss:$48 sps:$4 sm:$0xff]   ;;  %v7978_v62 = vld [vmem:[#allocation7 + $0x328] ss:$48 sps:$4 sm:$0xff]  }
 0x372   :  { %5064 = vmatprep.subr.bf16.mxu1 %v7914_v0  ;;  %v7983_v0 = vld [vmem:[#allocation7 + $0x384] ss:$48 sps:$4 sm:$0xff]  }
 0x374   :  { %5024 = vmatpush1.bf16.msra.mxu0 %v7909_v40  ;;  %v7986_v40 = vld [vmem:[#allocation7 + $0x38c] ss:$48 sps:$4 sm:$0xff]  }
 0x375   :  { %5065 = vmatpush1.bf16.msra.mxu1 %v7912_v42  ;;  %5025 = vmatprep.subr.bf16.mxu0 %v7917_v1  ;;  %v7981_v42 = vld [vmem:[#allocation7 + $0x380] ss:$48 sps:$4 sm:$0xff]   ;;  %v7984_v1 = vld [vmem:[#allocation7 + $0x388] ss:$48 sps:$4 sm:$0xff]  }
 0x376   :  { %5066 = vmatprep.subr.bf16.mxu1 %v7920_v2  ;;  %v7989_v2 = vld [vmem:[#allocation7 + $0x3e4] ss:$48 sps:$4 sm:$0xff]  }
 0x378   :  { %5026 = vmatpush1.bf16.msra.mxu0 %v7915_v6  ;;  %v7992_v6 = vld [vmem:[#allocation7 + $0x3ec] ss:$48 sps:$4 sm:$0xff]  }
 0x379   :  { %5067 = vmatpush1.bf16.msra.mxu1 %v7918_v7  ;;  %5027 = vmatprep.subr.bf16.mxu0 %v7923_v10  ;;  %v7987_v7 = vld [vmem:[#allocation7 + $0x3e0] ss:$48 sps:$4 sm:$0xff]   ;;  %v7990_v10 = vld [vmem:[#allocation7 + $0x3e8] ss:$48 sps:$4 sm:$0xff]  }
 0x37a   :  { %5068 = vmatprep.subr.bf16.mxu1 %v7926_v11  ;;  %v7995_v11 = vld [vmem:[#allocation7 + $0x444] ss:$48 sps:$4 sm:$0xff]  }
 0x37c   :  { %5028 = vmatpush1.bf16.msra.mxu0 %v7921_v16  ;;  %v7998_v16 = vld [vmem:[#allocation7 + $0x44c] ss:$48 sps:$4 sm:$0xff]  }
 0x37d   :  { %5069 = vmatpush1.bf16.msra.mxu1 %v7924_v48  ;;  %5486 = vmatprep.subr.bf16.mxu0 %v7929_v17  ;;  %v7993_v48 = vld [vmem:[#allocation7 + $0x440] ss:$48 sps:$4 sm:$0xff]   ;;  %v7996_v17 = vld [vmem:[#allocation7 + $0x448] ss:$48 sps:$4 sm:$0xff]  }
 0x37e   :  { %5527 = vmatprep.subr.bf16.mxu1 %v7932_v19  ;;  %v8001_v19 = vld [vmem:[#allocation7 + $0x4a4] ss:$48 sps:$4 sm:$0xff]  }
 0x37f   :  { %5030 = vmatmul.mubr.bf16.vlgmr.msra.gmra.mrb[36].mxu0 %v8442_v9 }
 0x380   :  { %5071 = vmatmul.mubr.bf16.vlgmr.msra.gmra.mrb[36].mxu1 %v8442_v9  ;;  %5487 = vmatpush1.bf16.msra.mxu0 %v7927_v12  ;;  %v7950_v9 = vld [vmem:[#allocation7 + $0x14c] ss:$48 sps:$4 sm:$0xff]  }
 0x381   :  { %5528 = vmatpush1.bf16.msra.mxu1 %v7930_v14  ;;  %5488 = vmatprep.subr.bf16.mxu0 %v7935_v4  ;;  %v8004_v12 = vld [vmem:[#allocation7 + $0x4ac] ss:$48 sps:$4 sm:$0xff]   ;;  %v7999_v14 = vld [vmem:[#allocation7 + $0x4a0] ss:$48 sps:$4 sm:$0xff]   ;;  %v8002_v4 = vld [vmem:[#allocation7 + $0x4a8] ss:$48 sps:$4 sm:$0xff]  }
 0x382   :  { %5529 = vmatprep.subr.bf16.mxu1 %v7938_v20  ;;  %5518 = vmatprep.mubr.bf16.mxu0 %v8451_v15  ;;  %v8007_v20 = vld [vmem:[#allocation7 + $0x504] ss:$48 sps:$4 sm:$0xff]  }
 0x383   :  { %5559 = vmatprep.mubr.bf16.mxu1 %v8451_v15  ;;  %v7954_v15 = vld [vmem:[#allocation7 + $0x1a8] ss:$48 sps:$4 sm:$0xff]  }
 0x384   :  { %5489 = vmatpush1.bf16.msra.mxu0 %v7933_v21  ;;  %v8010_v21 = vld [vmem:[#allocation7 + $0x50c] ss:$48 sps:$4 sm:$0xff]  }
 0x385   :  { %5530 = vmatpush1.bf16.msra.mxu1 %v7936_v32  ;;  %5490 = vmatprep.subr.bf16.mxu0 %v7941_v22  ;;  %v8005_v32 = vld [vmem:[#allocation7 + $0x500] ss:$48 sps:$4 sm:$0xff]   ;;  %v8008_v22 = vld [vmem:[#allocation7 + $0x508] ss:$48 sps:$4 sm:$0xff]  }
 0x386   :  { %5531 = vmatprep.subr.bf16.mxu1 %v7944_v33  ;;  %v8013_v33 = vld [vmem:[#allocation7 + $0x564] ss:$48 sps:$4 sm:$0xff]  }
 0x388   :  { %5491 = vmatpush1.bf16.msra.mxu0 %v7939_v30  ;;  %v8016_v30 = vld [vmem:[#allocation7 + $0x56c] ss:$48 sps:$4 sm:$0xff]  }
 0x389   :  { %5532 = vmatpush1.bf16.msra.mxu1 %v7942_v23  ;;  %5492 = vmatprep.subr.bf16.mxu0 %v7947_v34  ;;  %v8011_v23 = vld [vmem:[#allocation7 + $0x560] ss:$48 sps:$4 sm:$0xff]   ;;  %v8014_v34 = vld [vmem:[#allocation7 + $0x568] ss:$48 sps:$4 sm:$0xff]  }
 0x38a   :  { %5533 = vmatprep.subr.bf16.mxu1 %v7950_v9  ;;  %v8019_v9 = vld [vmem:[#allocation7 + $0x5c4] ss:$48 sps:$4 sm:$0xff]  }
 0x38c   :  { %5493 = vmatpush1.bf16.msra.mxu0 %v7945_v24  ;;  %v8022_v24 = vld [vmem:[#allocation7 + $0x5cc] ss:$48 sps:$4 sm:$0xff]  }
 0x38d   :  { %5534 = vmatpush1.bf16.msra.mxu1 %v7948_v35  ;;  %5494 = vmatprep.subr.bf16.mxu0 %v7953_v25  ;;  %v8017_v35 = vld [vmem:[#allocation7 + $0x5c0] ss:$48 sps:$4 sm:$0xff]   ;;  %v8020_v25 = vld [vmem:[#allocation7 + $0x5c8] ss:$48 sps:$4 sm:$0xff]  }
 0x38e   :  { %5535 = vmatprep.subr.bf16.mxu1 %v7956_v13 }
 0x390   :  { %5495 = vmatpush1.bf16.msra.mxu0 %v7951_v26 }
 0x391   :  { %5536 = vmatpush1.bf16.msra.mxu1 %v7954_v15  ;;  %5496 = vmatprep.subr.bf16.mxu0 %v7959_v27 }
 0x392   :  { %v3651_v37 = vpop.f32.mrb[24].mxu0  ;;  %5537 = vmatprep.subr.bf16.mxu1 %v7962_v28 }
 0x393   :  { %v3692_v39 = vpop.f32.mrb[24].mxu1  ;;  %v3653_v41 = vpop.f32.mrb[25].mxu0 }
 0x394   :  { %v8594_v50 = vadd.f32 %v3692_v39, %v3651_v37  ;;  %v3694_v43 = vpop.f32.mrb[25].mxu1  ;;  %5497 = vmatpush1.bf16.msra.mxu0 %v7957_v29  ;;  %v3655_v44 = vpop.f32.mrb[26].mxu0 }
 0x395   :  { %v8596_v51 = vadd.f32 %v3694_v43, %v3653_v41  ;;  %5538 = vmatpush1.bf16.msra.mxu1 %v7960_v31  ;;  %v3696_v45 = vpop.f32.mrb[26].mxu1  ;;  %v3656_v54 = vpop.f32.mrb[27].mxu0  ;;  %5498 = vmatprep.subr.bf16.mxu0 %v7965_v36  ;;  %v8023_v43 = vld [vmem:[#allocation8 + $0x400] ss:$8 sps:$4 sm:$0xff]   ;;  %v8025_v44 = vld [vmem:[#allocation8 + $0x404] ss:$8 sps:$4 sm:$0xff]  }
 0x396   :  { %v3697_v52 = vpop.f32.mrb[27].mxu1  ;;  %5539 = vmatprep.subr.bf16.mxu1 %v7968_v38  ;;  %v8031_v45 = vld [vmem:[#allocation8 + $0x414] ss:$8 sps:$4 sm:$0xff]   ;;  %v8029_v54 = vld [vmem:[#allocation8 + $0x410] ss:$8 sps:$4 sm:$0xff]  }
 0x397   :  { %v8035_v52 = vld [vmem:[#allocation8 + $0x420] ss:$8 sps:$4 sm:$0xff]  }
 0x398   :  { %5499 = vmatpush1.bf16.msra.mxu0 %v7963_v49  ;;  %v8026_v49 = vld [vmem:[#allocation8 + $0x500] ss:$8 sps:$4 sm:$0xff]  }
 0x399   :  { %5540 = vmatpush1.bf16.msra.mxu1 %v7966_v55  ;;  %5500 = vmatprep.subr.bf16.mxu0 %v7971_v46  ;;  %v8037_v55 = vld [vmem:[#allocation8 + $0x424] ss:$8 sps:$4 sm:$0xff]  }
 0x39a   :  { %5541 = vmatprep.subr.bf16.mxu1 %v7974_v53  ;;  %v8040_v46 = vld [vmem:[#allocation8 + $0x524] ss:$8 sps:$4 sm:$0xff]   ;;  %v8038_v53 = vld [vmem:[#allocation8 + $0x520] ss:$8 sps:$4 sm:$0xff]  }
 0x39c   :  { %5501 = vmatpush1.bf16.msra.mxu0 %v7969_v56  ;;  %v8043_v56 = vld [vmem:[#allocation8 + $0x434] ss:$8 sps:$4 sm:$0xff]  }
 0x39d   :  { %5542 = vmatpush1.bf16.msra.mxu1 %v7972_v58  ;;  %5502 = vmatprep.subr.bf16.mxu0 %v7977_v59  ;;  %v8046_v58 = vld [vmem:[#allocation8 + $0x534] ss:$8 sps:$4 sm:$0xff]   ;;  %v8041_v59 = vld [vmem:[#allocation8 + $0x430] ss:$8 sps:$4 sm:$0xff]  }
 0x39e   :  { %5543 = vmatprep.subr.bf16.mxu1 %v7980_v60  ;;  %v8044_v60 = vld [vmem:[#allocation8 + $0x530] ss:$8 sps:$4 sm:$0xff]  }
 0x3a0   :  { %5503 = vmatpush1.bf16.msra.mxu0 %v7975_v61  ;;  %v8049_v61 = vld [vmem:[#allocation8 + $0x444] ss:$8 sps:$4 sm:$0xff]  }
 0x3a1   :  { %5544 = vmatpush1.bf16.msra.mxu1 %v7978_v62  ;;  %5504 = vmatprep.subr.bf16.mxu0 %v7983_v0  ;;  %v8052_v62 = vld [vmem:[#allocation8 + $0x544] ss:$8 sps:$4 sm:$0xff]   ;;  %v8047_v0 = vld [vmem:[#allocation8 + $0x440] ss:$8 sps:$4 sm:$0xff]  }
 0x3a2   :  { %5545 = vmatprep.subr.bf16.mxu1 %v7986_v40  ;;  %v8050_v40 = vld [vmem:[#allocation8 + $0x540] ss:$8 sps:$4 sm:$0xff]  }
 0x3a4   :  { %5505 = vmatpush1.bf16.msra.mxu0 %v7981_v42  ;;  %v8055_v42 = vld [vmem:[#allocation8 + $0x454] ss:$8 sps:$4 sm:$0xff]  }
 0x3a5   :  { %5546 = vmatpush1.bf16.msra.mxu1 %v7984_v1  ;;  %5506 = vmatprep.subr.bf16.mxu0 %v7989_v2  ;;  %v8058_v1 = vld [vmem:[#allocation8 + $0x554] ss:$8 sps:$4 sm:$0xff]   ;;  %v8053_v2 = vld [vmem:[#allocation8 + $0x450] ss:$8 sps:$4 sm:$0xff]  }
 0x3a6   :  { %5547 = vmatprep.subr.bf16.mxu1 %v7992_v6  ;;  %v8056_v6 = vld [vmem:[#allocation8 + $0x550] ss:$8 sps:$4 sm:$0xff]  }
 0x3a8   :  { %5507 = vmatpush1.bf16.msra.mxu0 %v7987_v7  ;;  %v8061_v7 = vld [vmem:[#allocation8 + $0x464] ss:$8 sps:$4 sm:$0xff]  }
 0x3a9   :  { %5548 = vmatpush1.bf16.msra.mxu1 %v7990_v10  ;;  %5508 = vmatprep.subr.bf16.mxu0 %v7995_v11  ;;  %v8064_v10 = vld [vmem:[#allocation8 + $0x564] ss:$8 sps:$4 sm:$0xff]   ;;  %v8059_v11 = vld [vmem:[#allocation8 + $0x460] ss:$8 sps:$4 sm:$0xff]  }
 0x3aa   :  { %5549 = vmatprep.subr.bf16.mxu1 %v7998_v16  ;;  %v8062_v16 = vld [vmem:[#allocation8 + $0x560] ss:$8 sps:$4 sm:$0xff]  }
 0x3ac   :  { %5509 = vmatpush1.bf16.msra.mxu0 %v7993_v48  ;;  %v8067_v48 = vld [vmem:[#allocation8 + $0x474] ss:$8 sps:$4 sm:$0xff]  }
 0x3ad   :  { %5550 = vmatpush1.bf16.msra.mxu1 %v7996_v17  ;;  %5510 = vmatprep.subr.bf16.mxu0 %v8001_v19  ;;  %v8070_v17 = vld [vmem:[#allocation8 + $0x574] ss:$8 sps:$4 sm:$0xff]   ;;  %v8065_v19 = vld [vmem:[#allocation8 + $0x470] ss:$8 sps:$4 sm:$0xff]  }
 0x3ae   :  { %5551 = vmatprep.subr.bf16.mxu1 %v8004_v12  ;;  %v8068_v12 = vld [vmem:[#allocation8 + $0x570] ss:$8 sps:$4 sm:$0xff]  }
 0x3b0   :  { %5511 = vmatpush1.bf16.msra.mxu0 %v7999_v14 }
 0x3b1   :  { %5552 = vmatpush1.bf16.msra.mxu1 %v8002_v4  ;;  %5512 = vmatprep.subr.bf16.mxu0 %v8007_v20  ;;  %v8073_v4 = vld [vmem:[#allocation8 + $0x484] ss:$8 sps:$4 sm:$0xff]  }
 0x3b2   :  { %5553 = vmatprep.subr.bf16.mxu1 %v8010_v21  ;;  %v8076_v20 = vld [vmem:[#allocation8 + $0x584] ss:$8 sps:$4 sm:$0xff]  }
 0x3b4   :  { %5513 = vmatpush1.bf16.msra.mxu0 %v8005_v32 }
 0x3b5   :  { %5554 = vmatpush1.bf16.msra.mxu1 %v8008_v22  ;;  %5514 = vmatprep.subr.bf16.mxu0 %v8013_v33  ;;  %v8071_v22 = vld [vmem:[#allocation8 + $0x480] ss:$8 sps:$4 sm:$0xff]  }
 0x3b6   :  { %5555 = vmatprep.subr.bf16.mxu1 %v8016_v30  ;;  %v8074_v33 = vld [vmem:[#allocation8 + $0x580] ss:$8 sps:$4 sm:$0xff]  }
 0x3b8   :  { %5515 = vmatpush1.bf16.msra.mxu0 %v8011_v23 }
 0x3b9   :  { %5556 = vmatpush1.bf16.msra.mxu1 %v8014_v34  ;;  %5516 = vmatprep.subr.bf16.mxu0 %v8019_v9 }
 0x3ba   :  { %5557 = vmatprep.subr.bf16.mxu1 %v8022_v24 }
 0x3bc   :  { %5517 = vmatpush1.bf16.msra.mxu0 %v8017_v35  ;;  %v8079_v35 = vld [vmem:[#allocation8 + $0x494] ss:$8 sps:$4 sm:$0xff]  }
 0x3bd   :  { %5558 = vmatpush1.bf16.msra.mxu1 %v8020_v25  ;;  %6012 = vmatprep.subr.bf16.mxu0 %v8025_v44  ;;  %v8077_v25 = vld [vmem:[#allocation8 + $0x490] ss:$8 sps:$4 sm:$0xff]   ;;  %v8100_v44 = vld [vmem:[#allocation8 + $0x5c4] ss:$8 sps:$4 sm:$0xff]  }
 0x3bf   :  { %5519 = vmatmul.mubr.bf16.vlgmr.msra.gmra.mrb[40].mxu0 %v8459_v18 }
 0x3c0   :  { %5560 = vmatmul.mubr.bf16.vlgmr.msra.gmra.mrb[40].mxu1 %v8459_v18  ;;  %v8028_v18 = vld [vmem:[#allocation8 + $0x504] ss:$8 sps:$4 sm:$0xff]   ;;  %6013 = vmatpush1.bf16.msra.mxu0 %v8023_v43 }
 0x3c1   :  { %6053 = vmatprep.subr.bf16.mxu1 %v8028_v18  ;;  %6014 = vmatprep.subr.bf16.mxu0 %v8031_v45  ;;  %v8097_v43 = vld [vmem:[#allocation8 + $0x4c4] ss:$8 sps:$4 sm:$0xff]   ;;  %v8098_v18 = vld [vmem:[#allocation8 + $0x5c0] ss:$8 sps:$4 sm:$0xff]   ;;  %v8103_v45 = vld [vmem:[#allocation8 + $0x4d4] ss:$8 sps:$4 sm:$0xff]  }
 0x3c2   :  { %6054 = vmatpush1.bf16.msra.mxu1 %v8026_v49  ;;  %v8095_v49 = vld [vmem:[#allocation8 + $0x4c0] ss:$8 sps:$4 sm:$0xff]  }
 0x3c4   :  { %6015 = vmatpush1.bf16.msra.mxu0 %v8029_v54  ;;  %v8101_v54 = vld [vmem:[#allocation8 + $0x4d0] ss:$8 sps:$4 sm:$0xff]  }
 0x3c5   :  { %6016 = vmatprep.subr.bf16.mxu0 %v8037_v55  ;;  %v8109_v55 = vld [vmem:[#allocation8 + $0x4e4] ss:$8 sps:$4 sm:$0xff]  }
 0x3c8   :  { %6017 = vmatpush1.bf16.msra.mxu0 %v8035_v52  ;;  %v8107_v52 = vld [vmem:[#allocation8 + $0x4e0] ss:$8 sps:$4 sm:$0xff]  }
 0x3c9   :  { %6018 = vmatprep.subr.bf16.mxu0 %v8043_v56  ;;  %v8115_v56 = vld [vmem:[#allocation8 + $0x4f4] ss:$8 sps:$4 sm:$0xff]  }
 0x3cc   :  { %6019 = vmatpush1.bf16.msra.mxu0 %v8041_v59  ;;  %v8113_v59 = vld [vmem:[#allocation8 + $0x4f0] ss:$8 sps:$4 sm:$0xff]  }
 0x3cd   :  { %6020 = vmatprep.subr.bf16.mxu0 %v8049_v61 }
 0x3d0   :  { %6021 = vmatpush1.bf16.msra.mxu0 %v8047_v0 }
 0x3d1   :  { %6022 = vmatprep.subr.bf16.mxu0 %v8055_v42 }
 0x3d2   :  { %v4053_v13 = vpop.f32.mrb[28].mxu0 }
 0x3d3   :  { %v4054_v26 = vadd.f32 %v4053_v13, %v8594_v50  ;;  %v4094_v15 = vpop.f32.mrb[28].mxu1  ;;  %v4055_v27 = vpop.f32.mrb[29].mxu0  ;;  %v8034_v50 = vld [vmem:[#allocation8 + $0x514] ss:$8 sps:$4 sm:$0xff]   ;;  %v8080_v13 = vld [vmem:[#allocation8 + $0x590] ss:$8 sps:$4 sm:$0xff]  }
 0x3d4   :  { %v4056_v28 = vadd.f32 %v4055_v27, %v8596_v51  ;;  %v4096_v29 = vpop.f32.mrb[29].mxu1  ;;  %v4057_v31 = vpop.f32.mrb[30].mxu0  ;;  %v8032_v51 = vld [vmem:[#allocation8 + $0x510] ss:$8 sps:$4 sm:$0xff]   ;;  %6055 = vmatprep.subr.bf16.mxu1 %v8034_v50  ;;  %6023 = vmatpush1.bf16.msra.mxu0 %v8053_v2  ;;  %v8088_v27 = vld [vmem:[#allocation8 + $0x5a4] ss:$8 sps:$4 sm:$0xff]  }
 0x3d5   :  { %v8602_v36 = vadd.f32 %v4094_v15, %v4054_v26  ;;  %v4098_v37 = vpop.f32.mrb[30].mxu1  ;;  %v4058_v38 = vpop.f32.mrb[31].mxu0  ;;  %6056 = vmatpush1.bf16.msra.mxu1 %v8032_v51  ;;  %6024 = vmatprep.subr.bf16.mxu0 %v8061_v7  ;;  %v8082_v26 = vld [vmem:[#allocation8 + $0x594] ss:$8 sps:$4 sm:$0xff]   ;;  %v8085_v15 = vld [vmem:[#allocation8 + $0x4a4] ss:$8 sps:$4 sm:$0xff]  }
 0x3d6   :  { %v8604_v39 = vadd.f32 %v4096_v29, %v4056_v28  ;;  %v4099_v41 = vpop.f32.mrb[31].mxu1  ;;  %6057 = vmatprep.subr.bf16.mxu1 %v8040_v46  ;;  %v8083_v28 = vld [vmem:[#allocation8 + $0x4a0] ss:$8 sps:$4 sm:$0xff]   ;;  %v8091_v31 = vld [vmem:[#allocation8 + $0x4b4] ss:$8 sps:$4 sm:$0xff]  }
 0x3d7   :  { %v8086_v29 = vld [vmem:[#allocation8 + $0x5a0] ss:$8 sps:$4 sm:$0xff]   ;;  %v8094_v37 = vld [vmem:[#allocation8 + $0x5b4] ss:$8 sps:$4 sm:$0xff]   ;;  %v8089_v38 = vld [vmem:[#allocation8 + $0x4b0] ss:$8 sps:$4 sm:$0xff]  }
 0x3d8   :  { %6025 = vmatpush1.bf16.msra.mxu0 %v8059_v11  ;;  %v8092_v41 = vld [vmem:[#allocation8 + $0x5b0] ss:$8 sps:$4 sm:$0xff]   ;;  %v8106_v50 = vld [vmem:[#allocation8 + $0x5d4] ss:$8 sps:$4 sm:$0xff]   ;;  %v8112_v46 = vld [vmem:[#allocation8 + $0x5e4] ss:$8 sps:$4 sm:$0xff]  }
 0x3d9   :  { %6058 = vmatpush1.bf16.msra.mxu1 %v8038_v53  ;;  %6026 = vmatprep.subr.bf16.mxu0 %v8067_v48  ;;  %v8104_v51 = vld [vmem:[#allocation8 + $0x5d0] ss:$8 sps:$4 sm:$0xff]   ;;  %v8110_v53 = vld [vmem:[#allocation8 + $0x5e0] ss:$8 sps:$4 sm:$0xff]  }
 0x3da   :  { %6059 = vmatprep.subr.bf16.mxu1 %v8046_v58  ;;  %v8118_v58 = vld [vmem:[#allocation8 + $0x5f4] ss:$8 sps:$4 sm:$0xff]   ;;  %v6690_v7 = vld [vmem:[%s8674_s6 + $0x20] ss:$4 sm:$0xf] }
 0x3db   :  { %v4179_v11 = vrot.slane %v6690_v7, %v8494_v3  ;;  %v4183_v48 = vrot.slane %v6690_v7, %v8500_v8 }
 0x3dc   :  { %6027 = vmatpush1.bf16.msra.mxu0 %v8065_v19  ;;  %v6820_v19 = vld [vmem:[%s8674_s6 + $0x22] ss:$4 sm:$0xf] }
 0x3dd   :  { %6060 = vmatpush1.bf16.msra.mxu1 %v8044_v60  ;;  %6028 = vmatprep.subr.bf16.mxu0 %v8073_v4  ;;  %v8116_v60 = vld [vmem:[#allocation8 + $0x5f0] ss:$8 sps:$4 sm:$0xff]  }
 0x3de   :  { %6061 = vmatprep.subr.bf16.mxu1 %v8052_v62 }
 0x3e0   :  { %6029 = vmatpush1.bf16.msra.mxu0 %v8071_v22 }
 0x3e1   :  { %6062 = vmatpush1.bf16.msra.mxu1 %v8050_v40  ;;  %6030 = vmatprep.subr.bf16.mxu0 %v8079_v35  ;;  %v5153_v35 = vrot.slane %v6820_v19, %v8497_v5 }
 0x3e2   :  { %6063 = vmatprep.subr.bf16.mxu1 %v8058_v1 }
 0x3e4   :  { %6031 = vmatpush1.bf16.msra.mxu0 %v8077_v25 }
 0x3e5   :  { %6064 = vmatpush1.bf16.msra.mxu1 %v8056_v6  ;;  %6032 = vmatprep.subr.bf16.mxu0 %v8085_v15 }
 0x3e6   :  { %6065 = vmatprep.subr.bf16.mxu1 %v8064_v10  ;;  %v4171_v10 = vrot.slane %v6690_v7, %v8488_v63 }
 0x3e8   :  { %6033 = vmatpush1.bf16.msra.mxu0 %v8083_v28 }
 0x3e9   :  { %6066 = vmatpush1.bf16.msra.mxu1 %v8062_v16  ;;  %6034 = vmatprep.subr.bf16.mxu0 %v8091_v31  ;;  %v4175_v16 = vrot.slane %v6690_v7, %v8497_v5 }
 0x3ea   :  { %6067 = vmatprep.subr.bf16.mxu1 %v8070_v17  ;;  %v6755_v17 = vld [vmem:[%s8674_s6 + $0x21] ss:$4 sm:$0xf] }
 0x3ec   :  { %6035 = vmatpush1.bf16.msra.mxu0 %v8089_v38 }
 0x3ed   :  { %6068 = vmatpush1.bf16.msra.mxu1 %v8068_v12  ;;  %6036 = vmatprep.subr.bf16.mxu0 %v8097_v43 }
 0x3ee   :  { %6069 = vmatprep.subr.bf16.mxu1 %v8076_v20 }
 0x3f0   :  { %6037 = vmatpush1.bf16.msra.mxu0 %v8095_v49 }
 0x3f1   :  { %6070 = vmatpush1.bf16.msra.mxu1 %v8074_v33  ;;  %6038 = vmatprep.subr.bf16.mxu0 %v8103_v45  ;;  %v4660_v33 = vrot.slane %v6755_v17, %v8488_v63 }
 0x3f2   :  { %6071 = vmatprep.subr.bf16.mxu1 %v8082_v26 }
 0x3f4   :  { %6039 = vmatpush1.bf16.msra.mxu0 %v8101_v54 }
 0x3f5   :  { %6072 = vmatpush1.bf16.msra.mxu1 %v8080_v13  ;;  %6040 = vmatprep.subr.bf16.mxu0 %v8109_v55 }
 0x3f6   :  { %6073 = vmatprep.subr.bf16.mxu1 %v8088_v27 }
 0x3f8   :  { %6041 = vmatpush1.bf16.msra.mxu0 %v8107_v52 }
 0x3f9   :  { %6074 = vmatpush1.bf16.msra.mxu1 %v8086_v29  ;;  %6042 = vmatprep.subr.bf16.mxu0 %v8115_v56 }
 0x3fa   :  { %6075 = vmatprep.subr.bf16.mxu1 %v8094_v37 }
 0x3fc   :  { %6043 = vmatpush1.bf16.msra.mxu0 %v8113_v59 }
 0x3fd   :  { %6076 = vmatpush1.bf16.msra.mxu1 %v8092_v41 }
 0x3fe   :  { %6077 = vmatprep.subr.bf16.mxu1 %v8100_v44 }
 0x401   :  { %6078 = vmatpush1.bf16.msra.mxu1 %v8098_v18 }
 0x402   :  { %6079 = vmatprep.subr.bf16.mxu1 %v8106_v50 }
 0x405   :  { %6080 = vmatpush1.bf16.msra.mxu1 %v8104_v51 }
 0x406   :  { %6081 = vmatprep.subr.bf16.mxu1 %v8112_v46 }
 0x409   :  { %6082 = vmatpush1.bf16.msra.mxu1 %v8110_v53 }
 0x40a   :  { %6083 = vmatprep.subr.bf16.mxu1 %v8118_v58 }
 0x40d   :  { %6084 = vmatpush1.bf16.msra.mxu1 %v8116_v60 }
 0x412   :  { %v8606_v14 = vpop.f32.mrb[32].mxu0 }
 0x413   :  { %v8608_v21 = vpop.f32.mrb[32].mxu1  ;;  %v8610_v32 = vpop.f32.mrb[33].mxu0  ;;  %v4543_v12 = vadd.f32 %v8606_v14, %v4171_v10  ;;  %v4672_v14 = vrot.slane %v6755_v17, %v8500_v8 }
 0x414   :  { %v8612_v30 = vpop.f32.mrb[33].mxu1  ;;  %v4546_v23 = vpop.f32.mrb[34].mxu0  ;;  %v4584_v4 = vadd.f32 %v8608_v21, %v4179_v11  ;;  %v4545_v20 = vadd.f32 %v8610_v32, %v4175_v16  ;;  %v5161_v21 = vrot.slane %v6820_v19, %v8500_v8 }
 0x415   :  { %v4587_v34 = vpop.f32.mrb[34].mxu1  ;;  %v4547_v9 = vpop.f32.mrb[35].mxu0  ;;  %v4586_v22 = vadd.f32 %v8612_v30, %v4183_v48  ;;  %v5149_v23 = vrot.slane %v6820_v19, %v8488_v63  ;;  %v5604_v25 = vmul.f32 0.5, %v4543_v12 }
 0x416   :  { %v4588_v24 = vpop.f32.mrb[35].mxu1  ;;  %v4668_v34 = vrot.slane %v6755_v17, %v8494_v3  ;;  %v4664_v9 = vrot.slane %v6755_v17, %v8497_v5  ;;  %v5606_v32 = vmul.f32 0.5, %v4584_v4  ;;  %v5605_v30 = vmul.f32 0.5, %v4545_v20 }
 0x417   :  { %v5157_v24 = vrot.slane %v6820_v19, %v8494_v3  ;;  %v5607_v26 = vmul.f32 0.5, %v4586_v22  ;;  %8151 = vtanh.f32 %v5604_v25 }
 0x418   :  { %8153 = vtanh.f32 %v5606_v32 }
 0x419   :  { %8155 = vtanh.f32 %v5605_v30 }
 0x41a   :  { %8157 = vtanh.f32 %v5607_v26 }
 0x421   :  { %v8152_v17 = vpop.eup %8151 }
 0x422   :  { %v8154_v19 = vpop.eup %8153  ;;  %v5612_v20 = vmul.f32 0.5, %v8152_v17 }
 0x423   :  { %v8156_v12 = vpop.eup %8155 }
 0x424   :  { %v8158_v4 = vpop.eup %8157  ;;  %v5616_v25 = vadd.f32 0.5, %v5612_v20 }
 0x452   :  { %v5031_v61 = vpop.f32.mrb[36].mxu0 }
 0x453   :  { %v5072_v62 = vpop.f32.mrb[36].mxu1  ;;  %v5033_v0 = vpop.f32.mrb[37].mxu0  ;;  %v5032_v15 = vadd.f32 %v5031_v61, %v4660_v33  ;;  %v5614_v33 = vmul.f32 0.5, %v8154_v19 }
 0x454   :  { %v5074_v40 = vpop.f32.mrb[37].mxu1  ;;  %v5035_v42 = vpop.f32.mrb[38].mxu0  ;;  %v5073_v31 = vadd.f32 %v5072_v62, %v4668_v34  ;;  %v5034_v37 = vadd.f32 %v5033_v0, %v4664_v9  ;;  %v5613_v34 = vmul.f32 0.5, %v8156_v12 }
 0x455   :  { %v5076_v1 = vpop.f32.mrb[38].mxu1  ;;  %v5036_v2 = vpop.f32.mrb[39].mxu0  ;;  %v5075_v44 = vadd.f32 %v5074_v40, %v4672_v14  ;;  %v5618_v30 = vadd.f32 0.5, %v5614_v33 }
 0x456   :  { %v5077_v6 = vpop.f32.mrb[39].mxu1 }
 0x492   :  { %v5520_v13 = vpop.f32.mrb[40].mxu0 }
 0x493   :  { %v5521_v27 = vadd.f32 %v5520_v13, %v5149_v23  ;;  %v5561_v28 = vpop.f32.mrb[40].mxu1  ;;  %v5522_v29 = vpop.f32.mrb[41].mxu0 }
 0x494   :  { %v5562_v38 = vadd.f32 %v5561_v28, %v5157_v24  ;;  %v5523_v41 = vadd.f32 %v5522_v29, %v5153_v35  ;;  %v5563_v3 = vpop.f32.mrb[41].mxu1  ;;  %v5524_v43 = vpop.f32.mrb[42].mxu0  ;;  %v5615_v35 = vmul.f32 0.5, %v8158_v4 }
 0x495   :  { %v5568_v49 = vsub.f32 %v5032_v15, %v5521_v27  ;;  %v5572_v18 = vadd.f32 %v5521_v27, %v5032_v15  ;;  %v5564_v45 = vadd.f32 %v5563_v3, %v5161_v21  ;;  %v5565_v8 = vpop.f32.mrb[42].mxu1  ;;  %v5525_v50 = vpop.f32.mrb[43].mxu0  ;;  %v5617_v27 = vadd.f32 0.5, %v5613_v34 }
 0x496   :  { %v5570_v54 = vsub.f32 %v5073_v31, %v5562_v38  ;;  %v5574_v51 = vadd.f32 %v5562_v38, %v5073_v31  ;;  %v5569_v55 = vsub.f32 %v5034_v37, %v5523_v41  ;;  %v5573_v46 = vadd.f32 %v5523_v41, %v5034_v37  ;;  %v5566_v52 = vpop.f32.mrb[43].mxu1 }
 0x497   :  { %v5576_v53 = vmax.f32 %v5572_v18, 0.0  ;;  %v5580_v56 = vmul.f32 %v5568_v49, %v5568_v49  ;;  %v5571_v58 = vsub.f32 %v5075_v44, %v5564_v45  ;;  %v5575_v59 = vadd.f32 %v5564_v45, %v5075_v44  ;;  %v91_v45 = vld [vmem:[%s8676_s8] ss:$4 sm:$0x3] }
 0x498   :  { %v5578_v60 = vmax.f32 %v5574_v51, 0.0  ;;  %v5582_v61 = vmul.f32 %v5570_v54, %v5570_v54  ;;  %v5577_v62 = vmax.f32 %v5573_v46, 0.0  ;;  %v5581_v0 = vmul.f32 %v5569_v55, %v5569_v55 }
 0x499   :  { %v5584_v40 = vsub.f32 %v5576_v53, %v5580_v56  ;;  %v5579_v42 = vmax.f32 %v5575_v59, 0.0  ;;  %v5583_v1 = vmul.f32 %v5571_v58, %v5571_v58  ;;  %v5619_v31 = vadd.f32 0.5, %v5615_v35  ;;  %v6166_v59 = vld [vmem:[%s8676_s8 + $0x1] ss:$4 sm:$0x3] }
 0x49a   :  { %v5586_v2 = vsub.f32 %v5578_v60, %v5582_v61  ;;  %v5585_v6 = vsub.f32 %v5577_v62, %v5581_v0  ;;  %v6100_v52 = vrot.slane %v91_v45, %v8488_v63  ;;  %v6104_v60 = vrot.slane %v91_v45, %v8497_v5 }
 0x49b   :  { %v5588_v7 = vmul.f32 0.5, %v5584_v40  ;;  %v5587_v10 = vsub.f32 %v5579_v42, %v5583_v1  ;;  %v6115_v42 = vrot.slane %v6166_v59, %v8488_v63 }
 0x49c   :  { %v5590_v11 = vmul.f32 0.5, %v5586_v2  ;;  %v5589_v16 = vmul.f32 0.5, %v5585_v6  ;;  %v6119_v2 = vrot.slane %v6166_v59, %v8497_v5  ;;  %v6141_v5 = vand.u32 127, %v161_v47 }
 0x49d   :  { %8159 = vtanh.f32 %v5588_v7  ;;  %v5591_v48 = vmul.f32 0.5, %v5587_v10 }
 0x49e   :  { %8161 = vtanh.f32 %v5590_v11  ;;  %v6144_v20 = vsub.s32 %v6141_v5, %v8482_v57 }
 0x49f   :  { %8163 = vtanh.f32 %v5589_v16 }
 0x4a0   :  { %8165 = vtanh.f32 %v5591_v48  ;;  %v8295_v48 = vmov 0  }
 0x4a1   :  { %6960 = vset.pattern.permute.xlu0 %v8295_v48 }
 0x4a7   :  { %v8160_v22 = vpop.eup %8159 }
 0x4a8   :  { %v8162_v23 = vpop.eup %8161  ;;  %v5596_v9 = vmul.f32 0.5, %v8160_v22 }
 0x4a9   :  { %v8164_v24 = vpop.eup %8163  ;;  %v5598_v14 = vmul.f32 0.5, %v8162_v23 }
 0x4aa   :  { %v8166_v21 = vpop.eup %8165  ;;  %v5600_v32 = vadd.f32 0.5, %v5596_v9  ;;  %v5597_v13 = vmul.f32 0.5, %v8164_v24 }
 0x4ab   :  { %v5602_v26 = vadd.f32 0.5, %v5598_v14  ;;  %v5599_v15 = vmul.f32 0.5, %v8166_v21 }
 0x4ac   :  { %v5601_v28 = vadd.f32 0.5, %v5597_v13  ;;  %v5620_v29 = vmul.f32 %v5616_v25, %v5600_v32 }
 0x4ad   :  { %v5603_v37 = vadd.f32 0.5, %v5599_v15  ;;  %v5622_v38 = vmul.f32 %v5618_v30, %v5602_v26 }
 0x4ae   :  { %v5621_v41 = vmul.f32 %v5617_v27, %v5601_v28  ;;  %v5624_v49 = vpack.c.bf16 %v5620_v29, %v5620_v29 }
 0x4af   :  { %v5623_v3 = vmul.f32 %v5619_v31, %v5603_v37  ;;  %v5626_v18 = vpack.c.bf16 %v5622_v38, %v5622_v38 }
 0x4b0   :  { %v5625_v43 = vpack.c.bf16 %v5621_v41, %v5621_v41 }
 0x4b1   :  { %v5627_v44 = vpack.c.bf16 %v5623_v3, %v5623_v3 }
 0x4b2   :  { %6044 = vmatprep.mubr.bf16.mxu0 %v5625_v43 }
 0x4b3   :  { %6085 = vmatprep.mubr.bf16.mxu1 %v5627_v44  ;;  %6045 = vmatmul.mubr.bf16.vlgmr.msra.gmra.mrb[44].mxu0 %v5624_v49 }
 0x4b4   :  { %6086 = vmatmul.mubr.bf16.vlgmr.msra.gmra.mrb[44].mxu1 %v5626_v18 }
 0x586   :  { %v6046_v8 = vpop.f32.mrb[44].mxu0 }
 0x587   :  { %v6087_v50 = vpop.f32.mrb[44].mxu1  ;;  %v6048_v54 = vpop.f32.mrb[45].mxu0 }
 0x588   :  { %v6088_v51 = vadd.f32 %v6087_v50, %v6046_v8  ;;  %v6089_v55 = vpop.f32.mrb[45].mxu1  ;;  %v6050_v46 = vpop.f32.mrb[46].mxu0 }
 0x589   :  { %v6090_v53 = vadd.f32 %v6089_v55, %v6048_v54  ;;  %v6091_v56 = vpop.f32.mrb[46].mxu1  ;;  %v6051_v58 = vpop.f32.mrb[47].mxu0 }
 0x58a   :  { %v6094_v61 = vadd.f32 %v6088_v51, %v8602_v36  ;;  %v6092_v62 = vpop.f32.mrb[47].mxu1  ;;  %v6949_v36 = vld [vmem:[%s8676_s8 + $0x2] ss:$0 sm:$0xff]  ;;  %s8257_s8 = scalar_lea.vmem %s6156_s0, 16 }
 0x58b   :  { %v6095_v0 = vadd.f32 %v6090_v53, %v8604_v39  ;;  %p8258_p4 = scmp.ne.s32.totalorder %s6156_s0, %s8257_s8  ;;  %p8263_p6 = scmp.lt.s32.totalorder %s8261_s17, %s8257_s8 }
 0x58c   :  { %v6107_v40 = vadd.f32 %v6100_v52, %v6094_v61 }
 0x58d   :  { %v6108_v1 = vadd.f32 %v6104_v60, %v6095_v0  ;;  %p8264_p7 = por %p8263_p6, %p8262_p5 }
 0x58e   :  { %v6109_v6 = vmax.f32 %v6107_v40, 0.0 }
 0x58f   :  { %v6110_v7 = vmax.f32 %v6108_v1, 0.0  ;;  %p8265_p8 = pnand %p8264_p7, %p8258_p4 }
 0x590   :  { %v6122_v10 = vmul.f32 %v6115_v42, %v6109_v6 }
 0x591   :  { %v6123_v11 = vmul.f32 %v6119_v2, %v6110_v7 }
 0x593   :  { %v6124_v16 = vadd.f32 %v6123_v11, %v6122_v10 }
 0x595   :  { %6125 = vadd.xlane.f32.xlu0 %v6124_v16 }
 0x622   :  { %v6126_v17 = vpop.xlane.xlu0 %6125 }
 0x623   :  { %v6131_v39 = vadd.f32 %v6949_v36, %v6126_v17 }
 0x625   :  { %v6132_v19 = vmul.f32 0.5, %v6131_v39 }
 0x627   :  { %8167 = vtanh.f32 %v6132_v19 }
 0x631   :  { %v8168_v63 = vpop.eup %8167 }
 0x632   :  { %v6134_v12 = vmul.f32 0.5, %v8168_v63 }
 0x634   :  { %v6135_v4 = vadd.f32 0.5, %v6134_v12 }
 0x636   :  { %6138 = vperm.xlu0 %6960, %v6135_v4  }
 0x6b5   :  { %v6139_v22 = vpop.permute.xlu0 %6138 }
 0x6b6   :  { %v6145_v33 = vrot.slane %v6139_v22, %v6144_v20 }
 0x6b8   :  { %6148 = vst.msk [vmem:[#allocation10] sm:$0x1] %vm6147_vm0, %v6145_v33 }
 0x6b9   :  { %8268 = shalt.err (!%p8265_p8)
}
 0x6ba   :  { %s8269_s2 = scalar_lea.hbm %s8677_s9, 16 }
 0x6bb   :  { %p8270_p9 = scmp.ne.s32.totalorder %s8677_s9, %s8269_s2  ;;  %p8273_p10 = scmp.lt.u32.totalorder %s8269_s2, %s8677_s9 }
 0x6bd   :  { %p8275_p11 = pnand %p8273_p10, %p8270_p9 }
 0x6bf   :  { %8278 = shalt.err (!%p8275_p11)
}
 0x6c0   :  { %6158 = dma.vmem_to_hbm [thread:$0]  %s6156_s0, 16, %s8677_s9, [#allocation4]  }
 0x6c1   :  { %8285 = dma.done.wait [#allocation4], 16  }
 0x6c2   :  { %8286 = vsyncadd [#allocation4], 4294967280 }
 0x6c3   :  { %6162 = vsyncpa [#allocation3], 1 }
 0x6c4   :  { %6163 = vsyncpa [#allocation6], 1 }
 0x6c5   :  { %6164 = vsyncpa [#allocation9], 1 }
 0x6c6   :  { %6165 = vsyncpa [#allocation4], 1 }

</bundles_post_ra>
